<compile_context>
chip_gen: v7x
topology: tpu7x:2x2x1
jax: 0.10.0
libtpu: 0.0.40
codegen_flags: <defaults>
</compile_context>

<pallas_src>
import functools
import math

import jax
import jax.numpy as jnp
from jax.experimental import pallas as pl
from jax.experimental.pallas import tpu as pltpu


# ----------------------------- kernel helpers -----------------------------

def _round_up(x, m):
    return (x + m - 1) // m * m


def _layer_norm(v, g, b, eps=1e-5):
    mu = jnp.mean(v, axis=-1, keepdims=True)
    var = jnp.mean((v - mu) ** 2, axis=-1, keepdims=True)
    return (v - mu) * jax.lax.rsqrt(var + eps) * g + b


def _gelu(x):
    # TODO(synk): tanh approximation of GELU; PyTorch nn.GELU default is exact erf.
    c = math.sqrt(2.0 / math.pi)
    return 0.5 * x * (1.0 + jnp.tanh(c * (x + 0.044715 * x * x * x)))


# --------------------------------- kernel ---------------------------------

def vit_kernel(patches_ref, wp_ref, bp_ref, cls_ref, pos_ref,
               ln1g_ref, ln1b_ref, wq_ref, bq_ref, wk_ref, bk_ref,
               wv_ref, bv_ref, wo_ref, bo_ref, ln2g_ref, ln2b_ref,
               w1_ref, b1_ref, w2_ref, b2_ref,
               lnfg_ref, lnfb_ref, wh_ref, bh_ref,
               out_ref, xbuf, *, n_heads):
    l = pl.program_id(1)
    n_layers = pl.num_programs(1)
    S, D = xbuf.shape
    H = n_heads
    hd = D // H
    scale = jnp.float32(1.0 / math.sqrt(hd))
    bf16 = jnp.bfloat16

    # --- first layer step: patch embedding, cls token, positional encoding ---
    @pl.when(l == 0)
    def _embed():
        emb = jnp.dot(patches_ref[...].astype(bf16), wp_ref[...],
                      preferred_element_type=jnp.float32) + bp_ref[...]     # (N, D)
        tok = jnp.concatenate([cls_ref[...], emb], axis=0)                  # (S, D)
        xbuf[...] = tok + pos_ref[...]

    # --- one pre-LN encoder layer (this layer's weights streamed into VMEM) ---
    x = xbuf[...]                                                           # (S, D) f32
    h = _layer_norm(x, ln1g_ref[...], ln1b_ref[...]).astype(bf16)
    q = jnp.dot(h, wq_ref[...], preferred_element_type=jnp.float32) + bq_ref[...]
    k = jnp.dot(h, wk_ref[...], preferred_element_type=jnp.float32) + bk_ref[...]
    v = jnp.dot(h, wv_ref[...], preferred_element_type=jnp.float32) + bv_ref[...]

    # head-batched attention: (S, D) -> (H, S, hd), batched einsums, one
    # lane-dense merge back to (S, D) (no per-head loop / masked narrow stores)
    qh = q.reshape(S, H, hd).transpose(1, 0, 2).astype(bf16)
    kh = k.reshape(S, H, hd).transpose(1, 0, 2).astype(bf16)
    vh = v.reshape(S, H, hd).transpose(1, 0, 2).astype(bf16)
    s = jnp.einsum('hqe,hke->hqk', qh, kh,
                   preferred_element_type=jnp.float32) * scale
    s = s - jnp.max(s, axis=-1, keepdims=True)
    p = jnp.exp(s)
    p = p * pl.reciprocal(jnp.sum(p, axis=-1, keepdims=True), approx=True)
    ctx = jnp.einsum('hqk,hke->hqe', p.astype(bf16), vh,
                     preferred_element_type=jnp.float32)
    ctx = ctx.transpose(1, 0, 2).reshape(S, D)

    attn = jnp.dot(ctx.astype(bf16), wo_ref[...],
                   preferred_element_type=jnp.float32) + bo_ref[...]
    x = x + attn
    # TODO(synk): dropout (p=0.5) omitted -- eval/inference semantics.

    h2 = _layer_norm(x, ln2g_ref[...], ln2b_ref[...]).astype(bf16)
    m = _gelu(jnp.dot(h2, w1_ref[...],
                      preferred_element_type=jnp.float32) + b1_ref[...])
    x = x + jnp.dot(m.astype(bf16), w2_ref[...],
                    preferred_element_type=jnp.float32) + b2_ref[...]
    xbuf[...] = x                                     # carry residual stream

    # --- last layer step: final LayerNorm on cls token + classification head ---
    @pl.when(l == n_layers - 1)
    def _head():
        cls_n = _layer_norm(x[0:1, :], lnfg_ref[...], lnfb_ref[...])
        out_ref[...] = jnp.dot(cls_n.astype(bf16), wh_ref[...],
                               preferred_element_type=jnp.float32) + bh_ref[...]


# -------------------------------- wrapper ---------------------------------

def vit_forward(x, params, *, patch_size, n_heads, n_layers):
    B, C, H, W = x.shape
    nh, nw = H // patch_size, W // patch_size
    N = nh * nw
    D = params['w_patch'].shape[1]
    M = params['w_mlp1'].shape[2]
    n_classes = params['w_head'].shape[1]
    S = N + 1

    # glue: extract flattened non-overlapping patches (B, N, C*p*p),
    # patch vector ordered (c, ph, pw) to match Conv2d weight flattening.
    xp = x.reshape(B, C, nh, patch_size, nw, patch_size)
    xp = xp.transpose(0, 2, 4, 1, 3, 5).reshape(B, N, C * patch_size * patch_size)
    xp = xp.astype(jnp.float32)

    # pad patch-embedding contraction dim to a multiple of 128
    P = C * patch_size * patch_size
    Ppad = _round_up(P, 128)
    xp = jnp.pad(xp, ((0, 0), (0, 0), (0, Ppad - P)))
    w_patch = jnp.pad(params['w_patch'], ((0, Ppad - P), (0, 0)))

    # pad classifier output lanes to 128 (unmasked stores); slice on host
    Cpad = _round_up(n_classes, 128)
    w_head = jnp.pad(params['w_head'], ((0, 0), (0, Cpad - n_classes)))
    b_head = jnp.pad(params['b_head'], ((0, 0), (0, Cpad - n_classes)))

    bf16 = jnp.bfloat16
    args = [
        xp,
        w_patch.astype(bf16), params['b_patch'], params['cls'], params['pos'],
        params['ln1_g'], params['ln1_b'],
        params['w_q'].astype(bf16), params['b_q'],
        params['w_k'].astype(bf16), params['b_k'],
        params['w_v'].astype(bf16), params['b_v'],
        params['w_o'].astype(bf16), params['b_o'],
        params['ln2_g'], params['ln2_b'],
        params['w_mlp1'].astype(bf16), params['b_mlp1'],
        params['w_mlp2'].astype(bf16), params['b_mlp2'],
        params['lnf_g'], params['lnf_b'],
        w_head.astype(bf16), b_head,
    ]

    def fixed(shape):        # loaded once: same block index every grid step
        zeros = (0,) * len(shape)
        return pl.BlockSpec(shape, lambda b, l: zeros)

    def per_layer(shape):    # stream one layer's slice per inner grid step
        zeros = (0,) * len(shape)
        return pl.BlockSpec((None,) + shape, lambda b, l: (l,) + zeros)

    in_specs = [
        pl.BlockSpec((None, N, Ppad), lambda b, l: (b, 0, 0)),     # patches (per image)
        fixed((Ppad, D)), fixed((1, D)), fixed((1, D)), fixed((S, D)),
        per_layer((1, D)), per_layer((1, D)),                      # ln1
        per_layer((D, D)), per_layer((1, D)),                      # q
        per_layer((D, D)), per_layer((1, D)),                      # k
        per_layer((D, D)), per_layer((1, D)),                      # v
        per_layer((D, D)), per_layer((1, D)),                      # o
        per_layer((1, D)), per_layer((1, D)),                      # ln2
        per_layer((D, M)), per_layer((1, M)),                      # mlp1
        per_layer((M, D)), per_layer((1, D)),                      # mlp2
        fixed((1, D)), fixed((1, D)),                              # final LN
        fixed((D, Cpad)), fixed((1, Cpad)),                        # head
    ]

    kernel = functools.partial(vit_kernel, n_heads=n_heads)
    out = pl.pallas_call(
        kernel,
        out_shape=jax.ShapeDtypeStruct((B, 1, Cpad), jnp.float32),
        grid=(B, n_layers),
        in_specs=in_specs,
        out_specs=pl.BlockSpec((None, 1, Cpad), lambda b, l: (b, 0, 0)),
        scratch_shapes=[pltpu.VMEM((S, D), jnp.float32)],          # residual stream
        compiler_params=pltpu.CompilerParams(
            dimension_semantics=("parallel", "arbitrary"),
            vmem_limit_bytes=64 * 1024 * 1024),
    )(*args)
    return out[:, 0, :n_classes]


# ----------------------- deterministic parameter init ----------------------

def get_positional_encoding(seq_len, hidden_dim):
    pos = jnp.arange(seq_len, dtype=jnp.float32)[:, None]
    i = jnp.arange(hidden_dim, dtype=jnp.float32)[None, :]
    angle = pos / jnp.power(10000.0, (2.0 * jnp.floor(i / 2.0)) / hidden_dim)
    even = (jnp.arange(hidden_dim) % 2 == 0)[None, :]
    return jnp.where(even, jnp.sin(angle), jnp.cos(angle)).astype(jnp.float32)


def init_params(key, *, in_chans, patch_size, hidden_dim, mlp_hidden_dim,
                n_layers, n_classes, n_patches):
    P = in_chans * patch_size * patch_size
    D, M, L = hidden_dim, mlp_hidden_dim, n_layers
    S = n_patches + 1
    keys = jax.random.split(key, 8)
    scl = 0.02

    def rnd(k, shape):
        return jax.random.normal(k, shape, jnp.float32) * scl

    return dict(
        w_patch=rnd(keys[0], (P, D)), b_patch=jnp.zeros((1, D), jnp.float32),
        cls=jnp.zeros((1, D), jnp.float32),          # nn.Parameter(torch.zeros(1, D))
        pos=get_positional_encoding(S, D),
        ln1_g=jnp.ones((L, 1, D), jnp.float32), ln1_b=jnp.zeros((L, 1, D), jnp.float32),
        w_q=rnd(keys[1], (L, D, D)), b_q=jnp.zeros((L, 1, D), jnp.float32),
        w_k=rnd(keys[2], (L, D, D)), b_k=jnp.zeros((L, 1, D), jnp.float32),
        w_v=rnd(keys[3], (L, D, D)), b_v=jnp.zeros((L, 1, D), jnp.float32),
        w_o=rnd(keys[4], (L, D, D)), b_o=jnp.zeros((L, 1, D), jnp.float32),
        ln2_g=jnp.ones((L, 1, D), jnp.float32), ln2_b=jnp.zeros((L, 1, D), jnp.float32),
        w_mlp1=rnd(keys[5], (L, D, M)), b_mlp1=jnp.zeros((L, 1, M), jnp.float32),
        w_mlp2=rnd(keys[6], (L, M, D)), b_mlp2=jnp.zeros((L, 1, D), jnp.float32),
        lnf_g=jnp.ones((1, D), jnp.float32), lnf_b=jnp.zeros((1, D), jnp.float32),
        w_head=rnd(keys[7], (D, n_classes)), b_head=jnp.zeros((1, n_classes), jnp.float32),
    )


# ---------------------------------- main -----------------------------------

if __name__ == "__main__":
    B, C, H, W = 2, 3, 16, 16
    patch_size = 8
    hidden_dim, mlp_hidden = 128, 256
    n_heads, n_layers, n_classes = 4, 2, 10
    n_patches = (W // patch_size) ** 2

    key = jax.random.PRNGKey(0)
    kx, kp = jax.random.split(key)
    x = jax.random.normal(kx, (B, C, H, W), jnp.float32)
    params = init_params(kp, in_chans=C, patch_size=patch_size,
                         hidden_dim=hidden_dim, mlp_hidden_dim=mlp_hidden,
                         n_layers=n_layers, n_classes=n_classes,
                         n_patches=n_patches)

    out = vit_forward(x, params, patch_size=patch_size,
                      n_heads=n_heads, n_layers=n_layers)
    jax.block_until_ready(out)
    assert out.shape == (B, n_classes) and out.dtype == jnp.float32
    print("KERNEL_OK")
</pallas_src>

<mosaic_0001>
module attributes {stable_mosaic.version = 11 : i64} {
  func.func @vit_kernel(%arg0: i32, %arg1: i32, %arg2: memref<1x4x256xf32, #tpu.memory_space<vmem>>, %arg3: memref<256x128xbf16, #tpu.memory_space<vmem>>, %arg4: memref<1x128xf32, #tpu.memory_space<vmem>>, %arg5: memref<1x128xf32, #tpu.memory_space<vmem>>, %arg6: memref<5x128xf32, #tpu.memory_space<vmem>>, %arg7: memref<1x1x128xf32, #tpu.memory_space<vmem>>, %arg8: memref<1x1x128xf32, #tpu.memory_space<vmem>>, %arg9: memref<1x128x128xbf16, #tpu.memory_space<vmem>>, %arg10: memref<1x1x128xf32, #tpu.memory_space<vmem>>, %arg11: memref<1x128x128xbf16, #tpu.memory_space<vmem>>, %arg12: memref<1x1x128xf32, #tpu.memory_space<vmem>>, %arg13: memref<1x128x128xbf16, #tpu.memory_space<vmem>>, %arg14: memref<1x1x128xf32, #tpu.memory_space<vmem>>, %arg15: memref<1x128x128xbf16, #tpu.memory_space<vmem>>, %arg16: memref<1x1x128xf32, #tpu.memory_space<vmem>>, %arg17: memref<1x1x128xf32, #tpu.memory_space<vmem>>, %arg18: memref<1x1x128xf32, #tpu.memory_space<vmem>>, %arg19: memref<1x128x256xbf16, #tpu.memory_space<vmem>>, %arg20: memref<1x1x256xf32, #tpu.memory_space<vmem>>, %arg21: memref<1x256x128xbf16, #tpu.memory_space<vmem>>, %arg22: memref<1x1x128xf32, #tpu.memory_space<vmem>>, %arg23: memref<1x128xf32, #tpu.memory_space<vmem>>, %arg24: memref<1x128xf32, #tpu.memory_space<vmem>>, %arg25: memref<128x128xbf16, #tpu.memory_space<vmem>>, %arg26: memref<1x128xf32, #tpu.memory_space<vmem>>, %arg27: memref<1x1x128xf32, #tpu.memory_space<vmem>>, %arg28: memref<5x128xf32, #tpu.memory_space<vmem>>) attributes {dimension_semantics = [#tpu.dimension_semantics<parallel>, #tpu.dimension_semantics<arbitrary>], iteration_bounds = array<i64: 2, 2>, scalar_prefetch = 0 : i64, scratch_operands = 1 : i64, tpu.core_type = #tpu.core_type<tc>, window_params = [{transform_indices = @transform_0, window_bounds = array<i64: 1, 4, 256>}, {pipeline_mode = #tpu.pipeline_mode<synchronous>, transform_indices = @transform_1, window_bounds = array<i64: 256, 128>}, {pipeline_mode = #tpu.pipeline_mode<synchronous>, transform_indices = @transform_2, window_bounds = array<i64: 1, 128>}, {pipeline_mode = #tpu.pipeline_mode<synchronous>, transform_indices = @transform_3, window_bounds = array<i64: 1, 128>}, {pipeline_mode = #tpu.pipeline_mode<synchronous>, transform_indices = @transform_4, window_bounds = array<i64: 5, 128>}, {transform_indices = @transform_5, window_bounds = array<i64: 1, 1, 128>}, {transform_indices = @transform_6, window_bounds = array<i64: 1, 1, 128>}, {transform_indices = @transform_7, window_bounds = array<i64: 1, 128, 128>}, {transform_indices = @transform_8, window_bounds = array<i64: 1, 1, 128>}, {transform_indices = @transform_9, window_bounds = array<i64: 1, 128, 128>}, {transform_indices = @transform_10, window_bounds = array<i64: 1, 1, 128>}, {transform_indices = @transform_11, window_bounds = array<i64: 1, 128, 128>}, {transform_indices = @transform_12, window_bounds = array<i64: 1, 1, 128>}, {transform_indices = @transform_13, window_bounds = array<i64: 1, 128, 128>}, {transform_indices = @transform_14, window_bounds = array<i64: 1, 1, 128>}, {transform_indices = @transform_15, window_bounds = array<i64: 1, 1, 128>}, {transform_indices = @transform_16, window_bounds = array<i64: 1, 1, 128>}, {transform_indices = @transform_17, window_bounds = array<i64: 1, 128, 256>}, {transform_indices = @transform_18, window_bounds = array<i64: 1, 1, 256>}, {transform_indices = @transform_19, window_bounds = array<i64: 1, 256, 128>}, {transform_indices = @transform_20, window_bounds = array<i64: 1, 1, 128>}, {pipeline_mode = #tpu.pipeline_mode<synchronous>, transform_indices = @transform_21, window_bounds = array<i64: 1, 128>}, {pipeline_mode = #tpu.pipeline_mode<synchronous>, transform_indices = @transform_22, window_bounds = array<i64: 1, 128>}, {pipeline_mode = #tpu.pipeline_mode<synchronous>, transform_indices = @transform_23, window_bounds = array<i64: 128, 128>}, {pipeline_mode = #tpu.pipeline_mode<synchronous>, transform_indices = @transform_24, window_bounds = array<i64: 1, 128>}, {transform_indices = @transform_25, window_bounds = array<i64: 1, 1, 128>}]} {
    %c0_i32 = arith.constant 0 : i32
    %0 = arith.cmpi eq, %arg1, %c0_i32 : i32
    %1 = arith.extui %0 : i1 to i32
    %c0_i32_0 = arith.constant 0 : i32
    %2 = arith.cmpi ne, %1, %c0_i32_0 : i32
    scf.if %2 {
      %c0_77 = arith.constant 0 : index
      %c0_78 = arith.constant 0 : index
      %c0_79 = arith.constant 0 : index
      %147 = vector.load %arg2[%c0_77, %c0_78, %c0_79] : memref<1x4x256xf32, #tpu.memory_space<vmem>>, vector<1x4x256xf32>
      %148 = vector.shape_cast %147 : vector<1x4x256xf32> to vector<4x256xf32>
      %149 = arith.truncf %148 : vector<4x256xf32> to vector<4x256xbf16>
      %c0_80 = arith.constant 0 : index
      %c0_81 = arith.constant 0 : index
      %150 = vector.load %arg3[%c0_80, %c0_81] : memref<256x128xbf16, #tpu.memory_space<vmem>>, vector<256x128xbf16>
      %cst_82 = arith.constant dense<0.000000e+00> : vector<4x128xf32>
      %151 = tpu.matmul %149, %150, %cst_82 {dimension_numbers = #tpu.dot_dimension_numbers<[1], [0], [0], [1], [0, 0, 1, 1], [], []>} : vector<4x256xbf16>, vector<256x128xbf16>, vector<4x128xf32> -> vector<4x128xf32>
      %c0_83 = arith.constant 0 : index
      %c0_84 = arith.constant 0 : index
      %152 = vector.load %arg4[%c0_83, %c0_84] : memref<1x128xf32, #tpu.memory_space<vmem>>, vector<1x128xf32>
      %153 = vector.broadcast %152 : vector<1x128xf32> to vector<4x128xf32>
      %154 = arith.addf %151, %153 : vector<4x128xf32>
      %c0_85 = arith.constant 0 : index
      %c0_86 = arith.constant 0 : index
      %155 = vector.load %arg5[%c0_85, %c0_86] : memref<1x128xf32, #tpu.memory_space<vmem>>, vector<1x128xf32>
      %156 = tpu.concatenate %155, %154 in 0 : vector<1x128xf32>, vector<4x128xf32> -> vector<5x128xf32>
      %c0_87 = arith.constant 0 : index
      %c0_88 = arith.constant 0 : index
      %157 = vector.load %arg6[%c0_87, %c0_88] : memref<5x128xf32, #tpu.memory_space<vmem>>, vector<5x128xf32>
      %158 = arith.addf %156, %157 : vector<5x128xf32>
      %c0_89 = arith.constant 0 : index
      %c0_90 = arith.constant 0 : index
      %159 = vector.load %arg28[%c0_89, %c0_90] : memref<5x128xf32, #tpu.memory_space<vmem>>, vector<5x128xf32>
      tpu.vector_store %arg28[%c0_89, %c0_90], %158 {strides = array<i32>} : memref<5x128xf32, #tpu.memory_space<vmem>>, vector<5x128xf32>,
    } else {
    }
    %c0 = arith.constant 0 : index
    %c0_1 = arith.constant 0 : index
    %3 = vector.load %arg28[%c0, %c0_1] : memref<5x128xf32, #tpu.memory_space<vmem>>, vector<5x128xf32>
    %c0_2 = arith.constant 0 : index
    %c0_3 = arith.constant 0 : index
    %c0_4 = arith.constant 0 : index
    %4 = vector.load %arg7[%c0_2, %c0_3, %c0_4] : memref<1x1x128xf32, #tpu.memory_space<vmem>>, vector<1x1x128xf32>
    %5 = vector.shape_cast %4 : vector<1x1x128xf32> to vector<1x128xf32>
    %c0_5 = arith.constant 0 : index
    %c0_6 = arith.constant 0 : index
    %c0_7 = arith.constant 0 : index
    %6 = vector.load %arg8[%c0_5, %c0_6, %c0_7] : memref<1x1x128xf32, #tpu.memory_space<vmem>>, vector<1x1x128xf32>
    %7 = vector.shape_cast %6 : vector<1x1x128xf32> to vector<1x128xf32>
    %cst = arith.constant dense<0.000000e+00> : vector<5xf32>
    %8 = vector.multi_reduction <add>, %3, %cst [1] : vector<5x128xf32> to vector<5xf32>
    %9 = vector.shape_cast %8 : vector<5xf32> to vector<5x1xf32>
    %cst_8 = arith.constant 1.280000e+02 : f32
    %10 = vector.broadcast %cst_8 : f32 to vector<5x1xf32>
    %11 = arith.divf %9, %10 : vector<5x1xf32>
    %12 = vector.broadcast %11 : vector<5x1xf32> to vector<5x128xf32>
    %13 = arith.subf %3, %12 : vector<5x128xf32>
    %14 = arith.mulf %13, %13 : vector<5x128xf32>
    %cst_9 = arith.constant dense<0.000000e+00> : vector<5xf32>
    %15 = vector.multi_reduction <add>, %14, %cst_9 [1] : vector<5x128xf32> to vector<5xf32>
    %16 = vector.shape_cast %15 : vector<5xf32> to vector<5x1xf32>
    %cst_10 = arith.constant 1.280000e+02 : f32
    %17 = vector.broadcast %cst_10 : f32 to vector<5x1xf32>
    %18 = arith.divf %16, %17 : vector<5x1xf32>
    %19 = vector.broadcast %11 : vector<5x1xf32> to vector<5x128xf32>
    %20 = arith.subf %3, %19 : vector<5x128xf32>
    %cst_11 = arith.constant 9.99999974E-6 : f32
    %21 = vector.broadcast %cst_11 : f32 to vector<5x1xf32>
    %22 = arith.addf %18, %21 : vector<5x1xf32>
    %23 = math.rsqrt %22 : vector<5x1xf32>
    %24 = vector.broadcast %23 : vector<5x1xf32> to vector<5x128xf32>
    %25 = arith.mulf %20, %24 : vector<5x128xf32>
    %26 = vector.broadcast %5 : vector<1x128xf32> to vector<5x128xf32>
    %27 = arith.mulf %25, %26 : vector<5x128xf32>
    %28 = vector.broadcast %7 : vector<1x128xf32> to vector<5x128xf32>
    %29 = arith.addf %27, %28 : vector<5x128xf32>
    %30 = arith.truncf %29 : vector<5x128xf32> to vector<5x128xbf16>
    %c0_12 = arith.constant 0 : index
    %c0_13 = arith.constant 0 : index
    %c0_14 = arith.constant 0 : index
    %31 = vector.load %arg9[%c0_12, %c0_13, %c0_14] : memref<1x128x128xbf16, #tpu.memory_space<vmem>>, vector<1x128x128xbf16>
    %32 = vector.shape_cast %31 : vector<1x128x128xbf16> to vector<128x128xbf16>
    %cst_15 = arith.constant dense<0.000000e+00> : vector<5x128xf32>
    %33 = tpu.matmul %30, %32, %cst_15 {dimension_numbers = #tpu.dot_dimension_numbers<[1], [0], [0], [1], [0, 0, 1, 1], [], []>} : vector<5x128xbf16>, vector<128x128xbf16>, vector<5x128xf32> -> vector<5x128xf32>
    %c0_16 = arith.constant 0 : index
    %c0_17 = arith.constant 0 : index
    %c0_18 = arith.constant 0 : index
    %34 = vector.load %arg10[%c0_16, %c0_17, %c0_18] : memref<1x1x128xf32, #tpu.memory_space<vmem>>, vector<1x1x128xf32>
    %35 = vector.shape_cast %34 : vector<1x1x128xf32> to vector<1x128xf32>
    %36 = vector.broadcast %35 : vector<1x128xf32> to vector<5x128xf32>
    %37 = arith.addf %33, %36 : vector<5x128xf32>
    %c0_19 = arith.constant 0 : index
    %c0_20 = arith.constant 0 : index
    %c0_21 = arith.constant 0 : index
    %38 = vector.load %arg11[%c0_19, %c0_20, %c0_21] : memref<1x128x128xbf16, #tpu.memory_space<vmem>>, vector<1x128x128xbf16>
    %39 = vector.shape_cast %38 : vector<1x128x128xbf16> to vector<128x128xbf16>
    %cst_22 = arith.constant dense<0.000000e+00> : vector<5x128xf32>
    %40 = tpu.matmul %30, %39, %cst_22 {dimension_numbers = #tpu.dot_dimension_numbers<[1], [0], [0], [1], [0, 0, 1, 1], [], []>} : vector<5x128xbf16>, vector<128x128xbf16>, vector<5x128xf32> -> vector<5x128xf32>
    %c0_23 = arith.constant 0 : index
    %c0_24 = arith.constant 0 : index
    %c0_25 = arith.constant 0 : index
    %41 = vector.load %arg12[%c0_23, %c0_24, %c0_25] : memref<1x1x128xf32, #tpu.memory_space<vmem>>, vector<1x1x128xf32>
    %42 = vector.shape_cast %41 : vector<1x1x128xf32> to vector<1x128xf32>
    %43 = vector.broadcast %42 : vector<1x128xf32> to vector<5x128xf32>
    %44 = arith.addf %40, %43 : vector<5x128xf32>
    %c0_26 = arith.constant 0 : index
    %c0_27 = arith.constant 0 : index
    %c0_28 = arith.constant 0 : index
    %45 = vector.load %arg13[%c0_26, %c0_27, %c0_28] : memref<1x128x128xbf16, #tpu.memory_space<vmem>>, vector<1x128x128xbf16>
    %46 = vector.shape_cast %45 : vector<1x128x128xbf16> to vector<128x128xbf16>
    %cst_29 = arith.constant dense<0.000000e+00> : vector<5x128xf32>
    %47 = tpu.matmul %30, %46, %cst_29 {dimension_numbers = #tpu.dot_dimension_numbers<[1], [0], [0], [1], [0, 0, 1, 1], [], []>} : vector<5x128xbf16>, vector<128x128xbf16>, vector<5x128xf32> -> vector<5x128xf32>
    %c0_30 = arith.constant 0 : index
    %c0_31 = arith.constant 0 : index
    %c0_32 = arith.constant 0 : index
    %48 = vector.load %arg14[%c0_30, %c0_31, %c0_32] : memref<1x1x128xf32, #tpu.memory_space<vmem>>, vector<1x1x128xf32>
    %49 = vector.shape_cast %48 : vector<1x1x128xf32> to vector<1x128xf32>
    %50 = vector.broadcast %49 : vector<1x128xf32> to vector<5x128xf32>
    %51 = arith.addf %47, %50 : vector<5x128xf32>
    %52 = vector.shape_cast %37 : vector<5x128xf32> to vector<5x4x32xf32>
    %53 = tpu.transpose %52, [1, 0, 2] : vector<5x4x32xf32> -> vector<4x5x32xf32>
    %54 = arith.truncf %53 : vector<4x5x32xf32> to vector<4x5x32xbf16>
    %55 = vector.shape_cast %44 : vector<5x128xf32> to vector<5x4x32xf32>
    %56 = tpu.transpose %55, [1, 0, 2] : vector<5x4x32xf32> -> vector<4x5x32xf32>
    %57 = arith.truncf %56 : vector<4x5x32xf32> to vector<4x5x32xbf16>
    %58 = vector.shape_cast %51 : vector<5x128xf32> to vector<5x4x32xf32>
    %59 = tpu.transpose %58, [1, 0, 2] : vector<5x4x32xf32> -> vector<4x5x32xf32>
    %60 = arith.truncf %59 : vector<4x5x32xf32> to vector<4x5x32xbf16>
    "tpu.trace_start"() <{level = 10 : i32, message = "hqe,hke->hqk"}> : () -> ()
    %cst_33 = arith.constant dense<0.000000e+00> : vector<4x5x5xf32>
    %61 = tpu.matmul %54, %57, %cst_33 {dimension_numbers = #tpu.dot_dimension_numbers<[2], [2], [1], [1], [0, 0, 0, 1, 1, 1], [0], [0]>} : vector<4x5x32xbf16>, vector<4x5x32xbf16>, vector<4x5x5xf32> -> vector<4x5x5xf32>
    "tpu.trace_stop"() : () -> ()
    %cst_34 = arith.constant 0.176776692 : f32
    %62 = vector.broadcast %cst_34 : f32 to vector<4x5x5xf32>
    %63 = arith.mulf %61, %62 : vector<4x5x5xf32>
    %cst_35 = arith.constant dense<0xFF800000> : vector<4x5xf32>
    %64 = vector.multi_reduction <maximumf>, %63, %cst_35 [2] : vector<4x5x5xf32> to vector<4x5xf32>
    %65 = vector.shape_cast %64 : vector<4x5xf32> to vector<4x5x1xf32>
    %66 = vector.broadcast %65 : vector<4x5x1xf32> to vector<4x5x5xf32>
    %67 = arith.subf %63, %66 : vector<4x5x5xf32>
    %68 = math.exp %67 : vector<4x5x5xf32>
    %cst_36 = arith.constant dense<0.000000e+00> : vector<4x5xf32>
    %69 = vector.multi_reduction <add>, %68, %cst_36 [2] : vector<4x5x5xf32> to vector<4x5xf32>
    %70 = vector.shape_cast %69 : vector<4x5xf32> to vector<4x5x1xf32>
    %71 = tpu.reciprocal %70 {approx = true} : vector<4x5x1xf32> -> vector<4x5x1xf32>
    %72 = vector.broadcast %71 : vector<4x5x1xf32> to vector<4x5x5xf32>
    %73 = arith.mulf %68, %72 : vector<4x5x5xf32>
    %74 = arith.truncf %73 : vector<4x5x5xf32> to vector<4x5x5xbf16>
    "tpu.trace_start"() <{level = 10 : i32, message = "hqk,hke->hqe"}> : () -> ()
    %cst_37 = arith.constant dense<0.000000e+00> : vector<4x5x32xf32>
    %75 = tpu.matmul %74, %60, %cst_37 {dimension_numbers = #tpu.dot_dimension_numbers<[2], [1], [1], [2], [0, 0, 0, 1, 1, 2], [0], [0]>} : vector<4x5x5xbf16>, vector<4x5x32xbf16>, vector<4x5x32xf32> -> vector<4x5x32xf32>
    "tpu.trace_stop"() : () -> ()
    %76 = tpu.transpose %75, [1, 0, 2] : vector<4x5x32xf32> -> vector<5x4x32xf32>
    %77 = vector.shape_cast %76 : vector<5x4x32xf32> to vector<5x128xf32>
    %78 = arith.truncf %77 : vector<5x128xf32> to vector<5x128xbf16>
    %c0_38 = arith.constant 0 : index
    %c0_39 = arith.constant 0 : index
    %c0_40 = arith.constant 0 : index
    %79 = vector.load %arg15[%c0_38, %c0_39, %c0_40] : memref<1x128x128xbf16, #tpu.memory_space<vmem>>, vector<1x128x128xbf16>
    %80 = vector.shape_cast %79 : vector<1x128x128xbf16> to vector<128x128xbf16>
    %cst_41 = arith.constant dense<0.000000e+00> : vector<5x128xf32>
    %81 = tpu.matmul %78, %80, %cst_41 {dimension_numbers = #tpu.dot_dimension_numbers<[1], [0], [0], [1], [0, 0, 1, 1], [], []>} : vector<5x128xbf16>, vector<128x128xbf16>, vector<5x128xf32> -> vector<5x128xf32>
    %c0_42 = arith.constant 0 : index
    %c0_43 = arith.constant 0 : index
    %c0_44 = arith.constant 0 : index
    %82 = vector.load %arg16[%c0_42, %c0_43, %c0_44] : memref<1x1x128xf32, #tpu.memory_space<vmem>>, vector<1x1x128xf32>
    %83 = vector.shape_cast %82 : vector<1x1x128xf32> to vector<1x128xf32>
    %84 = vector.broadcast %83 : vector<1x128xf32> to vector<5x128xf32>
    %85 = arith.addf %81, %84 : vector<5x128xf32>
    %86 = arith.addf %3, %85 : vector<5x128xf32>
    %c0_45 = arith.constant 0 : index
    %c0_46 = arith.constant 0 : index
    %c0_47 = arith.constant 0 : index
    %87 = vector.load %arg17[%c0_45, %c0_46, %c0_47] : memref<1x1x128xf32, #tpu.memory_space<vmem>>, vector<1x1x128xf32>
    %88 = vector.shape_cast %87 : vector<1x1x128xf32> to vector<1x128xf32>
    %c0_48 = arith.constant 0 : index
    %c0_49 = arith.constant 0 : index
    %c0_50 = arith.constant 0 : index
    %89 = vector.load %arg18[%c0_48, %c0_49, %c0_50] : memref<1x1x128xf32, #tpu.memory_space<vmem>>, vector<1x1x128xf32>
    %90 = vector.shape_cast %89 : vector<1x1x128xf32> to vector<1x128xf32>
    %cst_51 = arith.constant dense<0.000000e+00> : vector<5xf32>
    %91 = vector.multi_reduction <add>, %86, %cst_51 [1] : vector<5x128xf32> to vector<5xf32>
    %92 = vector.shape_cast %91 : vector<5xf32> to vector<5x1xf32>
    %cst_52 = arith.constant 1.280000e+02 : f32
    %93 = vector.broadcast %cst_52 : f32 to vector<5x1xf32>
    %94 = arith.divf %92, %93 : vector<5x1xf32>
    %95 = vector.broadcast %94 : vector<5x1xf32> to vector<5x128xf32>
    %96 = arith.subf %86, %95 : vector<5x128xf32>
    %97 = arith.mulf %96, %96 : vector<5x128xf32>
    %cst_53 = arith.constant dense<0.000000e+00> : vector<5xf32>
    %98 = vector.multi_reduction <add>, %97, %cst_53 [1] : vector<5x128xf32> to vector<5xf32>
    %99 = vector.shape_cast %98 : vector<5xf32> to vector<5x1xf32>
    %cst_54 = arith.constant 1.280000e+02 : f32
    %100 = vector.broadcast %cst_54 : f32 to vector<5x1xf32>
    %101 = arith.divf %99, %100 : vector<5x1xf32>
    %102 = vector.broadcast %94 : vector<5x1xf32> to vector<5x128xf32>
    %103 = arith.subf %86, %102 : vector<5x128xf32>
    %cst_55 = arith.constant 9.99999974E-6 : f32
    %104 = vector.broadcast %cst_55 : f32 to vector<5x1xf32>
    %105 = arith.addf %101, %104 : vector<5x1xf32>
    %106 = math.rsqrt %105 : vector<5x1xf32>
    %107 = vector.broadcast %106 : vector<5x1xf32> to vector<5x128xf32>
    %108 = arith.mulf %103, %107 : vector<5x128xf32>
    %109 = vector.broadcast %88 : vector<1x128xf32> to vector<5x128xf32>
    %110 = arith.mulf %108, %109 : vector<5x128xf32>
    %111 = vector.broadcast %90 : vector<1x128xf32> to vector<5x128xf32>
    %112 = arith.addf %110, %111 : vector<5x128xf32>
    %113 = arith.truncf %112 : vector<5x128xf32> to vector<5x128xbf16>
    %c0_56 = arith.constant 0 : index
    %c0_57 = arith.constant 0 : index
    %c0_58 = arith.constant 0 : index
    %114 = vector.load %arg19[%c0_56, %c0_57, %c0_58] : memref<1x128x256xbf16, #tpu.memory_space<vmem>>, vector<1x128x256xbf16>
    %115 = vector.shape_cast %114 : vector<1x128x256xbf16> to vector<128x256xbf16>
    %cst_59 = arith.constant dense<0.000000e+00> : vector<5x256xf32>
    %116 = tpu.matmul %113, %115, %cst_59 {dimension_numbers = #tpu.dot_dimension_numbers<[1], [0], [0], [1], [0, 0, 1, 1], [], []>} : vector<5x128xbf16>, vector<128x256xbf16>, vector<5x256xf32> -> vector<5x256xf32>
    %c0_60 = arith.constant 0 : index
    %c0_61 = arith.constant 0 : index
    %c0_62 = arith.constant 0 : index
    %117 = vector.load %arg20[%c0_60, %c0_61, %c0_62] : memref<1x1x256xf32, #tpu.memory_space<vmem>>, vector<1x1x256xf32>
    %118 = vector.shape_cast %117 : vector<1x1x256xf32> to vector<1x256xf32>
    %119 = vector.broadcast %118 : vector<1x256xf32> to vector<5x256xf32>
    %120 = arith.addf %116, %119 : vector<5x256xf32>
    %cst_63 = arith.constant 5.000000e-01 : f32
    %121 = vector.broadcast %cst_63 : f32 to vector<5x256xf32>
    %122 = arith.mulf %121, %120 : vector<5x256xf32>
    %cst_64 = arith.constant 4.471500e-02 : f32
    %123 = vector.broadcast %cst_64 : f32 to vector<5x256xf32>
    %124 = arith.mulf %123, %120 : vector<5x256xf32>
    %125 = arith.mulf %124, %120 : vector<5x256xf32>
    %126 = arith.mulf %125, %120 : vector<5x256xf32>
    %127 = arith.addf %120, %126 : vector<5x256xf32>
    %cst_65 = arith.constant 0.797884583 : f32
    %128 = vector.broadcast %cst_65 : f32 to vector<5x256xf32>
    %129 = arith.mulf %128, %127 : vector<5x256xf32>
    %130 = math.tanh %129 : vector<5x256xf32>
    %cst_66 = arith.constant 1.000000e+00 : f32
    %131 = vector.broadcast %cst_66 : f32 to vector<5x256xf32>
    %132 = arith.addf %131, %130 : vector<5x256xf32>
    %133 = arith.mulf %122, %132 : vector<5x256xf32>
    %134 = arith.truncf %133 : vector<5x256xf32> to vector<5x256xbf16>
    %c0_67 = arith.constant 0 : index
    %c0_68 = arith.constant 0 : index
    %c0_69 = arith.constant 0 : index
    %135 = vector.load %arg21[%c0_67, %c0_68, %c0_69] : memref<1x256x128xbf16, #tpu.memory_space<vmem>>, vector<1x256x128xbf16>
    %136 = vector.shape_cast %135 : vector<1x256x128xbf16> to vector<256x128xbf16>
    %cst_70 = arith.constant dense<0.000000e+00> : vector<5x128xf32>
    %137 = tpu.matmul %134, %136, %cst_70 {dimension_numbers = #tpu.dot_dimension_numbers<[1], [0], [0], [1], [0, 0, 1, 1], [], []>} : vector<5x256xbf16>, vector<256x128xbf16>, vector<5x128xf32> -> vector<5x128xf32>
    %138 = arith.addf %86, %137 : vector<5x128xf32>
    %c0_71 = arith.constant 0 : index
    %c0_72 = arith.constant 0 : index
    %c0_73 = arith.constant 0 : index
    %139 = vector.load %arg22[%c0_71, %c0_72, %c0_73] : memref<1x1x128xf32, #tpu.memory_space<vmem>>, vector<1x1x128xf32>
    %140 = vector.shape_cast %139 : vector<1x1x128xf32> to vector<1x128xf32>
    %141 = vector.broadcast %140 : vector<1x128xf32> to vector<5x128xf32>
    %142 = arith.addf %138, %141 : vector<5x128xf32>
    %c0_74 = arith.constant 0 : index
    %c0_75 = arith.constant 0 : index
    %143 = vector.load %arg28[%c0_74, %c0_75] : memref<5x128xf32, #tpu.memory_space<vmem>>, vector<5x128xf32>
    tpu.vector_store %arg28[%c0_74, %c0_75], %142 {strides = array<i32>} : memref<5x128xf32, #tpu.memory_space<vmem>>, vector<5x128xf32>,
    %c1_i32 = arith.constant 1 : i32
    %144 = arith.cmpi eq, %arg1, %c1_i32 : i32
    %145 = arith.extui %144 : i1 to i32
    %c0_i32_76 = arith.constant 0 : i32
    %146 = arith.cmpi ne, %145, %c0_i32_76 : i32
    scf.if %146 {
      %147 = vector.extract_strided_slice %142 {offsets = [0, 0], sizes = [1, 128], strides = [1, 1]} : vector<5x128xf32> to vector<1x128xf32>
      %c0_77 = arith.constant 0 : index
      %c0_78 = arith.constant 0 : index
      %148 = vector.load %arg23[%c0_77, %c0_78] : memref<1x128xf32, #tpu.memory_space<vmem>>, vector<1x128xf32>
      %c0_79 = arith.constant 0 : index
      %c0_80 = arith.constant 0 : index
      %149 = vector.load %arg24[%c0_79, %c0_80] : memref<1x128xf32, #tpu.memory_space<vmem>>, vector<1x128xf32>
      %cst_81 = arith.constant dense<0.000000e+00> : vector<1xf32>
      %150 = vector.multi_reduction <add>, %147, %cst_81 [1] : vector<1x128xf32> to vector<1xf32>
      %151 = vector.shape_cast %150 : vector<1xf32> to vector<1x1xf32>
      %cst_82 = arith.constant 1.280000e+02 : f32
      %152 = vector.broadcast %cst_82 : f32 to vector<1x1xf32>
      %153 = arith.divf %151, %152 : vector<1x1xf32>
      %154 = vector.broadcast %153 : vector<1x1xf32> to vector<1x128xf32>
      %155 = arith.subf %147, %154 : vector<1x128xf32>
      %156 = arith.mulf %155, %155 : vector<1x128xf32>
      %cst_83 = arith.constant dense<0.000000e+00> : vector<1xf32>
      %157 = vector.multi_reduction <add>, %156, %cst_83 [1] : vector<1x128xf32> to vector<1xf32>
      %158 = vector.shape_cast %157 : vector<1xf32> to vector<1x1xf32>
      %cst_84 = arith.constant 1.280000e+02 : f32
      %159 = vector.broadcast %cst_84 : f32 to vector<1x1xf32>
      %160 = arith.divf %158, %159 : vector<1x1xf32>
      %161 = vector.broadcast %153 : vector<1x1xf32> to vector<1x128xf32>
      %162 = arith.subf %147, %161 : vector<1x128xf32>
      %cst_85 = arith.constant 9.99999974E-6 : f32
      %163 = vector.broadcast %cst_85 : f32 to vector<1x1xf32>
      %164 = arith.addf %160, %163 : vector<1x1xf32>
      %165 = math.rsqrt %164 : vector<1x1xf32>
      %166 = vector.broadcast %165 : vector<1x1xf32> to vector<1x128xf32>
      %167 = arith.mulf %162, %166 : vector<1x128xf32>
      %168 = arith.mulf %167, %148 : vector<1x128xf32>
      %169 = arith.addf %168, %149 : vector<1x128xf32>
      %170 = arith.truncf %169 : vector<1x128xf32> to vector<1x128xbf16>
      %c0_86 = arith.constant 0 : index
      %c0_87 = arith.constant 0 : index
      %171 = vector.load %arg25[%c0_86, %c0_87] : memref<128x128xbf16, #tpu.memory_space<vmem>>, vector<128x128xbf16>
      %cst_88 = arith.constant dense<0.000000e+00> : vector<1x128xf32>
      %172 = tpu.matmul %170, %171, %cst_88 {dimension_numbers = #tpu.dot_dimension_numbers<[1], [0], [0], [1], [0, 0, 1, 1], [], []>} : vector<1x128xbf16>, vector<128x128xbf16>, vector<1x128xf32> -> vector<1x128xf32>
      %c0_89 = arith.constant 0 : index
      %c0_90 = arith.constant 0 : index
      %173 = vector.load %arg26[%c0_89, %c0_90] : memref<1x128xf32, #tpu.memory_space<vmem>>, vector<1x128xf32>
      %174 = arith.addf %172, %173 : vector<1x128xf32>
      %c0_91 = arith.constant 0 : index
      %c0_92 = arith.constant 0 : index
      %c0_93 = arith.constant 0 : index
      %175 = vector.load %arg27[%c0_91, %c0_92, %c0_93] : memref<1x1x128xf32, #tpu.memory_space<vmem>>, vector<1x1x128xf32>
      %176 = vector.shape_cast %175 : vector<1x1x128xf32> to vector<1x128xf32>
      %177 = vector.shape_cast %174 : vector<1x128xf32> to vector<1x1x128xf32>
      tpu.vector_store %arg27[%c0_91, %c0_92, %c0_93], %177 {strides = array<i32>} : memref<1x1x128xf32, #tpu.memory_space<vmem>>, vector<1x1x128xf32>,
    } else {
    }
    return
  }
  func.func @transform_0(%arg0: i32, %arg1: i32) -> (i32, i32, i32) {
    %c0_i32 = arith.constant 0 : i32
    %c0_i32_0 = arith.constant 0 : i32
    %c0_i32_1 = arith.constant 0 : i32
    return %arg0, %c0_i32, %c0_i32_0 : i32, i32, i32
  }
  func.func @transform_1(%arg0: i32, %arg1: i32) -> (i32, i32) {
    %c0_i32 = arith.constant 0 : i32
    %c0_i32_0 = arith.constant 0 : i32
    %c0_i32_1 = arith.constant 0 : i32
    return %c0_i32, %c0_i32_0 : i32, i32
  }
  func.func @transform_2(%arg0: i32, %arg1: i32) -> (i32, i32) {
    %c0_i32 = arith.constant 0 : i32
    %c0_i32_0 = arith.constant 0 : i32
    %c0_i32_1 = arith.constant 0 : i32
    return %c0_i32, %c0_i32_0 : i32, i32
  }
  func.func @transform_3(%arg0: i32, %arg1: i32) -> (i32, i32) {
    %c0_i32 = arith.constant 0 : i32
    %c0_i32_0 = arith.constant 0 : i32
    %c0_i32_1 = arith.constant 0 : i32
    return %c0_i32, %c0_i32_0 : i32, i32
  }
  func.func @transform_4(%arg0: i32, %arg1: i32) -> (i32, i32) {
    %c0_i32 = arith.constant 0 : i32
    %c0_i32_0 = arith.constant 0 : i32
    %c0_i32_1 = arith.constant 0 : i32
    return %c0_i32, %c0_i32_0 : i32, i32
  }
  func.func @transform_5(%arg0: i32, %arg1: i32) -> (i32, i32, i32) {
    %c0_i32 = arith.constant 0 : i32
    %c0_i32_0 = arith.constant 0 : i32
    %c0_i32_1 = arith.constant 0 : i32
    return %arg1, %c0_i32, %c0_i32_0 : i32, i32, i32
  }
  func.func @transform_6(%arg0: i32, %arg1: i32) -> (i32, i32, i32) {
    %c0_i32 = arith.constant 0 : i32
    %c0_i32_0 = arith.constant 0 : i32
    %c0_i32_1 = arith.constant 0 : i32
    return %arg1, %c0_i32, %c0_i32_0 : i32, i32, i32
  }
  func.func @transform_7(%arg0: i32, %arg1: i32) -> (i32, i32, i32) {
    %c0_i32 = arith.constant 0 : i32
    %c0_i32_0 = arith.constant 0 : i32
    %c0_i32_1 = arith.constant 0 : i32
    return %arg1, %c0_i32, %c0_i32_0 : i32, i32, i32
  }
  func.func @transform_8(%arg0: i32, %arg1: i32) -> (i32, i32, i32) {
    %c0_i32 = arith.constant 0 : i32
    %c0_i32_0 = arith.constant 0 : i32
    %c0_i32_1 = arith.constant 0 : i32
    return %arg1, %c0_i32, %c0_i32_0 : i32, i32, i32
  }
  func.func @transform_9(%arg0: i32, %arg1: i32) -> (i32, i32, i32) {
    %c0_i32 = arith.constant 0 : i32
    %c0_i32_0 = arith.constant 0 : i32
    %c0_i32_1 = arith.constant 0 : i32
    return %arg1, %c0_i32, %c0_i32_0 : i32, i32, i32
  }
  func.func @transform_10(%arg0: i32, %arg1: i32) -> (i32, i32, i32) {
    %c0_i32 = arith.constant 0 : i32
    %c0_i32_0 = arith.constant 0 : i32
    %c0_i32_1 = arith.constant 0 : i32
    return %arg1, %c0_i32, %c0_i32_0 : i32, i32, i32
  }
  func.func @transform_11(%arg0: i32, %arg1: i32) -> (i32, i32, i32) {
    %c0_i32 = arith.constant 0 : i32
    %c0_i32_0 = arith.constant 0 : i32
    %c0_i32_1 = arith.constant 0 : i32
    return %arg1, %c0_i32, %c0_i32_0 : i32, i32, i32
  }
  func.func @transform_12(%arg0: i32, %arg1: i32) -> (i32, i32, i32) {
    %c0_i32 = arith.constant 0 : i32
    %c0_i32_0 = arith.constant 0 : i32
    %c0_i32_1 = arith.constant 0 : i32
    return %arg1, %c0_i32, %c0_i32_0 : i32, i32, i32
  }
  func.func @transform_13(%arg0: i32, %arg1: i32) -> (i32, i32, i32) {
    %c0_i32 = arith.constant 0 : i32
    %c0_i32_0 = arith.constant 0 : i32
    %c0_i32_1 = arith.constant 0 : i32
    return %arg1, %c0_i32, %c0_i32_0 : i32, i32, i32
  }
  func.func @transform_14(%arg0: i32, %arg1: i32) -> (i32, i32, i32) {
    %c0_i32 = arith.constant 0 : i32
    %c0_i32_0 = arith.constant 0 : i32
    %c0_i32_1 = arith.constant 0 : i32
    return %arg1, %c0_i32, %c0_i32_0 : i32, i32, i32
  }
  func.func @transform_15(%arg0: i32, %arg1: i32) -> (i32, i32, i32) {
    %c0_i32 = arith.constant 0 : i32
    %c0_i32_0 = arith.constant 0 : i32
    %c0_i32_1 = arith.constant 0 : i32
    return %arg1, %c0_i32, %c0_i32_0 : i32, i32, i32
  }
  func.func @transform_16(%arg0: i32, %arg1: i32) -> (i32, i32, i32) {
    %c0_i32 = arith.constant 0 : i32
    %c0_i32_0 = arith.constant 0 : i32
    %c0_i32_1 = arith.constant 0 : i32
    return %arg1, %c0_i32, %c0_i32_0 : i32, i32, i32
  }
  func.func @transform_17(%arg0: i32, %arg1: i32) -> (i32, i32, i32) {
    %c0_i32 = arith.constant 0 : i32
    %c0_i32_0 = arith.constant 0 : i32
    %c0_i32_1 = arith.constant 0 : i32
    return %arg1, %c0_i32, %c0_i32_0 : i32, i32, i32
  }
  func.func @transform_18(%arg0: i32, %arg1: i32) -> (i32, i32, i32) {
    %c0_i32 = arith.constant 0 : i32
    %c0_i32_0 = arith.constant 0 : i32
    %c0_i32_1 = arith.constant 0 : i32
    return %arg1, %c0_i32, %c0_i32_0 : i32, i32, i32
  }
  func.func @transform_19(%arg0: i32, %arg1: i32) -> (i32, i32, i32) {
    %c0_i32 = arith.constant 0 : i32
    %c0_i32_0 = arith.constant 0 : i32
    %c0_i32_1 = arith.constant 0 : i32
    return %arg1, %c0_i32, %c0_i32_0 : i32, i32, i32
  }
  func.func @transform_20(%arg0: i32, %arg1: i32) -> (i32, i32, i32) {
    %c0_i32 = arith.constant 0 : i32
    %c0_i32_0 = arith.constant 0 : i32
    %c0_i32_1 = arith.constant 0 : i32
    return %arg1, %c0_i32, %c0_i32_0 : i32, i32, i32
  }
  func.func @transform_21(%arg0: i32, %arg1: i32) -> (i32, i32) {
    %c0_i32 = arith.constant 0 : i32
    %c0_i32_0 = arith.constant 0 : i32
    %c0_i32_1 = arith.constant 0 : i32
    return %c0_i32, %c0_i32_0 : i32, i32
  }
  func.func @transform_22(%arg0: i32, %arg1: i32) -> (i32, i32) {
    %c0_i32 = arith.constant 0 : i32
    %c0_i32_0 = arith.constant 0 : i32
    %c0_i32_1 = arith.constant 0 : i32
    return %c0_i32, %c0_i32_0 : i32, i32
  }
  func.func @transform_23(%arg0: i32, %arg1: i32) -> (i32, i32) {
    %c0_i32 = arith.constant 0 : i32
    %c0_i32_0 = arith.constant 0 : i32
    %c0_i32_1 = arith.constant 0 : i32
    return %c0_i32, %c0_i32_0 : i32, i32
  }
  func.func @transform_24(%arg0: i32, %arg1: i32) -> (i32, i32) {
    %c0_i32 = arith.constant 0 : i32
    %c0_i32_0 = arith.constant 0 : i32
    %c0_i32_1 = arith.constant 0 : i32
    return %c0_i32, %c0_i32_0 : i32, i32
  }
  func.func @transform_25(%arg0: i32, %arg1: i32) -> (i32, i32, i32) {
    %c0_i32 = arith.constant 0 : i32
    %c0_i32_0 = arith.constant 0 : i32
    %c0_i32_1 = arith.constant 0 : i32
    return %arg0, %c0_i32, %c0_i32_0 : i32, i32, i32
  }
}

</mosaic_0001>

<bundles_post_ra>
// kernel: tpu_custom_call.1
= control target key start
LH: loop header
LB: loop body
LE: loop exit
PB: predicated region body
PF: predicated region fallthrough
CT: control target
= control target key end

     0   :  { %s7185_s0 = inlined_call_operand.hbm [shape: f32[2,4,256], index: 0, kind: input, shape index: {}]   ;;  %s7186_s1 = inlined_call_operand.hbm [shape: bf16[256,128], index: 1, kind: input, shape index: {}]   ;;  %s7187_s2 = inlined_call_operand.hbm [shape: f32[1,128], index: 2, kind: input, shape index: {}]   ;;  %s7188_s3 = inlined_call_operand.hbm [shape: f32[1,128], index: 3, kind: input, shape index: {}]   ;;  %s7189_s4 = inlined_call_operand.hbm [shape: f32[5,128], index: 4, kind: input, shape index: {}]   ;;  %s7190_s5 = inlined_call_operand.hbm [shape: f32[2,1,128], index: 5, kind: input, shape index: {}]   ;;  %s7191_s6 = inlined_call_operand.hbm [shape: f32[2,1,128], index: 6, kind: input, shape index: {}]   ;;  %s7192_s7 = inlined_call_operand.hbm [shape: bf16[2,128,128], index: 7, kind: input, shape index: {}]   ;;  %s7193_s8 = inlined_call_operand.hbm [shape: f32[2,1,128], index: 8, kind: input, shape index: {}]   ;;  %s7194_s9 = inlined_call_operand.hbm [shape: bf16[2,128,128], index: 9, kind: input, shape index: {}]   ;;  %s7195_s10 = inlined_call_operand.hbm [shape: f32[2,1,128], index: 10, kind: input, shape index: {}]   ;;  %s7196_s11 = inlined_call_operand.hbm [shape: bf16[2,128,128], index: 11, kind: input, shape index: {}]   ;;  %s7197_s12 = inlined_call_operand.hbm [shape: f32[2,1,128], index: 12, kind: input, shape index: {}]   ;;  %s7198_s13 = inlined_call_operand.hbm [shape: bf16[2,128,128], index: 13, kind: input, shape index: {}]   ;;  %s7199_s14 = inlined_call_operand.hbm [shape: f32[2,1,128], index: 14, kind: input, shape index: {}]   ;;  %s7200_s15 = inlined_call_operand.hbm [shape: f32[2,1,128], index: 15, kind: input, shape index: {}]   ;;  %s7201_s16 = inlined_call_operand.hbm [shape: f32[2,1,128], index: 16, kind: input, shape index: {}]   ;;  %s7202_s17 = inlined_call_operand.hbm [shape: bf16[2,128,256], index: 17, kind: input, shape index: {}]   ;;  %s7203_s18 = inlined_call_operand.hbm [shape: f32[2,1,256], index: 18, kind: input, shape index: {}]   ;;  %s7204_s19 = inlined_call_operand.hbm [shape: bf16[2,256,128], index: 19, kind: input, shape index: {}]   ;;  %s7205_s20 = inlined_call_operand.hbm [shape: f32[2,1,128], index: 20, kind: input, shape index: {}]   ;;  %s7206_s21 = inlined_call_operand.hbm [shape: f32[1,128], index: 21, kind: input, shape index: {}]   ;;  %s7207_s22 = inlined_call_operand.hbm [shape: f32[1,128], index: 22, kind: input, shape index: {}]   ;;  %s7208_s23 = inlined_call_operand.hbm [shape: bf16[128,128], index: 23, kind: input, shape index: {}]   ;;  %s7209_s24 = inlined_call_operand.hbm [shape: f32[1,128], index: 24, kind: input, shape index: {}]   ;;  %s7210_s25 = inlined_call_operand.hbm [shape: f32[2,1,128], index: 25, kind: output, shape index: {}]  }
   0x1   :  { %7281 = sst [smem:[#allocation74_spill]] %s7185_s0 }
   0x2   :  { %7282 = sst [smem:[#allocation75_spill]] %s7186_s1 }
   0x3   :  { %7283 = sst [smem:[#allocation76_spill]] %s7187_s2 }
   0x4   :  { %7284 = sst [smem:[#allocation77_spill]] %s7188_s3 }
   0x5   :  { %7285 = sst [smem:[#allocation78_spill]] %s7189_s4 }
   0x6   :  { %7286 = sst [smem:[#allocation79_spill]] %s7190_s5 }
   0x7   :  { %7287 = sst [smem:[#allocation80_spill]] %s7191_s6 }
   0x8   :  { %7288 = sst [smem:[#allocation81_spill]] %s7192_s7 }
   0x9   :  { %7289 = sst [smem:[#allocation82_spill]] %s7193_s8 }
   0xa   :  { %7290 = sst [smem:[#allocation83_spill]] %s7194_s9 }
   0xb   :  { %7291 = sst [smem:[#allocation84_spill]] %s7195_s10 }
   0xc   :  { %7292 = sst [smem:[#allocation85_spill]] %s7196_s11 }
   0xd   :  { %7293 = sst [smem:[#allocation86_spill]] %s7197_s12 }
   0xe   :  { %7294 = sst [smem:[#allocation87_spill]] %s7198_s13 }
   0xf   :  { %7295 = sst [smem:[#allocation88_spill]] %s7199_s14 }
  0x10   :  { %7296 = sst [smem:[#allocation89_spill]] %s7200_s15 }
  0x11   :  { %7297 = sst [smem:[#allocation90_spill]] %s7201_s16 }
  0x12   :  { %7298 = sst [smem:[#allocation91_spill]] %s7203_s18 }
  0x13   :  { %7299 = sst [smem:[#allocation92_spill]] %s7204_s19 }
  0x14   :  { %7300 = sst [smem:[#allocation93_spill]] %s7205_s20 }
  0x15   :  { %7301 = sst [smem:[#allocation94_spill]] %s7206_s21 }
  0x16   :  { %7302 = sst [smem:[#allocation95_spill]] %s7210_s25 }
  0x17   :  { %30 = vsyncpa [#allocation4], 0 }
  0x18   :  { %32 = vsyncpa [#allocation4 + $0x1], 0 }
  0x19   :  { %33 = vsyncpa [#allocation7], 0 }
  0x1a   :  { %34 = vsyncpa [#allocation10], 0 }
  0x1b   :  { %35 = vsyncpa [#allocation13], 0 }
  0x1c   :  { %37 = vsyncpa [#allocation13 + $0x1], 0 }
  0x1d   :  { %38 = vsyncpa [#allocation16], 0 }
  0x1e   :  { %40 = vsyncpa [#allocation16 + $0x1], 0 }
  0x1f   :  { %41 = vsyncpa [#allocation19], 0 }
  0x20   :  { %43 = vsyncpa [#allocation19 + $0x1], 0 }
  0x21   :  { %44 = vsyncpa [#allocation22], 0 }
  0x22   :  { %46 = vsyncpa [#allocation22 + $0x1], 0 }
  0x23   :  { %47 = vsyncpa [#allocation25], 0 }
  0x24   :  { %49 = vsyncpa [#allocation25 + $0x1], 0 }
  0x25   :  { %50 = vsyncpa [#allocation28], 0 }
  0x26   :  { %52 = vsyncpa [#allocation28 + $0x1], 0 }
  0x27   :  { %53 = vsyncpa [#allocation31], 0 }
  0x28   :  { %55 = vsyncpa [#allocation31 + $0x1], 0 }
  0x29   :  { %56 = vsyncpa [#allocation34], 0 }
  0x2a   :  { %58 = vsyncpa [#allocation34 + $0x1], 0 }
  0x2b   :  { %59 = vsyncpa [#allocation37], 0 }
  0x2c   :  { %60 = vsyncpa [#allocation40], 0 }
  0x2d   :  { %61 = vsyncpa [#allocation5], 0 }
  0x2e   :  { %63 = vsyncpa [#allocation5 + $0x1], 0  ;;  %s5903_s29 = smov 0   ;;  %s5905_s2 = smov 0  }
  0x2f   :  { %s5907_s6 = smov 0   ;;  %s5909_s30 = smov 0  }
  0x30   :  { %s5911_s7 = smov 0   ;;  %s5913_s3 = smov 0  }
  0x31   :  { %s5915_s26 = smov 0   ;;  %s5917_s1 = smov 0  }
  0x32   :  { %s5919_s8 = smov 0   ;;  %s5921_s27 = smov 0  }
  0x33   :  { %s5923_s4 = smov 0  }
  0x34 LB: > { %7303 = sst [smem:[#allocation57_spill]] %s5692_s2  ;;  %s5959_s28 = sadd.s32 4294967295, %s5728_s4   ;;  %s5728_s4 = sphi %s5923_s4, %s69_s4   ;;  %s5724_s27 = sphi %s5921_s27, %s7425_s27   ;;  %s5720_s8 = sphi %s5919_s8, %s7424_s8   ;;  %s5716_s1 = sphi %s5917_s1, %s7423_s1   ;;  %s5712_s26 = sphi %s5915_s26, %s7422_s26   ;;  %s5708_s3 = sphi %s5913_s3, %s7421_s3   ;;  %s5704_s7 = sphi %s5911_s7, %s7420_s7   ;;  %s5700_s30 = sphi %s5909_s30, %s7413_s30   ;;  %s5696_s6 = sphi %s5907_s6, %s7419_s6   ;;  %s5692_s2 = sphi %s5905_s2, %s7418_s2   ;;  %s5688_s29 = sphi %s5903_s29, %s7411_s29  }
  0x35   : > { %7304 = sst [smem:[#allocation58_spill]] %s5700_s30  ;;  %s4070_s9 = sadd.s32 4294967294, %s5728_s4  }
  0x36   : > { %7305 = sst [smem:[#allocation59_spill]] %s5704_s7  ;;  %s78_s5 = sadd.s32 1, %s5720_s8 }
  0x37   : > { %7306 = sst [smem:[#allocation60_spill]] %s5712_s26  ;;  %s81_s0 = sadd.s32 1, %s5724_s27 }
  0x38   : > { %7307 = sst [smem:[#allocation61_spill]] %s5716_s1  ;;  %p79_p0 = scmp.ge.s32.totalorder %s78_s5, 2 }
  0x39   : > { %7308 = sst [smem:[#allocation62_spill]] %s5724_s27  ;;  %s88_s25 = sadd.s32 1, %s5708_s3 }
  0x3a   : > { %7309 = sst [smem:[#allocation63_spill]] %s5959_s28  ;;  %p7230_p1 = scmp.ne.s32.totalorder %s5708_s3, %s5704_s7 }
  0x3b   : > { %p96_p2 = scmp.eq.s32.totalorder %s5728_s4, 0  ;;  %s7427_s5 = smov (%p79_p0, %s78_s5), 0 }
  0x3c   : > { %7310 = sst [smem:[#allocation64_spill]] %s7427_s5  ;;  %s7429_s0 = smov (!%p79_p0, %s81_s0), %s5724_s27 }
  0x3d   : > { %p5976_p3 = por %p96_p2, %p7230_p1  ;;  %p7229_p4 = scmp.ne.s32.totalorder %s5704_s7, %s5700_s30 }
  0x3e   : > { %p83_p5 = scmp.ge.s32.totalorder %s7429_s0, 2  ;;  %p7245_p6 = scmp.eq.s32.totalorder %s5959_s28, 0 }
  0x3f   : > { %s7311_s1 = scalar_select %p5976_p3, 1, 0 }
  0x40   : > { %s195_s26 = ssub.s32 %s5720_s8, %s7427_s5  ;;  %s198_s20 = sadd.s32 1, %s5696_s6 }
  0x41   : > { %7312 = sst [smem:[#allocation65_spill]] %s7311_s1  ;;  %s7431_s0 = smov (%p83_p5, %s7429_s0), 0 }
  0x42   : > { %7313 = sst [smem:[#allocation66_spill]] %s7431_s0  ;;  %p5993_p7 = por %p7245_p6, %p7229_p4 }
  0x43   : > { %p196_p8 = scmp.eq.s32.totalorder %s195_s26, 0  ;;  %s85_s16 = ssub.s32 %s5724_s27, %s7431_s0 }
  0x44   : > { %s7314_s18 = scalar_select %p5993_p7, 1, 0 }
  0x45   : > { %p205_p9 = scmp.ne.s32.totalorder %s5696_s6, %s5692_s2  ;;  %p86_p10 = scmp.eq.s32.totalorder %s85_s16, 0 }
  0x46   : > { %7315 = sst [smem:[#allocation67_spill]] %s7314_s18  ;;  %p211_p11 = scmp.ne.s32.totalorder %s5692_s2, %s5688_s29 }
  0x47   : > { %s6004_s5 = scalar_select %p196_p8, %s5696_s6, %s198_s20  }
  0x48   : > { %s6007_s14 = scalar_select %p86_p10, %s5708_s3, %s88_s25  }
  0x49   : > { %7316 = sst [smem:[#allocation68_spill]] %s6004_s5  ;;  %p6011_p12 = por %p205_p9, %p96_p2 }
  0x4a   : > { %7317 = sst [smem:[#allocation69_spill]] %s6007_s14  ;;  %p6017_p13 = por %p211_p11, %p7245_p6 }
  0x4b   : > { %s7318_s12 = scalar_select %p6011_p12, 1, 0 }
  0x4c   : > { %s7319_s10 = scalar_select %p6017_p13, 1, 0 }
  0x4d   : > { %p709_p0 = scmp.eq.s32.totalorder %s5959_s28, 3  ;;  %p715_p5 = scmp.eq.s32.totalorder %s4070_s9, 3 }
  0x4e   : > { %7320 = sst [smem:[#allocation70_spill]] %s7319_s10  ;;  %p4071_p4 = scmp.ge.s32.totalorder %s5728_s4, 1 }
  0x4f   : > { %p722_p1 = scmp.lt.s32.totalorder %s5728_s4, 5  ;;  %p7321_p7 = scmp.ne.s32.totalorder %s5708_s3, %s5704_s7 }
  0x50   : > { %p7324_p8 = scmp.ne.s32.totalorder %s5704_s7, %s5700_s30  ;;  %s5730_s29 = smov [#allocation6]  }
  0x51   : > { %p6027_p3 = por %p709_p0, %p7321_p7  ;;  %p6038_p2 = pnand %p4071_p4, %p722_p1 }
  0x52   : > { %p6034_p10 = por %p715_p5, %p7324_p8  ;;  %s734_s26 = sshll.u32 %s5730_s29, 4  ;;  %s735_s26 = int_to_ptr.vmem [resolvable:$true] %s734_s26 }
  0x53   : > { %s7322_s16 = scalar_select %p6027_p3, 1, 0 }
  0x54   : > { %s7325_s20 = scalar_select %p6034_p10, 1, 0 }
  0x55   : > { %7323 = sst [smem:[#allocation71_spill]] %s7322_s16  ;;  %p4575_p9 = pneg %p6038_p2 }
  0x56   : > { %7326 = sst [smem:[#allocation72_spill]] %s7325_s20  ;;  %s5731_s0 = smov [#allocation9]  }
  0x57   : > { %s7327_s25 = scalar_select %p6038_p2, 1, 0 }
  0x58   : > { %p6046_p7 = pnand %p4575_p9, %p7245_p6  ;;  %s759_s14 = sshll.u32 %s5731_s0, 4  ;;  %s6050_s14 = int_to_ptr.vmem [resolvable:$true] %s759_s14 }
  0x59   : > { %7328 = sst [smem:[#allocation73_spill]] %s7327_s25  ;;  %s7330_s30 = sld [smem:[#allocation75_spill]] }
  0x5a   : > { %p6060_p4 = pneg %p6046_p7 }
  0x5f   : > { %s7331_s16 = smov %s7330_s30  ;;  %s4858_s10 = scalar_lea.hbm %s7330_s30, 2048 }
  0x60   : > { %p4859_p1 = scmp.ne.s32.totalorder %s7331_s16, %s4858_s10  ;;  %p4865_p5 = scmp.lt.u32.totalorder %s4858_s10, %s7331_s16 }
  0x62   : > { %p4861_p11 = pnand %p6060_p4, %p4859_p1 }
  0x64   : > { %p4862_p0 = pneg %p4861_p11 }
  0x66   : > { %p4867_p8 = pnand %p4865_p5, %p4862_p0 }
  0x68   : > { %4870 = shalt.err (!%p4867_p8)
}
  0x69   : > { %s4871_s30 = scalar_lea.vmem %s735_s26, 2048  ;;  %p4879_p3 = scmp.lt.s32.totalorder %s735_s26, %s735_s26 }
  0x6a   : > { %p4872_p9 = scmp.ne.s32.totalorder %s735_s26, %s4871_s30  ;;  %p4880_p13 = scmp.lt.s32.totalorder %s4871_s30, %s4871_s30 }
  0x6c   : > { %p4874_p6 = pnand %p4872_p9, %p6060_p4  ;;  %p4881_p2 = por %p4880_p13, %p4879_p3 }
  0x6e   : > { %p4875_p10 = pneg %p4874_p6 }
  0x70   : > { %p4882_p12 = pnand %p4881_p2, %p4875_p10 }
  0x72   : > { %4885 = shalt.err (!%p4882_p12)
}
  0x73   : > { %s7255_s18 = smov 64   ;;  %s7256_s2 = smov 4  }
  0x74   : > { %4578 = dma.hbm_to_vmem [thread:$0]  (!%p6046_p7), %s7331_s16, 2048, %s735_s26, [#allocation7], %s7255_s18, %s7255_s18, %s7256_s2  }
  0x75   : > { %s7333_s0 = sld [smem:[#allocation77_spill]] }
  0x7b   : > { %s4886_s7 = scalar_lea.hbm %s7333_s0, 16 }
  0x7c   : > { %p4887_p3 = scmp.ne.s32.totalorder %s7333_s0, %s4886_s7  ;;  %p4893_p13 = scmp.lt.u32.totalorder %s4886_s7, %s7333_s0 }
  0x7e   : > { %p4889_p6 = pnand %p4887_p3, %p6060_p4 }
  0x80   : > { %p4890_p12 = pneg %p4889_p6 }
  0x82   : > { %p4895_p10 = pnand %p4893_p13, %p4890_p12 }
  0x84   : > { %4898 = shalt.err (!%p4895_p10)
}
  0x85   : > { %s4899_s26 = scalar_lea.vmem %s6050_s14, 16  ;;  %s4906_s25 = scalar_lea.vmem %s6050_s14, 32 }
  0x86   : > { %p4900_p2 = scmp.ne.s32.totalorder %s6050_s14, %s4899_s26  ;;  %p4907_p0 = scmp.lt.s32.totalorder %s6050_s14, %s6050_s14 }
  0x87   : > { %p4908_p5 = scmp.lt.s32.totalorder %s4906_s25, %s4899_s26 }
  0x88   : > { %p4902_p1 = pnand %p4900_p2, %p6060_p4 }
  0x89   : > { %p4909_p8 = por %p4908_p5, %p4907_p0 }
  0x8a   : > { %p4903_p11 = pneg %p4902_p1 }
  0x8c   : > { %p4910_p9 = pnand %p4909_p8, %p4903_p11 }
  0x8e   : > { %4913 = shalt.err (!%p4910_p9)
}
  0x8f   : > { %4584 = dma.hbm_to_vmem [thread:$0]  (!%p6046_p7), %s7333_s0, 16, %s6050_s14, [#allocation10]  }
  0x90   : > { %s5734_s27 = smov [#allocation36]   ;;  %s5735_s28 = smov [#allocation39]  }
  0x91   : > { %s781_s10 = sshll.u32 %s5734_s27, 4  ;;  %s802_s5 = sshll.u32 %s5735_s28, 4  ;;  %s782_s10 = int_to_ptr.vmem [resolvable:$true] %s781_s10  ;;  %s803_s5 = int_to_ptr.vmem [resolvable:$true] %s802_s5 }
  0x92   : > { %s7334_s21 = sld [smem:[#allocation94_spill]] }
  0x98   : > { %s4914_s26 = scalar_lea.hbm %s7334_s21, 16 }
  0x99   : > { %p4915_p3 = scmp.ne.s32.totalorder %s7334_s21, %s4914_s26  ;;  %p4921_p13 = scmp.lt.u32.totalorder %s4914_s26, %s7334_s21 }
  0x9b   : > { %p4917_p6 = pnand %p4915_p3, %p6060_p4 }
  0x9d   : > { %p4918_p12 = pneg %p4917_p6 }
  0x9f   : > { %p4923_p10 = pnand %p4921_p13, %p4918_p12 }
  0xa1   : > { %4926 = shalt.err (!%p4923_p10)
}
  0xa2   : > { %s4927_s14 = scalar_lea.vmem %s782_s10, 16  ;;  %s4934_s1 = scalar_lea.vmem %s782_s10, 32 }
  0xa3   : > { %p4928_p2 = scmp.ne.s32.totalorder %s782_s10, %s4927_s14  ;;  %p4935_p0 = scmp.lt.s32.totalorder %s782_s10, %s782_s10 }
  0xa4   : > { %p4936_p5 = scmp.lt.s32.totalorder %s4934_s1, %s4927_s14 }
  0xa5   : > { %p4930_p1 = pnand %p4928_p2, %p6060_p4 }
  0xa6   : > { %p4937_p8 = por %p4936_p5, %p4935_p0 }
  0xa7   : > { %p4931_p11 = pneg %p4930_p1 }
  0xa9   : > { %p4938_p9 = pnand %p4937_p8, %p4931_p11 }
  0xab   : > { %4941 = shalt.err (!%p4938_p9)
}
  0xac   : > { %4590 = dma.hbm_to_vmem [thread:$0]  (!%p6046_p7), %s7334_s21, 16, %s782_s10, [#allocation37]  }
  0xad   : > { %s4942_s20 = scalar_lea.hbm %s7208_s23, 1024 }
  0xae   : > { %p4943_p3 = scmp.ne.s32.totalorder %s7208_s23, %s4942_s20  ;;  %p4949_p13 = scmp.lt.u32.totalorder %s4942_s20, %s7208_s23 }
  0xb0   : > { %p4945_p6 = pnand %p4943_p3, %p6060_p4 }
  0xb2   : > { %p4946_p12 = pneg %p4945_p6 }
  0xb4   : > { %p4951_p10 = pnand %p4949_p13, %p4946_p12 }
  0xb6   : > { %4954 = shalt.err (!%p4951_p10)
}
  0xb7   : > { %s4955_s14 = scalar_lea.vmem %s803_s5, 1024  ;;  %p4963_p0 = scmp.lt.s32.totalorder %s803_s5, %s803_s5 }
  0xb8   : > { %p4956_p2 = scmp.ne.s32.totalorder %s803_s5, %s4955_s14  ;;  %p4964_p5 = scmp.lt.s32.totalorder %s4955_s14, %s4955_s14 }
  0xba   : > { %p4958_p1 = pnand %p4956_p2, %p6060_p4  ;;  %p4965_p8 = por %p4964_p5, %p4963_p0 }
  0xbc   : > { %p4959_p11 = pneg %p4958_p1 }
  0xbe   : > { %p4966_p9 = pnand %p4965_p8, %p4959_p11 }
  0xc0   : > { %4969 = shalt.err (!%p4966_p9)
}
  0xc1   : > { %s7335_s10 = smov 4   ;;  %s7336_s1 = smov 64  }
  0xc2   : > { %4596 = dma.hbm_to_vmem [thread:$0]  (!%p6046_p7), %s7208_s23, 1024, %s803_s5, [#allocation40], %s7336_s1, %s7336_s1, %s7335_s10  }
  0xc3   : > { %s5736_s2 = smov [#allocation8]   ;;  %s5737_s20 = smov [#allocation11]  }
  0xc4   : > { %s748_s28 = sshll.u32 %s5736_s2, 4  ;;  %s770_s30 = sshll.u32 %s5737_s20, 4  ;;  %s749_s28 = int_to_ptr.vmem [resolvable:$true] %s748_s28  ;;  %s771_s30 = int_to_ptr.vmem [resolvable:$true] %s770_s30 }
  0xc5   : > { %s7337_s7 = sld [smem:[#allocation76_spill]] }
  0xcb   : > { %s7338_s14 = smov %s7337_s7  ;;  %s4970_s0 = scalar_lea.hbm %s7337_s7, 16 }
  0xcc   : > { %p4971_p3 = scmp.ne.s32.totalorder %s7338_s14, %s4970_s0  ;;  %p4977_p13 = scmp.lt.u32.totalorder %s4970_s0, %s7338_s14 }
  0xce   : > { %p4973_p6 = pnand %p4971_p3, %p6060_p4 }
  0xd0   : > { %p4974_p12 = pneg %p4973_p6 }
  0xd2   : > { %p4979_p10 = pnand %p4977_p13, %p4974_p12 }
  0xd4   : > { %4982 = shalt.err (!%p4979_p10)
}
  0xd5   : > { %s4983_s5 = scalar_lea.vmem %s749_s28, 16  ;;  %s4990_s10 = scalar_lea.vmem %s749_s28, 32 }
  0xd6   : > { %p4984_p2 = scmp.ne.s32.totalorder %s749_s28, %s4983_s5  ;;  %p4991_p0 = scmp.lt.s32.totalorder %s749_s28, %s749_s28 }
  0xd7   : > { %p4992_p5 = scmp.lt.s32.totalorder %s4990_s10, %s4983_s5 }
  0xd8   : > { %p4986_p1 = pnand %p4984_p2, %p6060_p4 }
  0xd9   : > { %p4993_p8 = por %p4992_p5, %p4991_p0 }
  0xda   : > { %p4987_p11 = pneg %p4986_p1 }
  0xdc   : > { %p4994_p9 = pnand %p4993_p8, %p4987_p11 }
  0xde   : > { %4997 = shalt.err (!%p4994_p9)
}
  0xdf   : > { %4581 = dma.hbm_to_vmem [thread:$0]  (!%p6046_p7), %s7338_s14, 16, %s749_s28, [#allocation7]  }
  0xe0   : > { %s7339_s1 = sld [smem:[#allocation78_spill]] }
  0xe6   : > { %s7340_s20 = smov %s7339_s1  ;;  %s4998_s27 = scalar_lea.hbm %s7339_s1, 128 }
  0xe7   : > { %p4999_p3 = scmp.ne.s32.totalorder %s7340_s20, %s4998_s27  ;;  %p5005_p13 = scmp.lt.u32.totalorder %s4998_s27, %s7340_s20 }
  0xe9   : > { %p5001_p6 = pnand %p4999_p3, %p6060_p4 }
  0xeb   : > { %p5002_p12 = pneg %p5001_p6 }
  0xed   : > { %p5007_p10 = pnand %p5005_p13, %p5002_p12 }
  0xef   : > { %5010 = shalt.err (!%p5007_p10)
}
  0xf0   : > { %s5011_s18 = scalar_lea.vmem %s771_s30, 128  ;;  %p5019_p0 = scmp.lt.s32.totalorder %s771_s30, %s771_s30 }
  0xf1   : > { %p5012_p2 = scmp.ne.s32.totalorder %s771_s30, %s5011_s18  ;;  %p5020_p5 = scmp.lt.s32.totalorder %s5011_s18, %s5011_s18 }
  0xf3   : > { %p5014_p1 = pnand %p5012_p2, %p6060_p4  ;;  %p5021_p8 = por %p5020_p5, %p5019_p0 }
  0xf5   : > { %p5015_p11 = pneg %p5014_p1 }
  0xf7   : > { %p5022_p9 = pnand %p5021_p8, %p5015_p11 }
  0xf9   : > { %5025 = shalt.err (!%p5022_p9)
}
  0xfa   : > { %4587 = dma.hbm_to_vmem [thread:$0]  (!%p6046_p7), %s7340_s20, 128, %s771_s30, [#allocation10]  }
  0xfb   : > { %s5738_s10 = smov [#allocation38]   ;;  %s5739_s16 = smov [#allocation41]  }
  0xfc   : > { %s792_s21 = sshll.u32 %s5738_s10, 4  ;;  %s816_s19 = sshll.u32 %s5739_s16, 4  ;;  %s793_s21 = int_to_ptr.vmem [resolvable:$true] %s792_s21  ;;  %s817_s19 = int_to_ptr.vmem [resolvable:$true] %s816_s19 }
  0xfd   : > { %s5026_s27 = scalar_lea.hbm %s7207_s22, 16 }
  0xfe   : > { %p5027_p3 = scmp.ne.s32.totalorder %s7207_s22, %s5026_s27  ;;  %p5033_p13 = scmp.lt.u32.totalorder %s5026_s27, %s7207_s22 }
 0x100   : > { %p5029_p6 = pnand %p5027_p3, %p6060_p4 }
 0x102   : > { %p5030_p12 = pneg %p5029_p6 }
 0x104   : > { %p5035_p10 = pnand %p5033_p13, %p5030_p12 }
 0x106   : > { %5038 = shalt.err (!%p5035_p10)
}
 0x107   : > { %s5039_s30 = scalar_lea.vmem %s793_s21, 16  ;;  %s5046_s18 = scalar_lea.vmem %s793_s21, 32 }
 0x108   : > { %p5040_p2 = scmp.ne.s32.totalorder %s793_s21, %s5039_s30  ;;  %p5047_p0 = scmp.lt.s32.totalorder %s793_s21, %s793_s21 }
 0x109   : > { %p5048_p5 = scmp.lt.s32.totalorder %s5046_s18, %s5039_s30 }
 0x10a   : > { %p5042_p1 = pnand %p5040_p2, %p6060_p4 }
 0x10b   : > { %p5049_p8 = por %p5048_p5, %p5047_p0 }
 0x10c   : > { %p5043_p11 = pneg %p5042_p1 }
 0x10e   : > { %p5050_p9 = pnand %p5049_p8, %p5043_p11 }
 0x110   : > { %5053 = shalt.err (!%p5050_p9)
}
 0x111   : > { %4593 = dma.hbm_to_vmem [thread:$0]  (!%p6046_p7), %s7207_s22, 16, %s793_s21, [#allocation37]  }
 0x112   : > { %s5054_s0 = scalar_lea.hbm %s7209_s24, 16 }
 0x113   : > { %p5055_p3 = scmp.ne.s32.totalorder %s7209_s24, %s5054_s0  ;;  %p5061_p13 = scmp.lt.u32.totalorder %s5054_s0, %s7209_s24 }
 0x115   : > { %p5057_p6 = pnand %p5055_p3, %p6060_p4 }
 0x117   : > { %p5058_p12 = pneg %p5057_p6 }
 0x119   : > { %p5063_p10 = pnand %p5061_p13, %p5058_p12 }
 0x11b   : > { %5066 = shalt.err (!%p5063_p10)
}
 0x11c   : > { %s5067_s25 = scalar_lea.vmem %s817_s19, 16  ;;  %s5074_s21 = scalar_lea.vmem %s817_s19, 32 }
 0x11d   : > { %p5068_p2 = scmp.ne.s32.totalorder %s817_s19, %s5067_s25  ;;  %p5075_p0 = scmp.lt.s32.totalorder %s817_s19, %s817_s19 }
 0x11e   : > { %p5076_p5 = scmp.lt.s32.totalorder %s5074_s21, %s5067_s25 }
 0x11f   : > { %p5070_p1 = pnand %p5068_p2, %p6060_p4 }
 0x120   : > { %p5077_p8 = por %p5076_p5, %p5075_p0 }
 0x121   : > { %p5071_p11 = pneg %p5070_p1 }
 0x123   : > { %p5078_p9 = pnand %p5077_p8, %p5071_p11 }
 0x125   : > { %5081 = shalt.err (!%p5078_p9)
}
 0x126   : > { %4599 = dma.hbm_to_vmem [thread:$0]  (!%p6046_p7), %s7209_s24, 16, %s817_s19, [#allocation40]  }
 0x127   : > { %p4080_p3 = scmp.ge.s32.totalorder %s5728_s4, 4 }
 0x128   : > { %s6216_s29 = sand.u32 (!%p4080_p3), 1, %s5728_s4   ;;  %s6219_s18 = sand.u32 (!%p4080_p3), 1, %s5696_s6  }
 0x129   : > { %823 = sbr.rel (%p4080_p3) target bundleno = 776 (0x308), region = 48  ;;  %s6222_s28 = sshll.u32 (!%p4080_p3), %s5720_s8, 4 }
 0x12a   : > { %s849_s9 = scalar_lea.vmem (!%p4080_p3), [#allocation12], %s6219_s18  ;;  %s7341_s16 = sld [smem:[#allocation79_spill]] (!%p4080_p3) }
 0x12b   : > { %s856_s5 = sshll.u32 (!%p4080_p3), %s849_s9, 4  ;;  %s7260_s1 = scalar_lea.sflag (!%p4080_p3), [#allocation13], %s6216_s29  ;;  %s857_s5 = int_to_ptr.vmem [resolvable:$true] %s856_s5 }
 0x12c   : > { %p7342_p4 = scmp.ne.s32.totalorder (!%p4080_p3), %s7318_s12, 0 }
 0x130   : > { %s6229_s0 = scalar_lea.hbm %s7341_s16, %s6222_s28  ;;  %s5086_s25 = scalar_lea.hbm %s7341_s16, 32 }
 0x131   : > { %s5082_s27 = scalar_lea.hbm %s6229_s0, 16  ;;  %p5087_p13 = scmp.lt.u32.totalorder %s6229_s0, %s7341_s16 }
 0x132   : > { %p5083_p7 = scmp.ne.s32.totalorder %s6229_s0, %s5082_s27  ;;  %p5088_p10 = scmp.lt.u32.totalorder %s5086_s25, %s5082_s27 }
 0x133   : > { %p5090_p1 = scmp.lt.u32.totalorder %s5082_s27, %s6229_s0 }
 0x134   : > { %p5084_p6 = pnand %p5083_p7, %p7342_p4  ;;  %p5089_p2 = por %p5088_p10, %p5087_p13 }
 0x136   : > { %p5085_p12 = pneg %p5084_p6  ;;  %p5091_p11 = por %p5090_p1, %p5089_p2 }
 0x138   : > { %p5092_p0 = pnand %p5091_p11, %p5085_p12 }
 0x13a   : > { %5095 = shalt.err (!%p5092_p0)
}
 0x13b   : > { %s5096_s30 = scalar_lea.vmem %s857_s5, 16  ;;  %s5740_s9 = smov [#allocation12]  }
 0x13c   : > { %p5097_p5 = scmp.ne.s32.totalorder %s857_s5, %s5096_s30  ;;  %s5100_s10 = sshll.u32 %s5740_s9, 4  ;;  %s5101_s10 = int_to_ptr.vmem [resolvable:$false] %s5100_s10 }
 0x13d   : > { %s5102_s19 = scalar_lea.vmem %s5101_s10, 32  ;;  %p5103_p3 = scmp.lt.s32.totalorder %s857_s5, %s5101_s10 }
 0x13e   : > { %p5098_p8 = pnand %p5097_p5, %p7342_p4  ;;  %p5104_p7 = scmp.lt.s32.totalorder %s5102_s19, %s5096_s30 }
 0x140   : > { %p5099_p9 = pneg %p5098_p8  ;;  %p5105_p6 = por %p5104_p7, %p5103_p3 }
 0x142   : > { %p5106_p10 = pnand %p5105_p6, %p5099_p9 }
 0x144   : > { %5109 = shalt.err (!%p5106_p10)
}
 0x145   : > { %4524 = dma.hbm_to_vmem [thread:$0]  (%p7342_p4), %s6229_s0, 16, %s857_s5, %s7260_s1  }
 0x146   : > { %s6252_s27 = sshll.u32 %s6219_s18, 6  ;;  %s6255_s2 = sshll.u32 %s5720_s8, 10 }
 0x147   : > { %s7343_s21 = sld [smem:[#allocation81_spill]]  ;;  %s884_s30 = scalar_lea.vmem [#allocation15], %s6252_s27 }
 0x148   : > { %s891_s9 = sshll.u32 %s884_s30, 4  ;;  %s7264_s5 = scalar_lea.sflag [#allocation16], %s6216_s29  ;;  %s6264_s9 = int_to_ptr.vmem [resolvable:$true] %s891_s9 }
 0x14d   : > { %s6261_s7 = scalar_lea.hbm %s7343_s21, %s6255_s2  ;;  %s5114_s26 = scalar_lea.hbm %s7343_s21, 2048 }
 0x14e   : > { %s5110_s0 = scalar_lea.hbm %s6261_s7, 1024  ;;  %p5115_p1 = scmp.lt.u32.totalorder %s6261_s7, %s7343_s21 }
 0x14f   : > { %p5111_p12 = scmp.ne.s32.totalorder %s6261_s7, %s5110_s0  ;;  %p5116_p11 = scmp.lt.u32.totalorder %s5114_s26, %s5110_s0 }
 0x150   : > { %p5118_p5 = scmp.lt.u32.totalorder %s5110_s0, %s6261_s7 }
 0x151   : > { %p5112_p13 = pnand %p5111_p12, %p7342_p4  ;;  %p5117_p0 = por %p5116_p11, %p5115_p1 }
 0x153   : > { %p5113_p2 = pneg %p5112_p13  ;;  %p5119_p8 = por %p5118_p5, %p5117_p0 }
 0x155   : > { %p5120_p9 = pnand %p5119_p8, %p5113_p2 }
 0x157   : > { %5123 = shalt.err (!%p5120_p9)
}
 0x158   : > { %s5124_s30 = scalar_lea.vmem %s6264_s9, 1024  ;;  %s5741_s10 = smov [#allocation15]  }
 0x159   : > { %p5125_p3 = scmp.ne.s32.totalorder %s6264_s9, %s5124_s30  ;;  %s5128_s19 = sshll.u32 %s5741_s10, 4  ;;  %s5129_s19 = int_to_ptr.vmem [resolvable:$false] %s5128_s19 }
 0x15a   : > { %s5130_s1 = scalar_lea.vmem %s5129_s19, 2048  ;;  %p5131_p10 = scmp.lt.s32.totalorder %s6264_s9, %s5129_s19 }
 0x15b   : > { %p5126_p7 = pnand %p5125_p3, %p7342_p4  ;;  %p5132_p12 = scmp.lt.s32.totalorder %s5130_s1, %s5124_s30 }
 0x15d   : > { %p5127_p6 = pneg %p5126_p7  ;;  %p5133_p13 = por %p5132_p12, %p5131_p10 }
 0x15f   : > { %p5134_p1 = pnand %p5133_p13, %p5127_p6 }
 0x161   : > { %5137 = shalt.err (!%p5134_p1)
}
 0x162   : > { %s7269_s0 = smov 64   ;;  %s7270_s26 = smov 4  }
 0x163   : > { %4526 = dma.hbm_to_vmem [thread:$0]  (%p7342_p4), %s6261_s7, 1024, %s6264_s9, %s7264_s5, %s7269_s0, %s7269_s0, %s7270_s26  }
 0x164   : > { %s7344_s10 = sld [smem:[#allocation83_spill]]  ;;  %s922_s1 = scalar_lea.vmem [#allocation18], %s6252_s27 }
 0x165   : > { %s929_s14 = sshll.u32 %s922_s1, 4  ;;  %s7265_s16 = scalar_lea.sflag [#allocation19], %s6216_s29  ;;  %s6300_s14 = int_to_ptr.vmem [resolvable:$true] %s929_s14 }
 0x16a   : > { %s6297_s19 = scalar_lea.hbm %s7344_s10, %s6255_s2  ;;  %s5142_s25 = scalar_lea.hbm %s7344_s10, 2048 }
 0x16b   : > { %s5138_s20 = scalar_lea.hbm %s6297_s19, 1024  ;;  %p5143_p5 = scmp.lt.u32.totalorder %s6297_s19, %s7344_s10 }
 0x16c   : > { %p5139_p2 = scmp.ne.s32.totalorder %s6297_s19, %s5138_s20  ;;  %p5144_p8 = scmp.lt.u32.totalorder %s5142_s25, %s5138_s20 }
 0x16d   : > { %p5146_p3 = scmp.lt.u32.totalorder %s5138_s20, %s6297_s19 }
 0x16e   : > { %p5140_p11 = pnand %p5139_p2, %p7342_p4  ;;  %p5145_p9 = por %p5144_p8, %p5143_p5 }
 0x170   : > { %p5141_p0 = pneg %p5140_p11  ;;  %p5147_p7 = por %p5146_p3, %p5145_p9 }
 0x172   : > { %p5148_p6 = pnand %p5147_p7, %p5141_p0 }
 0x174   : > { %5151 = shalt.err (!%p5148_p6)
}
 0x175   : > { %s5152_s1 = scalar_lea.vmem %s6300_s14, 1024  ;;  %s5744_s7 = smov [#allocation18]  }
 0x176   : > { %p5153_p10 = scmp.ne.s32.totalorder %s6300_s14, %s5152_s1  ;;  %s5156_s9 = sshll.u32 %s5744_s7, 4  ;;  %s5157_s9 = int_to_ptr.vmem [resolvable:$false] %s5156_s9 }
 0x177   : > { %s5158_s5 = scalar_lea.vmem %s5157_s9, 2048  ;;  %p5159_p1 = scmp.lt.s32.totalorder %s6300_s14, %s5157_s9 }
 0x178   : > { %p5154_p12 = pnand %p5153_p10, %p7342_p4  ;;  %p5160_p2 = scmp.lt.s32.totalorder %s5158_s5, %s5152_s1 }
 0x17a   : > { %p5155_p13 = pneg %p5154_p12  ;;  %p5161_p11 = por %p5160_p2, %p5159_p1 }
 0x17c   : > { %p5162_p5 = pnand %p5161_p11, %p5155_p13 }
 0x17e   : > { %5165 = shalt.err (!%p5162_p5)
}
 0x17f   : > { %4528 = dma.hbm_to_vmem [thread:$0]  (%p7342_p4), %s6297_s19, 1024, %s6300_s14, %s7265_s16, %s7269_s0, %s7269_s0, %s7270_s26  }
 0x180   : > { %s7345_s11 = sld [smem:[#allocation85_spill]]  ;;  %s960_s1 = scalar_lea.vmem [#allocation21], %s6252_s27 }
 0x181   : > { %s967_s7 = sshll.u32 %s960_s1, 4  ;;  %s7267_s9 = scalar_lea.sflag [#allocation22], %s6216_s29  ;;  %s6336_s7 = int_to_ptr.vmem [resolvable:$true] %s967_s7 }
 0x186   : > { %s6333_s30 = scalar_lea.hbm %s7345_s11, %s6255_s2  ;;  %s5170_s20 = scalar_lea.hbm %s7345_s11, 2048 }
 0x187   : > { %s5166_s5 = scalar_lea.hbm %s6333_s30, 1024  ;;  %p5171_p3 = scmp.lt.u32.totalorder %s6333_s30, %s7345_s11 }
 0x188   : > { %p5167_p0 = scmp.ne.s32.totalorder %s6333_s30, %s5166_s5  ;;  %p5172_p7 = scmp.lt.u32.totalorder %s5170_s20, %s5166_s5 }
 0x189   : > { %p5174_p10 = scmp.lt.u32.totalorder %s5166_s5, %s6333_s30 }
 0x18a   : > { %p5168_p8 = pnand %p5167_p0, %p7342_p4  ;;  %p5173_p6 = por %p5172_p7, %p5171_p3 }
 0x18c   : > { %p5169_p9 = pneg %p5168_p8  ;;  %p5175_p12 = por %p5174_p10, %p5173_p6 }
 0x18e   : > { %p5176_p13 = pnand %p5175_p12, %p5169_p9 }
 0x190   : > { %5179 = shalt.err (!%p5176_p13)
}
 0x191   : > { %s5180_s1 = scalar_lea.vmem %s6336_s7, 1024  ;;  %s5745_s14 = smov [#allocation21]  }
 0x192   : > { %p5181_p1 = scmp.ne.s32.totalorder %s6336_s7, %s5180_s1  ;;  %s5184_s19 = sshll.u32 %s5745_s14, 4  ;;  %s5185_s19 = int_to_ptr.vmem [resolvable:$false] %s5184_s19 }
 0x193   : > { %s5186_s16 = scalar_lea.vmem %s5185_s19, 2048  ;;  %p5187_p5 = scmp.lt.s32.totalorder %s6336_s7, %s5185_s19 }
 0x194   : > { %p5182_p2 = pnand %p5181_p1, %p7342_p4  ;;  %p5188_p0 = scmp.lt.s32.totalorder %s5186_s16, %s5180_s1 }
 0x196   : > { %p5183_p11 = pneg %p5182_p2  ;;  %p5189_p8 = por %p5188_p0, %p5187_p5 }
 0x198   : > { %p5190_p3 = pnand %p5189_p8, %p5183_p11 }
 0x19a   : > { %5193 = shalt.err (!%p5190_p3)
}
 0x19b   : > { %4530 = dma.hbm_to_vmem [thread:$0]  (%p7342_p4), %s6333_s30, 1024, %s6336_s7, %s7267_s9, %s7269_s0, %s7269_s0, %s7270_s26  }
 0x19c   : > { %s7346_s13 = sld [smem:[#allocation87_spill]]  ;;  %s998_s1 = scalar_lea.vmem [#allocation24], %s6252_s27 }
 0x19d   : > { %s1005_s14 = sshll.u32 %s998_s1, 4  ;;  %s7266_s19 = scalar_lea.sflag [#allocation25], %s6216_s29  ;;  %s6372_s14 = int_to_ptr.vmem [resolvable:$true] %s1005_s14 }
 0x1a2   : > { %s6369_s25 = scalar_lea.hbm %s7346_s13, %s6255_s2  ;;  %s5198_s5 = scalar_lea.hbm %s7346_s13, 2048 }
 0x1a3   : > { %s5194_s16 = scalar_lea.hbm %s6369_s25, 1024  ;;  %p5199_p10 = scmp.lt.u32.totalorder %s6369_s25, %s7346_s13 }
 0x1a4   : > { %p5195_p9 = scmp.ne.s32.totalorder %s6369_s25, %s5194_s16  ;;  %p5200_p12 = scmp.lt.u32.totalorder %s5198_s5, %s5194_s16 }
 0x1a5   : > { %p5202_p1 = scmp.lt.u32.totalorder %s5194_s16, %s6369_s25 }
 0x1a6   : > { %p5196_p7 = pnand %p5195_p9, %p7342_p4  ;;  %p5201_p13 = por %p5200_p12, %p5199_p10 }
 0x1a8   : > { %p5197_p6 = pneg %p5196_p7  ;;  %p5203_p2 = por %p5202_p1, %p5201_p13 }
 0x1aa   : > { %p5204_p11 = pnand %p5203_p2, %p5197_p6 }
 0x1ac   : > { %5207 = shalt.err (!%p5204_p11)
}
 0x1ad   : > { %s5208_s27 = scalar_lea.vmem %s6372_s14, 1024  ;;  %s5746_s1 = smov [#allocation24]  }
 0x1ae   : > { %p5209_p5 = scmp.ne.s32.totalorder %s6372_s14, %s5208_s27  ;;  %s5212_s30 = sshll.u32 %s5746_s1, 4  ;;  %s5213_s30 = int_to_ptr.vmem [resolvable:$false] %s5212_s30 }
 0x1af   : > { %s5214_s7 = scalar_lea.vmem %s5213_s30, 2048  ;;  %p5215_p3 = scmp.lt.s32.totalorder %s6372_s14, %s5213_s30 }
 0x1b0   : > { %p5210_p0 = pnand %p5209_p5, %p7342_p4  ;;  %p5216_p9 = scmp.lt.s32.totalorder %s5214_s7, %s5208_s27 }
 0x1b2   : > { %p5211_p8 = pneg %p5210_p0  ;;  %p5217_p7 = por %p5216_p9, %p5215_p3 }
 0x1b4   : > { %p5218_p10 = pnand %p5217_p7, %p5211_p8 }
 0x1b6   : > { %5221 = shalt.err (!%p5218_p10)
}
 0x1b7   : > { %4532 = dma.hbm_to_vmem [thread:$0]  (%p7342_p4), %s6369_s25, 1024, %s6372_s14, %s7266_s19, %s7269_s0, %s7269_s0, %s7270_s26  }
 0x1b8   : > { %s7347_s15 = sld [smem:[#allocation89_spill]]  ;;  %s1035_s20 = scalar_lea.vmem [#allocation27], %s6219_s18 }
 0x1b9   : > { %s1042_s27 = sshll.u32 %s1035_s20, 4  ;;  %s7268_s1 = scalar_lea.sflag [#allocation28], %s6216_s29  ;;  %s1043_s27 = int_to_ptr.vmem [resolvable:$true] %s1042_s27 }
 0x1be   : > { %s6405_s2 = scalar_lea.hbm %s7347_s15, %s6222_s28  ;;  %s5226_s14 = scalar_lea.hbm %s7347_s15, 32 }
 0x1bf   : > { %s5222_s30 = scalar_lea.hbm %s6405_s2, 16  ;;  %p5227_p1 = scmp.lt.u32.totalorder %s6405_s2, %s7347_s15 }
 0x1c0   : > { %p5223_p6 = scmp.ne.s32.totalorder %s6405_s2, %s5222_s30  ;;  %p5228_p2 = scmp.lt.u32.totalorder %s5226_s14, %s5222_s30 }
 0x1c1   : > { %p5230_p5 = scmp.lt.u32.totalorder %s5222_s30, %s6405_s2 }
 0x1c2   : > { %p5224_p12 = pnand %p5223_p6, %p7342_p4  ;;  %p5229_p11 = por %p5228_p2, %p5227_p1 }
 0x1c4   : > { %p5225_p13 = pneg %p5224_p12  ;;  %p5231_p0 = por %p5230_p5, %p5229_p11 }
 0x1c6   : > { %p5232_p8 = pnand %p5231_p0, %p5225_p13 }
 0x1c8   : > { %5235 = shalt.err (!%p5232_p8)
}
 0x1c9   : > { %s5236_s20 = scalar_lea.vmem %s1043_s27, 16  ;;  %s5747_s19 = smov [#allocation27]  }
 0x1ca   : > { %p5237_p3 = scmp.ne.s32.totalorder %s1043_s27, %s5236_s20  ;;  %s5240_s9 = sshll.u32 %s5747_s19, 4  ;;  %s5241_s9 = int_to_ptr.vmem [resolvable:$false] %s5240_s9 }
 0x1cb   : > { %s5242_s7 = scalar_lea.vmem %s5241_s9, 32  ;;  %p5243_p10 = scmp.lt.s32.totalorder %s1043_s27, %s5241_s9 }
 0x1cc   : > { %p5238_p9 = pnand %p5237_p3, %p7342_p4  ;;  %p5244_p6 = scmp.lt.s32.totalorder %s5242_s7, %s5236_s20 }
 0x1ce   : > { %p5239_p7 = pneg %p5238_p9  ;;  %p5245_p12 = por %p5244_p6, %p5243_p10 }
 0x1d0   : > { %p5246_p1 = pnand %p5245_p12, %p5239_p7 }
 0x1d2   : > { %5249 = shalt.err (!%p5246_p1)
}
 0x1d3   : > { %4534 = dma.hbm_to_vmem [thread:$0]  (%p7342_p4), %s6405_s2, 16, %s1043_s27, %s7268_s1  }
 0x1d4   : > { %s4104_s19 = sshll.u32 %s6219_s18, 7  ;;  %s4251_s30 = sshll.u32 %s5720_s8, 11 }
 0x1d5   : > { %s6435_s14 = scalar_lea.hbm %s7202_s17, %s4251_s30  ;;  %s1070_s16 = scalar_lea.vmem [#allocation30], %s4104_s19 }
 0x1d6   : > { %s1077_s5 = sshll.u32 %s1070_s16, 4  ;;  %s7272_s20 = scalar_lea.sflag [#allocation31], %s6216_s29  ;;  %s6439_s5 = int_to_ptr.vmem [resolvable:$true] %s1077_s5 }
 0x1d7   : > { %s5250_s7 = scalar_lea.hbm %s6435_s14, 2048  ;;  %s5254_s9 = scalar_lea.hbm %s7202_s17, 4096 }
 0x1d8   : > { %p5251_p13 = scmp.ne.s32.totalorder %s6435_s14, %s5250_s7  ;;  %p5255_p5 = scmp.lt.u32.totalorder %s6435_s14, %s7202_s17 }
 0x1d9   : > { %p5256_p0 = scmp.lt.u32.totalorder %s5254_s9, %s5250_s7  ;;  %p5258_p3 = scmp.lt.u32.totalorder %s5250_s7, %s6435_s14 }
 0x1da   : > { %p5252_p2 = pnand %p5251_p13, %p7342_p4 }
 0x1db   : > { %p5257_p8 = por %p5256_p0, %p5255_p5 }
 0x1dc   : > { %p5253_p11 = pneg %p5252_p2 }
 0x1dd   : > { %p5259_p9 = por %p5258_p3, %p5257_p8 }
 0x1df   : > { %p5260_p7 = pnand %p5259_p9, %p5253_p11 }
 0x1e1   : > { %5263 = shalt.err (!%p5260_p7)
}
 0x1e2   : > { %s5264_s16 = scalar_lea.vmem %s6439_s5, 2048  ;;  %s5748_s2 = smov [#allocation30]  }
 0x1e3   : > { %p5265_p10 = scmp.ne.s32.totalorder %s6439_s5, %s5264_s16  ;;  %s5268_s27 = sshll.u32 %s5748_s2, 4  ;;  %s5269_s27 = int_to_ptr.vmem [resolvable:$false] %s5268_s27 }
 0x1e4   : > { %s5270_s1 = scalar_lea.vmem %s5269_s27, 4096  ;;  %p5271_p1 = scmp.lt.s32.totalorder %s6439_s5, %s5269_s27 }
 0x1e5   : > { %p5266_p6 = pnand %p5265_p10, %p7342_p4  ;;  %p5272_p13 = scmp.lt.s32.totalorder %s5270_s1, %s5264_s16 }
 0x1e7   : > { %p5267_p12 = pneg %p5266_p6  ;;  %p5273_p2 = por %p5272_p13, %p5271_p1 }
 0x1e9   : > { %p5274_p5 = pnand %p5273_p2, %p5267_p12 }
 0x1eb   : > { %5277 = shalt.err (!%p5274_p5)
}
 0x1ec   : > { %s5749_s7 = smov 128   ;;  %s5750_s9 = smov 8  }
 0x1ed   : > { %4536 = dma.hbm_to_vmem [thread:$0]  (%p7342_p4), %s6435_s14, 2048, %s6439_s5, %s7272_s20, %s5749_s7, %s5749_s7, %s5750_s9  }
 0x1ee   : > { %s7348_s2 = sld [smem:[#allocation92_spill]]  ;;  %s1110_s1 = scalar_lea.vmem [#allocation33], %s4104_s19 }
 0x1ef   : > { %s1117_s26 = sshll.u32 %s1110_s1, 4  ;;  %s827_s10 = sand.u32 1, %s5708_s3   ;;  %s6474_s26 = int_to_ptr.vmem [resolvable:$true] %s1117_s26 }
 0x1f0   : > { %s7275_s11 = scalar_lea.sflag [#allocation34], %s6216_s29 }
 0x1f4   : > { %s7349_s0 = smov %s7348_s2  ;;  %s6470_s27 = scalar_lea.hbm %s7348_s2, %s4251_s30 }
 0x1f5   : > { %s5278_s13 = scalar_lea.hbm %s6470_s27, 2048  ;;  %s5282_s30 = scalar_lea.hbm %s7349_s0, 4096 }
 0x1f6   : > { %p5279_p11 = scmp.ne.s32.totalorder %s6470_s27, %s5278_s13  ;;  %p5283_p3 = scmp.lt.u32.totalorder %s6470_s27, %s7349_s0 }
 0x1f7   : > { %p5284_p9 = scmp.lt.u32.totalorder %s5282_s30, %s5278_s13  ;;  %p5286_p10 = scmp.lt.u32.totalorder %s5278_s13, %s6470_s27 }
 0x1f8   : > { %p5280_p0 = pnand %p5279_p11, %p7342_p4 }
 0x1f9   : > { %p5285_p7 = por %p5284_p9, %p5283_p3 }
 0x1fa   : > { %p5281_p8 = pneg %p5280_p0 }
 0x1fb   : > { %p5287_p6 = por %p5286_p10, %p5285_p7 }
 0x1fd   : > { %p5288_p12 = pnand %p5287_p6, %p5281_p8 }
 0x1ff   : > { %5291 = shalt.err (!%p5288_p12)
}
 0x200   : > { %s5292_s19 = scalar_lea.vmem %s6474_s26, 2048  ;;  %s5751_s25 = smov [#allocation33]  }
 0x201   : > { %p5293_p1 = scmp.ne.s32.totalorder %s6474_s26, %s5292_s19  ;;  %s5296_s16 = sshll.u32 %s5751_s25, 4  ;;  %s5297_s16 = int_to_ptr.vmem [resolvable:$false] %s5296_s16 }
 0x202   : > { %s5298_s2 = scalar_lea.vmem %s5297_s16, 4096  ;;  %p5299_p5 = scmp.lt.s32.totalorder %s6474_s26, %s5297_s16 }
 0x203   : > { %p5294_p13 = pnand %p5293_p1, %p7342_p4  ;;  %p5300_p11 = scmp.lt.s32.totalorder %s5298_s2, %s5292_s19 }
 0x205   : > { %p5295_p2 = pneg %p5294_p13  ;;  %p5301_p0 = por %p5300_p11, %p5299_p5 }
 0x207   : > { %p5302_p3 = pnand %p5301_p0, %p5295_p2 }
 0x209   : > { %5305 = shalt.err (!%p5302_p3)
}
 0x20a   : > { %s7350_s13 = smov 4   ;;  %s7351_s1 = smov 64  }
 0x20b   : > { %s7352_s14 = sld [smem:[#allocation62_spill]]  ;;  %s7353_s5 = sld [smem:[#allocation65_spill]] }
 0x20c   : > { %4538 = dma.hbm_to_vmem [thread:$0]  (%p7342_p4), %s6470_s27, 2048, %s6474_s26, %s7275_s11, %s7351_s1, %s7351_s1, %s7350_s13  }
 0x20d   : > { %s4081_s30 = sshll.u32 %s827_s10, 3  ;;  %s7354_s25 = sld [smem:[#allocation74_spill]] }
 0x20e   : > { %s831_s2 = scalar_lea.vmem [#allocation3], %s4081_s30  ;;  %s828_s0 = scalar_lea.sflag [#allocation4], %s827_s10 }
 0x20f   : > { %s839_s20 = sshll.u32 %s831_s2, 4  ;;  %s840_s20 = int_to_ptr.vmem [resolvable:$true] %s839_s20 }
 0x211   : > { %s4246_s7 = sshll.u32 %s7352_s14, 7  ;;  %p7355_p9 = scmp.ne.s32.totalorder %s7353_s5, 0 }
 0x213   : > { %s6510_s16 = scalar_lea.hbm %s7354_s25, %s4246_s7  ;;  %s5310_s13 = scalar_lea.hbm %s7354_s25, 256 }
 0x214   : > { %s5306_s15 = scalar_lea.hbm %s6510_s16, 128  ;;  %p5311_p6 = scmp.lt.u32.totalorder %s6510_s16, %s7354_s25 }
 0x215   : > { %p5307_p8 = scmp.ne.s32.totalorder %s6510_s16, %s5306_s15  ;;  %p5312_p12 = scmp.lt.u32.totalorder %s5310_s13, %s5306_s15 }
 0x216   : > { %p5314_p13 = scmp.lt.u32.totalorder %s5306_s15, %s6510_s16 }
 0x217   : > { %p5308_p7 = pnand %p5307_p8, %p7355_p9  ;;  %p5313_p1 = por %p5312_p12, %p5311_p6 }
 0x219   : > { %p5309_p10 = pneg %p5308_p7  ;;  %p5315_p2 = por %p5314_p13, %p5313_p1 }
 0x21b   : > { %p5316_p5 = pnand %p5315_p2, %p5309_p10 }
 0x21d   : > { %5319 = shalt.err (!%p5316_p5)
}
 0x21e   : > { %s5320_s10 = scalar_lea.vmem %s840_s20, 128  ;;  %s5752_s30 = smov [#allocation3]  }
 0x21f   : > { %p5321_p11 = scmp.ne.s32.totalorder %s840_s20, %s5320_s10  ;;  %s5324_s7 = sshll.u32 %s5752_s30, 4  ;;  %s5325_s7 = int_to_ptr.vmem [resolvable:$false] %s5324_s7 }
 0x220   : > { %s5326_s9 = scalar_lea.vmem %s5325_s7, 256  ;;  %p5327_p8 = scmp.lt.s32.totalorder %s840_s20, %s5325_s7 }
 0x221   : > { %p5322_p0 = pnand %p5321_p11, %p7355_p9  ;;  %p5328_p7 = scmp.lt.s32.totalorder %s5326_s9, %s5320_s10 }
 0x223   : > { %p5323_p3 = pneg %p5322_p0  ;;  %p5329_p4 = por %p5328_p7, %p5327_p8 }
 0x225   : > { %p5330_p6 = pnand %p5329_p4, %p5323_p3 }
 0x227   : > { %5333 = shalt.err (!%p5330_p6)
}
 0x228   : > { %4523 = dma.hbm_to_vmem [thread:$0]  (%p7355_p9), %s6510_s16, 128, %s840_s20, %s828_s0  }
 0x229   : > { %s7356_s2 = sld [smem:[#allocation80_spill]]  ;;  %s866_s27 = scalar_lea.vmem [#allocation14], %s6219_s18 }
 0x22a   : > { %s873_s1 = sshll.u32 %s866_s27, 4  ;;  %p7358_p10 = scmp.ne.s32.totalorder %s7318_s12, 0  ;;  %s874_s1 = int_to_ptr.vmem [resolvable:$true] %s873_s1 }
 0x22f   : > { %s7357_s13 = smov %s7356_s2  ;;  %s6535_s26 = scalar_lea.hbm %s7356_s2, %s6222_s28 }
 0x230   : > { %s5334_s14 = scalar_lea.hbm %s6535_s26, 16  ;;  %s5338_s0 = scalar_lea.hbm %s7357_s13, 32 }
 0x231   : > { %p5335_p4 = scmp.ne.s32.totalorder %s6535_s26, %s5334_s14  ;;  %p5339_p9 = scmp.lt.u32.totalorder %s6535_s26, %s7357_s13 }
 0x232   : > { %p5340_p13 = scmp.lt.u32.totalorder %s5338_s0, %s5334_s14  ;;  %p5342_p5 = scmp.lt.u32.totalorder %s5334_s14, %s6535_s26 }
 0x233   : > { %p5336_p12 = pnand %p5335_p4, %p7358_p10 }
 0x234   : > { %p5341_p2 = por %p5340_p13, %p5339_p9 }
 0x235   : > { %p5337_p1 = pneg %p5336_p12 }
 0x236   : > { %p5343_p11 = por %p5342_p5, %p5341_p2 }
 0x238   : > { %p5344_p0 = pnand %p5343_p11, %p5337_p1 }
 0x23a   : > { %5347 = shalt.err (!%p5344_p0)
}
 0x23b   : > { %s5348_s30 = scalar_lea.vmem %s874_s1, 16  ;;  %s5753_s7 = smov [#allocation14]  }
 0x23c   : > { %p5349_p3 = scmp.ne.s32.totalorder %s874_s1, %s5348_s30  ;;  %s5352_s9 = sshll.u32 %s5753_s7, 4  ;;  %s5353_s9 = int_to_ptr.vmem [resolvable:$false] %s5352_s9 }
 0x23d   : > { %s5354_s15 = scalar_lea.vmem %s5353_s9, 32  ;;  %p5355_p6 = scmp.lt.s32.totalorder %s874_s1, %s5353_s9 }
 0x23e   : > { %p5350_p8 = pnand %p5349_p3, %p7358_p10  ;;  %p5356_p4 = scmp.lt.s32.totalorder %s5354_s15, %s5348_s30 }
 0x240   : > { %p5351_p7 = pneg %p5350_p8  ;;  %p5357_p12 = por %p5356_p4, %p5355_p6 }
 0x242   : > { %p5358_p9 = pnand %p5357_p12, %p5351_p7 }
 0x244   : > { %5361 = shalt.err (!%p5358_p9)
}
 0x245   : > { %s7359_s19 = scalar_lea.sflag [#allocation13], %s6216_s29  ;;  %s7360_s14 = sld [smem:[#allocation82_spill]] }
 0x246   : > { %4525 = dma.hbm_to_vmem [thread:$0]  (%p7358_p10), %s6535_s26, 16, %s874_s1, %s7359_s19  }
 0x247   : > { %s904_s10 = scalar_lea.vmem [#allocation17], %s6219_s18 }
 0x248   : > { %s911_s0 = sshll.u32 %s904_s10, 4  ;;  %s912_s0 = int_to_ptr.vmem [resolvable:$true] %s911_s0 }
 0x24b   : > { %s6561_s5 = scalar_lea.hbm %s7360_s14, %s6222_s28  ;;  %s5366_s26 = scalar_lea.hbm %s7360_s14, 32 }
 0x24c   : > { %s5362_s20 = scalar_lea.hbm %s6561_s5, 16  ;;  %p5367_p5 = scmp.lt.u32.totalorder %s6561_s5, %s7360_s14 }
 0x24d   : > { %p5363_p1 = scmp.ne.s32.totalorder %s6561_s5, %s5362_s20  ;;  %p5368_p11 = scmp.lt.u32.totalorder %s5366_s26, %s5362_s20 }
 0x24e   : > { %p5370_p3 = scmp.lt.u32.totalorder %s5362_s20, %s6561_s5 }
 0x24f   : > { %p5364_p13 = pnand %p5363_p1, %p7358_p10  ;;  %p5369_p0 = por %p5368_p11, %p5367_p5 }
 0x251   : > { %p5365_p2 = pneg %p5364_p13  ;;  %p5371_p8 = por %p5370_p3, %p5369_p0 }
 0x253   : > { %p5372_p7 = pnand %p5371_p8, %p5365_p2 }
 0x255   : > { %5375 = shalt.err (!%p5372_p7)
}
 0x256   : > { %s5376_s9 = scalar_lea.vmem %s912_s0, 16  ;;  %s5754_s15 = smov [#allocation17]  }
 0x257   : > { %p5377_p6 = scmp.ne.s32.totalorder %s912_s0, %s5376_s9  ;;  %s5380_s19 = sshll.u32 %s5754_s15, 4  ;;  %s5381_s19 = int_to_ptr.vmem [resolvable:$false] %s5380_s19 }
 0x258   : > { %s5382_s2 = scalar_lea.vmem %s5381_s19, 32  ;;  %p5383_p9 = scmp.lt.s32.totalorder %s912_s0, %s5381_s19 }
 0x259   : > { %p5378_p4 = pnand %p5377_p6, %p7358_p10  ;;  %p5384_p1 = scmp.lt.s32.totalorder %s5382_s2, %s5376_s9 }
 0x25b   : > { %p5379_p12 = pneg %p5378_p4  ;;  %p5385_p13 = por %p5384_p1, %p5383_p9 }
 0x25d   : > { %p5386_p5 = pnand %p5385_p13, %p5379_p12 }
 0x25f   : > { %5389 = shalt.err (!%p5386_p5)
}
 0x260   : > { %s7361_s27 = scalar_lea.sflag [#allocation16], %s6216_s29  ;;  %s7362_s16 = sld [smem:[#allocation84_spill]] }
 0x261   : > { %4527 = dma.hbm_to_vmem [thread:$0]  (%p7358_p10), %s6561_s5, 16, %s912_s0, %s7361_s27  }
 0x262   : > { %s942_s26 = scalar_lea.vmem [#allocation20], %s6219_s18 }
 0x263   : > { %s949_s1 = sshll.u32 %s942_s26, 4  ;;  %s950_s1 = int_to_ptr.vmem [resolvable:$true] %s949_s1 }
 0x266   : > { %s6587_s30 = scalar_lea.hbm %s7362_s16, %s6222_s28  ;;  %s5394_s5 = scalar_lea.hbm %s7362_s16, 32 }
 0x267   : > { %s5390_s7 = scalar_lea.hbm %s6587_s30, 16  ;;  %p5395_p3 = scmp.lt.u32.totalorder %s6587_s30, %s7362_s16 }
 0x268   : > { %p5391_p2 = scmp.ne.s32.totalorder %s6587_s30, %s5390_s7  ;;  %p5396_p8 = scmp.lt.u32.totalorder %s5394_s5, %s5390_s7 }
 0x269   : > { %p5398_p6 = scmp.lt.u32.totalorder %s5390_s7, %s6587_s30 }
 0x26a   : > { %p5392_p11 = pnand %p5391_p2, %p7358_p10  ;;  %p5397_p7 = por %p5396_p8, %p5395_p3 }
 0x26c   : > { %p5393_p0 = pneg %p5392_p11  ;;  %p5399_p4 = por %p5398_p6, %p5397_p7 }
 0x26e   : > { %p5400_p12 = pnand %p5399_p4, %p5393_p0 }
 0x270   : > { %5403 = shalt.err (!%p5400_p12)
}
 0x271   : > { %s5404_s2 = scalar_lea.vmem %s950_s1, 16  ;;  %s5755_s27 = smov [#allocation20]  }
 0x272   : > { %p5405_p9 = scmp.ne.s32.totalorder %s950_s1, %s5404_s2  ;;  %s5408_s10 = sshll.u32 %s5755_s27, 4  ;;  %s5409_s10 = int_to_ptr.vmem [resolvable:$false] %s5408_s10 }
 0x273   : > { %s5410_s20 = scalar_lea.vmem %s5409_s10, 32  ;;  %p5411_p5 = scmp.lt.s32.totalorder %s950_s1, %s5409_s10 }
 0x274   : > { %p5406_p1 = pnand %p5405_p9, %p7358_p10  ;;  %p5412_p2 = scmp.lt.s32.totalorder %s5410_s20, %s5404_s2 }
 0x276   : > { %p5407_p13 = pneg %p5406_p1  ;;  %p5413_p11 = por %p5412_p2, %p5411_p5 }
 0x278   : > { %p5414_p3 = pnand %p5413_p11, %p5407_p13 }
 0x27a   : > { %5417 = shalt.err (!%p5414_p3)
}
 0x27b   : > { %s7363_s26 = scalar_lea.sflag [#allocation19], %s6216_s29  ;;  %s7364_s15 = sld [smem:[#allocation86_spill]] }
 0x27c   : > { %4529 = dma.hbm_to_vmem [thread:$0]  (%p7358_p10), %s6587_s30, 16, %s950_s1, %s7363_s26  }
 0x27d   : > { %s980_s0 = scalar_lea.vmem [#allocation23], %s6219_s18 }
 0x27e   : > { %s987_s19 = sshll.u32 %s980_s0, 4  ;;  %s988_s19 = int_to_ptr.vmem [resolvable:$true] %s987_s19 }
 0x281   : > { %s6613_s5 = scalar_lea.hbm %s7364_s15, %s6222_s28  ;;  %s5422_s30 = scalar_lea.hbm %s7364_s15, 32 }
 0x282   : > { %s5418_s2 = scalar_lea.hbm %s6613_s5, 16  ;;  %p5423_p6 = scmp.lt.u32.totalorder %s6613_s5, %s7364_s15 }
 0x283   : > { %p5419_p0 = scmp.ne.s32.totalorder %s6613_s5, %s5418_s2  ;;  %p5424_p4 = scmp.lt.u32.totalorder %s5422_s30, %s5418_s2 }
 0x284   : > { %p5426_p9 = scmp.lt.u32.totalorder %s5418_s2, %s6613_s5 }
 0x285   : > { %p5420_p8 = pnand %p5419_p0, %p7358_p10  ;;  %p5425_p12 = por %p5424_p4, %p5423_p6 }
 0x287   : > { %p5421_p7 = pneg %p5420_p8  ;;  %p5427_p1 = por %p5426_p9, %p5425_p12 }
 0x289   : > { %p5428_p13 = pnand %p5427_p1, %p5421_p7 }
 0x28b   : > { %5431 = shalt.err (!%p5428_p13)
}
 0x28c   : > { %s5432_s26 = scalar_lea.vmem %s988_s19, 16  ;;  %s5756_s7 = smov [#allocation23]  }
 0x28d   : > { %p5433_p5 = scmp.ne.s32.totalorder %s988_s19, %s5432_s26  ;;  %s5436_s9 = sshll.u32 %s5756_s7, 4  ;;  %s5437_s9 = int_to_ptr.vmem [resolvable:$false] %s5436_s9 }
 0x28e   : > { %s5438_s0 = scalar_lea.vmem %s5437_s9, 32  ;;  %p5439_p3 = scmp.lt.s32.totalorder %s988_s19, %s5437_s9 }
 0x28f   : > { %p5434_p2 = pnand %p5433_p5, %p7358_p10  ;;  %p5440_p0 = scmp.lt.s32.totalorder %s5438_s0, %s5432_s26 }
 0x291   : > { %p5435_p11 = pneg %p5434_p2  ;;  %p5441_p8 = por %p5440_p0, %p5439_p3 }
 0x293   : > { %p5442_p4 = pnand %p5441_p8, %p5435_p11 }
 0x295   : > { %5445 = shalt.err (!%p5442_p4)
}
 0x296   : > { %s7365_s2 = scalar_lea.sflag [#allocation22], %s6216_s29  ;;  %s7366_s30 = sld [smem:[#allocation88_spill]] }
 0x297   : > { %4531 = dma.hbm_to_vmem [thread:$0]  (%p7358_p10), %s6613_s5, 16, %s988_s19, %s7365_s2  }
 0x298   : > { %s1018_s26 = scalar_lea.vmem [#allocation26], %s6219_s18 }
 0x299   : > { %s1025_s7 = sshll.u32 %s1018_s26, 4  ;;  %s1026_s7 = int_to_ptr.vmem [resolvable:$true] %s1025_s7 }
 0x29c   : > { %s7367_s20 = smov %s7366_s30  ;;  %s6639_s1 = scalar_lea.hbm %s7366_s30, %s6222_s28 }
 0x29d   : > { %s5446_s9 = scalar_lea.hbm %s6639_s1, 16  ;;  %s5450_s5 = scalar_lea.hbm %s7367_s20, 32 }
 0x29e   : > { %p5447_p7 = scmp.ne.s32.totalorder %s6639_s1, %s5446_s9  ;;  %p5451_p9 = scmp.lt.u32.totalorder %s6639_s1, %s7367_s20 }
 0x29f   : > { %p5452_p1 = scmp.lt.u32.totalorder %s5450_s5, %s5446_s9  ;;  %p5454_p5 = scmp.lt.u32.totalorder %s5446_s9, %s6639_s1 }
 0x2a0   : > { %p5448_p6 = pnand %p5447_p7, %p7358_p10 }
 0x2a1   : > { %p5453_p13 = por %p5452_p1, %p5451_p9 }
 0x2a2   : > { %p5449_p12 = pneg %p5448_p6 }
 0x2a3   : > { %p5455_p2 = por %p5454_p5, %p5453_p13 }
 0x2a5   : > { %p5456_p11 = pnand %p5455_p2, %p5449_p12 }
 0x2a7   : > { %5459 = shalt.err (!%p5456_p11)
}
 0x2a8   : > { %s5460_s27 = scalar_lea.vmem %s1026_s7, 16  ;;  %s5757_s10 = smov [#allocation26]  }
 0x2a9   : > { %p5461_p3 = scmp.ne.s32.totalorder %s1026_s7, %s5460_s27  ;;  %s5464_s30 = sshll.u32 %s5757_s10, 4  ;;  %s5465_s30 = int_to_ptr.vmem [resolvable:$false] %s5464_s30 }
 0x2aa   : > { %s5466_s11 = scalar_lea.vmem %s5465_s30, 32  ;;  %p5467_p4 = scmp.lt.s32.totalorder %s1026_s7, %s5465_s30 }
 0x2ab   : > { %p5462_p0 = pnand %p5461_p3, %p7358_p10  ;;  %p5468_p7 = scmp.lt.s32.totalorder %s5466_s11, %s5460_s27 }
 0x2ad   : > { %p5463_p8 = pneg %p5462_p0  ;;  %p5469_p6 = por %p5468_p7, %p5467_p4 }
 0x2af   : > { %p5470_p1 = pnand %p5469_p6, %p5463_p8 }
 0x2b1   : > { %5473 = shalt.err (!%p5470_p1)
}
 0x2b2   : > { %s7368_s26 = scalar_lea.sflag [#allocation25], %s6216_s29  ;;  %s7369_s5 = sld [smem:[#allocation90_spill]] }
 0x2b3   : > { %4533 = dma.hbm_to_vmem [thread:$0]  (%p7358_p10), %s6639_s1, 16, %s1026_s7, %s7368_s26  }
 0x2b4   : > { %s1052_s2 = scalar_lea.vmem [#allocation29], %s6219_s18 }
 0x2b5   : > { %s1059_s27 = sshll.u32 %s1052_s2, 4  ;;  %s1060_s27 = int_to_ptr.vmem [resolvable:$true] %s1059_s27 }
 0x2b8   : > { %s6665_s19 = scalar_lea.hbm %s7369_s5, %s6222_s28  ;;  %s5478_s7 = scalar_lea.hbm %s7369_s5, 32 }
 0x2b9   : > { %s5474_s30 = scalar_lea.hbm %s6665_s19, 16  ;;  %p5479_p5 = scmp.lt.u32.totalorder %s6665_s19, %s7369_s5 }
 0x2ba   : > { %p5475_p12 = scmp.ne.s32.totalorder %s6665_s19, %s5474_s30  ;;  %p5480_p2 = scmp.lt.u32.totalorder %s5478_s7, %s5474_s30 }
 0x2bb   : > { %p5482_p3 = scmp.lt.u32.totalorder %s5474_s30, %s6665_s19 }
 0x2bc   : > { %p5476_p9 = pnand %p5475_p12, %p7358_p10  ;;  %p5481_p11 = por %p5480_p2, %p5479_p5 }
 0x2be   : > { %p5477_p13 = pneg %p5476_p9  ;;  %p5483_p0 = por %p5482_p3, %p5481_p11 }
 0x2c0   : > { %p5484_p8 = pnand %p5483_p0, %p5477_p13 }
 0x2c2   : > { %5487 = shalt.err (!%p5484_p8)
}
 0x2c3   : > { %s5488_s0 = scalar_lea.vmem %s1060_s27, 16  ;;  %s5758_s2 = smov [#allocation29]  }
 0x2c4   : > { %p5489_p4 = scmp.ne.s32.totalorder %s1060_s27, %s5488_s0  ;;  %s5492_s10 = sshll.u32 %s5758_s2, 4  ;;  %s5493_s10 = int_to_ptr.vmem [resolvable:$false] %s5492_s10 }
 0x2c5   : > { %s5494_s11 = scalar_lea.vmem %s5493_s10, 32  ;;  %p5495_p1 = scmp.lt.s32.totalorder %s1060_s27, %s5493_s10 }
 0x2c6   : > { %p5490_p7 = pnand %p5489_p4, %p7358_p10  ;;  %p5496_p12 = scmp.lt.s32.totalorder %s5494_s11, %s5488_s0 }
 0x2c8   : > { %p5491_p6 = pneg %p5490_p7  ;;  %p5497_p9 = por %p5496_p12, %p5495_p1 }
 0x2ca   : > { %p5498_p2 = pnand %p5497_p9, %p5491_p6 }
 0x2cc   : > { %5501 = shalt.err (!%p5498_p2)
}
 0x2cd   : > { %s7370_s30 = scalar_lea.sflag [#allocation28], %s6216_s29  ;;  %s4252_s1 = sshll.u32 %s5720_s8, 5 }
 0x2ce   : > { %4535 = dma.hbm_to_vmem [thread:$0]  (%p7358_p10), %s6665_s19, 16, %s1060_s27, %s7370_s30  }
 0x2cf   : > { %s7371_s9 = sld [smem:[#allocation91_spill]]  ;;  %s7372_s10 = sshll.u32 %s6219_s18, 1 }
 0x2d0   : > { %s1091_s0 = scalar_lea.vmem [#allocation32], %s7372_s10 }
 0x2d1   : > { %s1099_s11 = sshll.u32 %s1091_s0, 4  ;;  %s1100_s11 = int_to_ptr.vmem [resolvable:$true] %s1099_s11 }
 0x2d5   : > { %s6692_s2 = scalar_lea.hbm %s7371_s9, %s4252_s1  ;;  %s5506_s30 = scalar_lea.hbm %s7371_s9, 64 }
 0x2d6   : > { %s5502_s5 = scalar_lea.hbm %s6692_s2, 32  ;;  %p5507_p3 = scmp.lt.u32.totalorder %s6692_s2, %s7371_s9 }
 0x2d7   : > { %p5503_p13 = scmp.ne.s32.totalorder %s6692_s2, %s5502_s5  ;;  %p5508_p0 = scmp.lt.u32.totalorder %s5506_s30, %s5502_s5 }
 0x2d8   : > { %p5510_p4 = scmp.lt.u32.totalorder %s5502_s5, %s6692_s2 }
 0x2d9   : > { %p5504_p5 = pnand %p5503_p13, %p7358_p10  ;;  %p5509_p8 = por %p5508_p0, %p5507_p3 }
 0x2db   : > { %p5505_p11 = pneg %p5504_p5  ;;  %p5511_p7 = por %p5510_p4, %p5509_p8 }
 0x2dd   : > { %p5512_p6 = pnand %p5511_p7, %p5505_p11 }
 0x2df   : > { %5515 = shalt.err (!%p5512_p6)
}
 0x2e0   : > { %s5516_s26 = scalar_lea.vmem %s1100_s11, 32  ;;  %s5759_s10 = smov [#allocation32]  }
 0x2e1   : > { %p5517_p1 = scmp.ne.s32.totalorder %s1100_s11, %s5516_s26  ;;  %s5520_s0 = sshll.u32 %s5759_s10, 4  ;;  %s5521_s0 = int_to_ptr.vmem [resolvable:$false] %s5520_s0 }
 0x2e2   : > { %s5522_s19 = scalar_lea.vmem %s5521_s0, 64  ;;  %p5523_p2 = scmp.lt.s32.totalorder %s1100_s11, %s5521_s0 }
 0x2e3   : > { %p5518_p12 = pnand %p5517_p1, %p7358_p10  ;;  %p5524_p13 = scmp.lt.s32.totalorder %s5522_s19, %s5516_s26 }
 0x2e5   : > { %p5519_p9 = pneg %p5518_p12  ;;  %p5525_p5 = por %p5524_p13, %p5523_p2 }
 0x2e7   : > { %p5526_p0 = pnand %p5525_p5, %p5519_p9 }
 0x2e9   : > { %5529 = shalt.err (!%p5526_p0)
}
 0x2ea   : > { %s7373_s5 = scalar_lea.sflag [#allocation31], %s6216_s29  ;;  %s7374_s7 = sld [smem:[#allocation93_spill]] }
 0x2eb   : > { %4537 = dma.hbm_to_vmem [thread:$0]  (%p7358_p10), %s6692_s2, 32, %s1100_s11, %s7373_s5  }
 0x2ec   : > { %s1130_s26 = scalar_lea.vmem [#allocation35], %s6219_s18 }
 0x2ed   : > { %s1137_s10 = sshll.u32 %s1130_s26, 4  ;;  %s1138_s10 = int_to_ptr.vmem [resolvable:$true] %s1137_s10 }
 0x2f0   : > { %s7375_s9 = smov %s7374_s7  ;;  %s6719_s1 = scalar_lea.hbm %s7374_s7, %s6222_s28 }
 0x2f1   : > { %s5530_s0 = scalar_lea.hbm %s6719_s1, 16  ;;  %s5534_s2 = scalar_lea.hbm %s7375_s9, 32 }
 0x2f2   : > { %p5531_p11 = scmp.ne.s32.totalorder %s6719_s1, %s5530_s0  ;;  %p5535_p4 = scmp.lt.u32.totalorder %s6719_s1, %s7375_s9 }
 0x2f3   : > { %p5536_p7 = scmp.lt.u32.totalorder %s5534_s2, %s5530_s0  ;;  %p5538_p1 = scmp.lt.u32.totalorder %s5530_s0, %s6719_s1 }
 0x2f4   : > { %p5532_p3 = pnand %p5531_p11, %p7358_p10 }
 0x2f5   : > { %p5537_p6 = por %p5536_p7, %p5535_p4 }
 0x2f6   : > { %p5533_p8 = pneg %p5532_p3 }
 0x2f7   : > { %p5539_p12 = por %p5538_p1, %p5537_p6 }
 0x2f9   : > { %p5540_p9 = pnand %p5539_p12, %p5533_p8 }
 0x2fb   : > { %5543 = shalt.err (!%p5540_p9)
}
 0x2fc   : > { %s5544_s18 = scalar_lea.vmem %s1138_s10, 16  ;;  %s5760_s28 = smov [#allocation35]  }
 0x2fd   : > { %p5545_p2 = scmp.ne.s32.totalorder %s1138_s10, %s5544_s18  ;;  %s5548_s27 = sshll.u32 %s5760_s28, 4  ;;  %s5549_s27 = int_to_ptr.vmem [resolvable:$false] %s5548_s27 }
 0x2fe   : > { %s5550_s13 = scalar_lea.vmem %s5549_s27, 32  ;;  %p5551_p0 = scmp.lt.s32.totalorder %s1138_s10, %s5549_s27 }
 0x2ff   : > { %p5546_p13 = pnand %p5545_p2, %p7358_p10  ;;  %p5552_p11 = scmp.lt.s32.totalorder %s5550_s13, %s5544_s18 }
 0x301   : > { %p5547_p5 = pneg %p5546_p13  ;;  %p5553_p3 = por %p5552_p11, %p5551_p0 }
 0x303   : > { %p5554_p4 = pnand %p5553_p3, %p5547_p5 }
 0x305   : > { %5557 = shalt.err (!%p5554_p4)
}
 0x306   : > { %s7376_s30 = scalar_lea.sflag [#allocation34], %s6216_s29 }
 0x307   : > { %4539 = dma.hbm_to_vmem [thread:$0]  (%p7358_p10), %s6719_s1, 16, %s1138_s10, %s7376_s30  }
 0x308 PF: > { %s7377_s7 = sld [smem:[#allocation73_spill]] }
 0x30e   : > { %p7378_p8 = scmp.ne.s32.totalorder %s7377_s7, 0 }
 0x30f   : > { %s7379_s26 = sld [smem:[#allocation59_spill]] (!%p7378_p8)  ;;  %s7380_s0 = sld [smem:[#allocation67_spill]] (!%p7378_p8) }
 0x310   : > { %1146 = sbr.rel (%p7378_p8) target bundleno = 4281 (0x10b9), region = 120 }
 0x315   : > { %s6744_s19 = sand.u32 (!%p7378_p8), 1, %s7379_s26   ;;  %p7381_p7 = scmp.ne.s32.totalorder (!%p7378_p8), %s7380_s0, 0 }
 0x316   : > { %s4115_s2 = sshll.u32 (!%p7378_p8), %s6744_s19, 3  ;;  %s1149_s11 = scalar_lea.sflag (!%p7378_p8), [#allocation4], %s6744_s19 }
 0x317   : > { %s6748_s5 = scalar_lea.vmem [#allocation3], %s4115_s2 }
 0x318   : > { %5631 = dma.done.wait (%p7381_p7), %s1149_s11, 128  }
 0x319   : > { %5633 = vsyncadd (%p7381_p7), %s1149_s11, 4294967168  ;;  %s7382_s12 = sld [smem:[#allocation63_spill]] }
 0x31f   : > { %p7383_p10 = scmp.eq.s32.totalorder %s7382_s12, 0 }
 0x321   : > { %5635 = dma.done.wait (%p7383_p10), [#allocation7], 2064   ;;  %p7384_p6 = pmov %p7383_p10 }
 0x323   : > { %5637 = vsyncadd (%p7384_p6), [#allocation7], 4294965232  ;;  %p7385_p1 = pmov %p7384_p6 }
 0x325   : > { %5639 = dma.done.wait (%p7385_p1), [#allocation10], 144   ;;  %p7386_p12 = pmov %p7385_p1 }
 0x326   : > { %s7387_s29 = sld [smem:[#allocation57_spill]]  ;;  %s7388_s1 = sld [smem:[#allocation70_spill]] }
 0x327   : > { %5641 = vsyncadd (%p7386_p12), [#allocation10], 4294967152  ;;  %s6763_s10 = sand.u32 1, %s7382_s12  }
 0x328   : > { %s1174_s28 = scalar_lea.sflag [#allocation13], %s6763_s10 }
 0x32c   : > { %s6766_s18 = sand.u32 1, %s7387_s29   ;;  %p7389_p9 = scmp.ne.s32.totalorder %s7388_s1, 0 }
 0x32e   : > { %5643 = dma.done.wait (%p7389_p9), %s1174_s28, 32  }
 0x32f   : > { %5645 = vsyncadd (%p7389_p9), %s1174_s28, 4294967264  ;;  %s4120_s13 = sshll.u32 %s6766_s18, 6  ;;  %s1190_s7 = scalar_lea.sflag [#allocation16], %s6763_s10 }
 0x330   : > { %s6777_s26 = scalar_lea.vmem [#allocation15], %s4120_s13 }
 0x331   : > { %5647 = dma.done.wait (%p7389_p9), %s1190_s7, 1040  }
 0x332   : > { %5649 = vsyncadd (%p7389_p9), %s1190_s7, 4294966256  ;;  %s1207_s2 = scalar_lea.sflag [#allocation19], %s6763_s10  ;;  %s6785_s11 = scalar_lea.vmem [#allocation18], %s4120_s13 }
 0x333   : > { %5651 = dma.done.wait (%p7389_p9), %s1207_s2, 1040  }
 0x334   : > { %5653 = vsyncadd (%p7389_p9), %s1207_s2, 4294966256  ;;  %s1224_s28 = scalar_lea.sflag [#allocation22], %s6763_s10  ;;  %s6793_s30 = scalar_lea.vmem [#allocation21], %s4120_s13 }
 0x335   : > { %5655 = dma.done.wait (%p7389_p9), %s1224_s28, 1040  }
 0x336   : > { %5657 = vsyncadd (%p7389_p9), %s1224_s28, 4294966256  ;;  %s1241_s0 = scalar_lea.sflag [#allocation25], %s6763_s10  ;;  %s6801_s27 = scalar_lea.vmem [#allocation24], %s4120_s13 }
 0x337   : > { %5659 = dma.done.wait (%p7389_p9), %s1241_s0, 1040  }
 0x338   : > { %5661 = vsyncadd (%p7389_p9), %s1241_s0, 4294966256  ;;  %s1258_s29 = scalar_lea.sflag [#allocation28], %s6763_s10 }
 0x339   : > { %5663 = dma.done.wait (%p7389_p9), %s1258_s29, 32  }
 0x33a   : > { %5665 = vsyncadd (%p7389_p9), %s1258_s29, 4294967264  ;;  %s4124_s13 = sshll.u32 %s6766_s18, 7  ;;  %s1274_s7 = scalar_lea.sflag [#allocation31], %s6763_s10 }
 0x33b   : > { %s6817_s0 = scalar_lea.vmem [#allocation30], %s4124_s13 }
 0x33c   : > { %5667 = dma.done.wait (%p7389_p9), %s1274_s7, 2080  }
 0x33d   : > { %5669 = vsyncadd (%p7389_p9), %s1274_s7, 4294965216  ;;  %s4125_s9 = sshll.u32 %s6766_s18, 1  ;;  %s1292_s29 = scalar_lea.sflag [#allocation34], %s6763_s10 }
 0x33e   : > { %s6824_s2 = scalar_lea.vmem [#allocation32], %s4125_s9  ;;  %s6827_s14 = scalar_lea.vmem [#allocation33], %s4124_s13 }
 0x33f   : > { %5671 = dma.done.wait (%p7389_p9), %s1292_s29, 2064  }
 0x340   : > { %5673 = vsyncadd (%p7389_p9), %s1292_s29, 4294965232  ;;  %s1303_s28 = scalar_lea.vmem [#allocation35], %s6766_s18  ;;  %p7390_p2 = pmov %p7385_p1 }
 0x341   : > { %p7391_p13 = pmov %p7385_p1 }
 0x342   : > { %5675 = dma.done.wait (%p7390_p2), [#allocation37], 32  }
 0x343   : > { %5677 = vsyncadd (%p7391_p13), [#allocation37], 4294967264  ;;  %p7392_p5 = pmov %p7385_p1 }
 0x344   : > { %p7393_p0 = pmov %p7385_p1 }
 0x345   : > { %5679 = dma.done.wait (%p7392_p5), [#allocation40], 1040  }
 0x346   : > { %5681 = vsyncadd (%p7393_p0), [#allocation40], 4294966256  ;;  %s1455_s9 = scalar_lea.vmem [#allocation42], %s6744_s19  ;;  %s7394_s10 = sld [smem:[#allocation60_spill]] }
 0x34c   : > { %p4131_p11 = scmp.ne.s32.totalorder %s7394_s10, 0 }
 0x34d   : > { %v4734_v0 = vld [vmem:[#allocation6 + $0x40] sm:$0xff] (!%p4131_p11)   ;;  %v4736_v2 = vld [vmem:[#allocation6 + $0x48] sm:$0xff] (!%p4131_p11)   ;;  %v4738_v4 = vld [vmem:[#allocation6 + $0x50] sm:$0xff] (!%p4131_p11)   ;;  %vm1646_vm0 = vcmask (!%p4131_p11), 1040384  }
 0x34e   : > { %1460 = sbr.rel (%p4131_p11) target bundleno = 1101 (0x44d), region = 224  ;;  %v4735_v1 = vld [vmem:[#allocation6] sm:$0xff] (!%p4131_p11)   ;;  %4254 = vmatprep.subr.bf16.mxu0 (!%p4131_p11), %v4734_v0  ;;  %v4737_v3 = vld [vmem:[#allocation6 + $0x8] sm:$0xff] (!%p4131_p11)   ;;  %v4739_v5 = vld [vmem:[#allocation6 + $0x10] sm:$0xff] (!%p4131_p11)  }
 0x34f   : > { %4255 = vmatpush3.bf16.msra.mxu0 (!%p4131_p11), %v4735_v1  ;;  %v4740_v6 = vld [vmem:[#allocation6 + $0x58] sm:$0xff] (!%p4131_p11)   ;;  %v4742_v8 = vld [vmem:[#allocation6 + $0x60] sm:$0xff] (!%p4131_p11)   ;;  %v4744_v10 = vld [vmem:[#allocation6 + $0x68] sm:$0xff] (!%p4131_p11)  }
 0x350   : > { %4256 = vmatprep.subr.bf16.mxu0 (!%p4131_p11), %v4736_v2  ;;  %v4741_v7 = vld [vmem:[#allocation6 + $0x18] sm:$0xff] (!%p4131_p11)   ;;  %v4743_v9 = vld [vmem:[#allocation6 + $0x20] sm:$0xff] (!%p4131_p11)   ;;  %v4745_v13 = vld [vmem:[#allocation6 + $0x28] sm:$0xff] (!%p4131_p11)  }
 0x351   : > { %v1461_v11 = vld [vmem:[%s6748_s5] sm:$0xff] (!%p4131_p11)  ;;  %v4132_v21 = vld [vmem:[#allocation8] ss:$0 sm:$0xff] (!%p4131_p11)  ;;  %v1642_v27 = vld [vmem:[#allocation9] sm:$0x1] (!%p4131_p11) }
 0x352   : > { %v1463_v12 = vcombine.high (!%p4131_p11), %v1461_v11, %v1461_v11  ;;  %v4746_v15 = vld [vmem:[#allocation6 + $0x70] sm:$0xff] (!%p4131_p11)   ;;  %v4748_v17 = vld [vmem:[#allocation6 + $0x78] sm:$0xff] (!%p4131_p11)   ;;  %v1465_v19 = vpack.c.bf16 (!%p4131_p11), %v1461_v11, %v1461_v11  ;;  %v1648_v29 = vld [vmem:[#allocation11] sm:$0x1f] (!%p4131_p11) }
 0x353   : > { %4257 = vmatpush3.bf16.msra.mxu0 (!%p4131_p11), %v4737_v3  ;;  %v4747_v16 = vld [vmem:[#allocation6 + $0x30] sm:$0xff] (!%p4131_p11)   ;;  %v4749_v18 = vld [vmem:[#allocation6 + $0x38] sm:$0xff] (!%p4131_p11)  }
 0x354   : > { %4258 = vmatprep.subr.bf16.mxu0 (!%p4131_p11), %v4738_v4  ;;  %v1466_v14 = vpack.c.bf16 (!%p4131_p11), %v1463_v12, %v1463_v12 }
 0x356   : > { %1634 = vmatprep.mubr.bf16.mxu0 %v1466_v14 }
 0x357   : > { %4259 = vmatpush3.bf16.msra.mxu0 %v4739_v5 }
 0x358   : > { %4260 = vmatprep.subr.bf16.mxu0 %v4740_v6 }
 0x35b   : > { %4261 = vmatpush3.bf16.msra.mxu0 %v4741_v7 }
 0x35c   : > { %4262 = vmatprep.subr.bf16.mxu0 %v4742_v8 }
 0x35f   : > { %4263 = vmatpush3.bf16.msra.mxu0 %v4743_v9 }
 0x360   : > { %4264 = vmatprep.subr.bf16.mxu0 %v4744_v10 }
 0x363   : > { %4265 = vmatpush3.bf16.msra.mxu0 %v4745_v13 }
 0x364   : > { %4266 = vmatprep.subr.bf16.mxu0 %v4746_v15 }
 0x367   : > { %4267 = vmatpush3.bf16.msra.mxu0 %v4747_v16 }
 0x368   : > { %4268 = vmatprep.subr.bf16.mxu0 %v4748_v17 }
 0x36b   : > { %4269 = vmatpush3.bf16.msra.mxu0 %v4749_v18 }
 0x36e   : > { %1635 = vmatmul.mubr.bf16.vlgmr.msra.gmra.mrb[0].mxu0 %v1465_v19 }
 0x441   : > { %v4270_v20 = vpop.f32.mrb[0].mxu0 }
 0x442   : > { %v4271_v22 = vpop.f32.mrb[1].mxu0 }
 0x443   : > { %v4272_v23 = vadd.f32 %v4271_v22, %v4270_v20  ;;  %v4273_v24 = vpop.f32.mrb[2].mxu0 }
 0x444   : > { %v4274_v25 = vpop.f32.mrb[3].mxu0 }
 0x445   : > { %v1637_v26 = vadd.f32 %v4272_v23, %v4132_v21 }
 0x447   : > { %v1644_v28 = vrot.slane %v1637_v26, 7 }
 0x449   : > { %v1647_v30 = vsel %vm1646_vm0, %v1642_v27, %v1644_v28 }
 0x44a   : > { %v1649_v31 = vadd.f32 %v1648_v29, %v1647_v30 }
 0x44c   : > { %1650 = vst [vmem:[#allocation2] sm:$0x1f] %v1649_v31 }
 0x44d PF: > { %vm1654_vm1 = vcmask 1044480   ;;  %v4751_v34 = vld [vmem:[%s6777_s26] sm:$0xff]   ;;  %v5761_v36 = vmov 0.0   ;;  %v4753_v37 = vld [vmem:[%s6777_s26 + $0x8] sm:$0xff]   ;;  %v4755_v39 = vld [vmem:[%s6777_s26 + $0x10] sm:$0xff]   ;;  %vm5762_vm2 = vmmov 0   ;;  %v2032_v28 = vlaneseq }
 0x44e   : > { %v4752_v35 = vld [vmem:[%s6785_s11] sm:$0xff]   ;;  %4359 = vmatprep.subr.bf16.mxu0 %v5761_v36  ;;  %4379 = vmatprep.subr.bf16.mxu1 %v5761_v36  ;;  %v4754_v38 = vld [vmem:[%s6785_s11 + $0x8] sm:$0xff]   ;;  %v4756_v45 = vld [vmem:[%s6785_s11 + $0x10] sm:$0xff]   ;;  %s7395_s5 = scalar_lea.vmem [#allocation12], %s6766_s18  ;;  %s7396_s12 = scalar_lea.vmem [#allocation14], %s6766_s18  ;;  %vm2407_vm3 = vcmask 261120  }
 0x44f   : > { %4360 = vmatpush3.bf16.msra.mxu0 %v4751_v34  ;;  %4380 = vmatpush3.bf16.msra.mxu1 %v4752_v35  ;;  %v4757_v46 = vld [vmem:[%s6777_s26 + $0x18] sm:$0xff]   ;;  %v4759_v48 = vld [vmem:[%s6777_s26 + $0x20] sm:$0xff]   ;;  %v4761_v50 = vld [vmem:[%s6777_s26 + $0x28] sm:$0xff]   ;;  %s7397_s1 = scalar_lea.vmem [#allocation20], %s6766_s18  ;;  %s5765_s7 = smov 64   ;;  %vm2596_vm4 = vcmask 36864  }
 0x450   : > { %4361 = vmatprep.subr.bf16.mxu0 %v5761_v36  ;;  %4381 = vmatprep.subr.bf16.mxu1 %v5761_v36  ;;  %v4758_v47 = vld [vmem:[%s6785_s11 + $0x18] sm:$0xff]   ;;  %v4760_v49 = vld [vmem:[%s6785_s11 + $0x20] sm:$0xff]   ;;  %v4762_v51 = vld [vmem:[%s6785_s11 + $0x28] sm:$0xff]   ;;  %v5766_v26 = vmov 1983009808   ;;  %s7399_s13 = scalar_lea.vmem [#allocation23], %s6766_s18 }
 0x451   : > { %4375 = vmatprep.mubr.msk.bf16.mxu0 %vm5762_vm2, %v5761_v36  ;;  %4395 = vmatprep.mubr.msk.bf16.mxu1 %vm5762_vm2, %v5761_v36  ;;  %v4763_v52 = vld [vmem:[%s6777_s26 + $0x30] sm:$0xff]   ;;  %v4765_v54 = vld [vmem:[%s6777_s26 + $0x38] sm:$0xff]   ;;  %v4767_v1 = vld [vmem:[%s6793_s30] sm:$0xff]   ;;  %s5764_s26 = smov 96   ;;  %v2030_v27 = vunpack.c.l.s4 %v5766_v26  ;;  %v5767_v29 = vmov 1934713408  }
 0x452   : > { %v4764_v53 = vld [vmem:[%s6785_s11 + $0x30] sm:$0xff]   ;;  %v4766_v55 = vld [vmem:[%s6785_s11 + $0x38] sm:$0xff]   ;;  %v4771_v6 = vld [vmem:[%s6793_s30 + $0x20] sm:$0xff]   ;;  %s7398_s11 = scalar_lea.vmem [#allocation17], %s6766_s18  ;;  %v2062_v30 = vunpack.c.l.s4 %v5767_v29  ;;  %vm2649_vm5 = vcmask 1041408   ;;  %vm2650_vm6 = vcmask 1042432  }
 0x453   : > { %v1651_v32 = vld [vmem:[#allocation2] sm:$0x1f]  ;;  %4362 = vmatpush3.bf16.msra.mxu0 %v4753_v37  ;;  %4382 = vmatpush3.bf16.msra.mxu1 %v4754_v38  ;;  %v4768_v3 = vld [vmem:[%s6793_s30 + $0x8] sm:$0xff]   ;;  %v2031_v31 = vunpack.c.0.s8 %v2030_v27  ;;  %vm2645_vm7 = vcmask 39936   ;;  %vm2963_vm8 = vcmask 523264   ;;  %vm2965_vm9 = vcmask 785408  }
 0x454   : > { %v1655_v33 = vsel %vm1654_vm1, %v1651_v32, 0.0  ;;  %4363 = vmatprep.subr.bf16.mxu0 %v5761_v36  ;;  %4383 = vmatprep.subr.bf16.mxu1 %v5761_v36  ;;  %v4149_v60 = vld [vmem:[%s7395_s5] ss:$0 sm:$0xff]  ;;  %v4770_v5 = vld [vmem:[%s6793_s30 + $0x18] sm:$0xff]   ;;  %v4772_v7 = vld [vmem:[%s6793_s30 + $0x28] sm:$0xff]   ;;  %v2063_v35 = vunpack.c.0.s8 %v2062_v30  ;;  %s7401_s29 = scalar_lea.vmem [#allocation27], %s6766_s18 }
 0x455   : > { %1656 = vadd.xlane.f32.xlu0 %v1655_v33  ;;  %v4150_v62 = vld [vmem:[%s7396_s12] ss:$0 sm:$0xff]  ;;  %v4774_v9 = vld [vmem:[%s6793_s30 + $0x38] sm:$0xff]   ;;  %s7402_s10 = scalar_lea.vmem [#allocation29], %s6766_s18 }
 0x456   : > { %v4769_v4 = vld [vmem:[%s6793_s30 + $0x10] sm:$0xff]  }
 0x457   : > { %4364 = vmatpush3.bf16.msra.mxu0 %v4755_v39  ;;  %4384 = vmatpush3.bf16.msra.mxu1 %v4756_v45  ;;  %v4773_v8 = vld [vmem:[%s6793_s30 + $0x30] sm:$0xff]   ;;  %s5763_s30 = smov 32  }
 0x458   : > { %4365 = vmatprep.subr.bf16.mxu0 %v5761_v36  ;;  %4385 = vmatprep.subr.bf16.mxu1 %v5761_v36  ;;  %v4160_v10 = vld [vmem:[%s7397_s1] ss:$0 sm:$0xff] }
 0x459   : > { %v4151_v20 = vld [vmem:[%s7398_s11] ss:$0 sm:$0xff] }
 0x45b   : > { %4366 = vmatpush3.bf16.msra.mxu0 %v4757_v46  ;;  %4386 = vmatpush3.bf16.msra.mxu1 %v4758_v47 }
 0x45c   : > { %4367 = vmatprep.subr.bf16.mxu0 %v5761_v36  ;;  %4387 = vmatprep.subr.bf16.mxu1 %v5761_v36 }
 0x45f   : > { %4368 = vmatpush3.bf16.msra.mxu0 %v4759_v48  ;;  %4388 = vmatpush3.bf16.msra.mxu1 %v4760_v49 }
 0x460   : > { %4369 = vmatprep.subr.bf16.mxu0 %v5761_v36  ;;  %4389 = vmatprep.subr.bf16.mxu1 %v5761_v36 }
 0x463   : > { %4370 = vmatpush3.bf16.msra.mxu0 %v4761_v50  ;;  %4390 = vmatpush3.bf16.msra.mxu1 %v4762_v51 }
 0x464   : > { %4371 = vmatprep.subr.bf16.mxu0 %v5761_v36  ;;  %4391 = vmatprep.subr.bf16.mxu1 %v5761_v36 }
 0x467   : > { %4372 = vmatpush3.bf16.msra.mxu0 %v4763_v52  ;;  %4392 = vmatpush3.bf16.msra.mxu1 %v4764_v53 }
 0x468   : > { %4373 = vmatprep.subr.bf16.mxu0 %v5761_v36  ;;  %4393 = vmatprep.subr.bf16.mxu1 %v5761_v36 }
 0x46b   : > { %4374 = vmatpush3.bf16.msra.mxu0 %v4765_v54  ;;  %4394 = vmatpush3.bf16.msra.mxu1 %v4766_v55 }
 0x46c   : > { %4399 = vmatprep.subr.bf16.mxu0 %v5761_v36  ;;  %4419 = vmatprep.subr.bf16.mxu1 %v5761_v36 }
 0x4e2   : > { %v1657_v40 = vpop.xlane.xlu0 %1656 }
 0x4e3   : > { %v1659_v41 = vmul.f32 0.0078125, %v1657_v40 }
 0x4e5   : > { %v1660_v42 = vsub.f32 %v1651_v32, %v1659_v41  ;;  %v6923_v32 = vshrl.u32 %v2032_v28, 7 }
 0x4e7   : > { %v1661_v43 = vmul.f32 %v1660_v42, %v1660_v42  ;;  %v6926_v37 = vsub.s32 %v2031_v31, %v6923_v32 }
 0x4e9   : > { %v1662_v44 = vsel %vm1654_vm1, %v1661_v43, 0.0  ;;  %v6929_v43 = vsub.s32 %v2063_v35, %v6923_v32 }
 0x4ea   : > { %1663 = vadd.xlane.f32.xlu0 %v1662_v44 }
 0x577   : > { %v1664_v56 = vpop.xlane.xlu0 %1663 }
 0x578   : > { %v1665_v57 = vmul.f32 0.0078125, %v1664_v56 }
 0x57a   : > { %v1666_v58 = vadd.f32 1e-05, %v1665_v57 }
 0x57c   : > { %4823 = vrsqrt.f32 %v1666_v58 }
 0x586   : > { %v4824_v59 = vpop.eup %4823 }
 0x587   : > { %v1668_v61 = vmul.f32 %v4824_v59, %v1660_v42 }
 0x589   : > { %v1675_v63 = vmul.f32 %v4149_v60, %v1668_v61 }
 0x58b   : > { %v1682_v0 = vadd.f32 %v4150_v62, %v1675_v63 }
 0x58d   : > { %v1683_v2 = vpack.c.bf16 %v1682_v0, %v1682_v0 }
 0x58f   : > { %4376 = vmatmul.mubr.bf16.vlgmr.msra.gmra.mrb[0].mxu0 %v1683_v2  ;;  %4396 = vmatmul.mubr.bf16.vlgmr.msra.gmra.mrb[0].mxu1 %v1683_v2 }
 0x590   : > { %4400 = vmatpush3.bf16.msra.mxu0 %v4767_v1  ;;  %4415 = vmatprep.mubr.msk.bf16.mxu0 %vm5762_vm2, %v5761_v36 }
 0x591   : > { %4401 = vmatprep.subr.bf16.mxu0 %v5761_v36  ;;  %4421 = vmatprep.mubr.msk.bf16.mxu1 %vm5762_vm2, %v5761_v36 }
 0x594   : > { %4402 = vmatpush3.bf16.msra.mxu0 %v4768_v3 }
 0x595   : > { %4403 = vmatprep.subr.bf16.mxu0 %v5761_v36 }
 0x598   : > { %4404 = vmatpush3.bf16.msra.mxu0 %v4769_v4 }
 0x599   : > { %4405 = vmatprep.subr.bf16.mxu0 %v5761_v36 }
 0x59c   : > { %4406 = vmatpush3.bf16.msra.mxu0 %v4770_v5 }
 0x59d   : > { %4407 = vmatprep.subr.bf16.mxu0 %v5761_v36 }
 0x5a0   : > { %4408 = vmatpush3.bf16.msra.mxu0 %v4771_v6 }
 0x5a1   : > { %4409 = vmatprep.subr.bf16.mxu0 %v5761_v36 }
 0x5a4   : > { %4410 = vmatpush3.bf16.msra.mxu0 %v4772_v7 }
 0x5a5   : > { %4411 = vmatprep.subr.bf16.mxu0 %v5761_v36 }
 0x5a8   : > { %4412 = vmatpush3.bf16.msra.mxu0 %v4773_v8 }
 0x5a9   : > { %4413 = vmatprep.subr.bf16.mxu0 %v5761_v36 }
 0x5ac   : > { %4414 = vmatpush3.bf16.msra.mxu0 %v4774_v9 }
 0x5ad   : > { %4467 = vmatprep.subr.bf16.mxu0 %v5761_v36 }
 0x5af   : > { %4416 = vmatmul.mubr.bf16.vlgmr.msra.gmra.mrb[4].mxu0 %v1683_v2 }
 0x5b0   : > { %4483 = vmatprep.mubr.msk.bf16.mxu0 %vm5762_vm2, %v5761_v36 }
 0x662   : > { %v1789_v11 = vpop.f32.mrb[0].mxu0  ;;  %v1900_v12 = vpop.f32.mrb[0].mxu1 }
 0x663   : > { %v1901_v13 = vadd.f32 %v4160_v10, %v1900_v12  ;;  %v4377_v14 = vpop.f32.mrb[1].mxu0  ;;  %v4397_v15 = vpop.f32.mrb[1].mxu1  ;;  %v1790_v21 = vadd.f32 %v4151_v20, %v1789_v11 }
 0x664   : > { %v1792_v16 = vpop.f32.mrb[2].mxu0  ;;  %v1903_v17 = vpop.f32.mrb[2].mxu1 }
 0x665   : > { %2154 = vrot.lane.b32.xlu0 %v1901_v13, %s5763_s30  ;;  %2148 = vrot.lane.b32.xlu1 %v1901_v13, %s5764_s26  ;;  %v4378_v18 = vpop.f32.mrb[3].mxu0  ;;  %v4398_v19 = vpop.f32.mrb[3].mxu1 }
 0x669   : > { %2151 = vrot.lane.b32.xlu1 %v1901_v13, %s5765_s7 }
 0x66d   : > { %2018 = vrot.lane.b32.xlu1 %v1790_v21, %s5764_s26 }
 0x671   : > { %2021 = vrot.lane.b32.xlu1 %v1790_v21, %s5765_s7 }
 0x675   : > { %2024 = vrot.lane.b32.xlu1 %v1790_v21, %s5763_s30 }
 0x682   : > { %v6921_v22 = vpop.f32.mrb[4].mxu0 }
 0x683   : > { %v4417_v23 = vpop.f32.mrb[5].mxu0 }
 0x684   : > { %v2014_v24 = vpop.f32.mrb[6].mxu0 }
 0x685   : > { %v4418_v25 = vpop.f32.mrb[7].mxu0 }
 0x6d7   : > { %v2155_v33 = vpop.permute.xlu0 %2154  ;;  %v2149_v34 = vpop.permute.xlu1 %2148 }
 0x6d8   : > { %v2173_v38 = vcombine.low %v2149_v34, %v2155_v33  ;;  %v2174_v39 = vcombine.high %v2149_v34, %v2155_v33 }
 0x6da   : > { %v2181_v44 = vrot.slane %v2173_v38, %v6926_v37  ;;  %v2188_v45 = vrot.slane %v2174_v39, %v6926_v37 }
 0x6db   : > { %v2152_v40 = vpop.permute.xlu1 %2151 }
 0x6dc   : > { %v2157_v41 = vcombine.low %v1901_v13, %v2152_v40  ;;  %v2158_v42 = vcombine.high %v1901_v13, %v2152_v40 }
 0x6de   : > { %v2165_v46 = vrot.slane %v2157_v41, %v6926_v37  ;;  %v2172_v47 = vrot.slane %v2158_v42, %v6926_v37 }
 0x6df   : > { %v2019_v48 = vpop.permute.xlu1 %2018 }
 0x6e0   : > { %v2189_v49 = vcombine.low %v2165_v46, %v2181_v44  ;;  %v2190_v50 = vcombine.high %v2165_v46, %v2181_v44  ;;  %v2205_v51 = vcombine.low %v2172_v47, %v2188_v45 }
 0x6e2   : > { %v2197_v52 = vrot.slane %v2189_v49, %v6929_v43  ;;  %v2204_v53 = vrot.slane %v2190_v50, %v6929_v43  ;;  %v2230_v54 = vrot.slane %v2205_v51, %v6929_v43 }
 0x6e3   : > { %v2022_v55 = vpop.permute.xlu1 %2021 }
 0x6e4   : > { %v2208_v56 = vcombine.low %v2197_v52, %v2204_v53  ;;  %v4179_v57 = vcombine.high %v2197_v52, %v2204_v53  ;;  %v2237_v58 = vrot.slane %v2230_v54, %v6926_v37  ;;  %v2027_v59 = vcombine.low %v1790_v21, %v2022_v55 }
 0x6e5   : > { %v2028_v62 = vcombine.high %v1790_v21, %v2022_v55 }
 0x6e6   : > { %v2215_v60 = vrot.slane %v2208_v56, %v6926_v37  ;;  %v2223_v61 = vrot.slane %v4179_v57, %v6926_v37  ;;  %v2035_v3 = vrot.slane %v2027_v59, %v6926_v37  ;;  %v2261_v4 = vrot.slane %v2237_v58, %v6929_v43 }
 0x6e7   : > { %v2025_v63 = vpop.permute.xlu1 %2024  ;;  %v2042_v5 = vrot.slane %v2028_v62, %v6926_v37  ;;  %v2254_v29 = vcombine.high %v2237_v58, %v5761_v36 }
 0x6e8   : > { %v2043_v0 = vcombine.low %v2019_v48, %v2025_v63  ;;  %v2044_v1 = vcombine.high %v2019_v48, %v2025_v63  ;;  %v2238_v2 = vcombine.low %v2215_v60, %v2223_v61  ;;  %v2239_v26 = vcombine.high %v2215_v60, %v2223_v61 }
 0x6e9   : > { %v2268_v35 = vrot.slane %v2254_v29, %v6929_v43 }
 0x6ea   : > { %v2051_v6 = vrot.slane %v2043_v0, %v6926_v37  ;;  %v2058_v7 = vrot.slane %v2044_v1, %v6926_v37  ;;  %v2246_v8 = vrot.slane %v2238_v2, %v6929_v43  ;;  %v2253_v33 = vrot.slane %v2239_v26, %v6929_v43 }
 0x6ec   : > { %v2059_v9 = vcombine.low %v2035_v3, %v2051_v6  ;;  %v2060_v10 = vcombine.high %v2035_v3, %v2051_v6  ;;  %v2075_v11 = vcombine.low %v2042_v5, %v2058_v7  ;;  %v2269_v12 = vcombine.low %v2246_v8, %v2261_v4 }
 0x6ed   : > { %v2270_v25 = vcombine.high %v2246_v8, %v2261_v4  ;;  %v2271_v39 = vcombine.low %v2253_v33, %v2268_v35  ;;  %v2272_v49 = vcombine.high %v2253_v33, %v2268_v35 }
 0x6ee   : > { %v2067_v13 = vrot.slane %v2059_v9, %v6929_v43  ;;  %v2074_v14 = vrot.slane %v2060_v10, %v6929_v43  ;;  %v2100_v15 = vrot.slane %v2075_v11, %v6929_v43  ;;  %v2273_v16 = vpack.c.bf16 %v2269_v12, %v2269_v12 }
 0x6ef   : > { %v2274_v31 = vpack.c.bf16 %v2270_v25, %v2270_v25  ;;  %v2275_v44 = vpack.c.bf16 %v2271_v39, %v2271_v39  ;;  %v2276_v51 = vpack.c.bf16 %v2272_v49, %v2272_v49 }
 0x6f0   : > { %v2078_v17 = vcombine.low %v2067_v13, %v2074_v14  ;;  %v4178_v18 = vcombine.high %v2067_v13, %v2074_v14  ;;  %v2412_v19 = vsel %vm2407_vm3, %v2273_v16, 0  ;;  %v2107_v23 = vrot.slane %v2100_v15, %v6926_v37  ;;  %v4169_v16 = vld [vmem:[%s7399_s13] ss:$0 sm:$0xff] }
 0x6f1   : > { %4420 = vmatpush3.bf16.xpose.msra.mxu1 %v2412_v19  ;;  %v2458_v38 = vsel %vm2407_vm3, %v2274_v31, 0  ;;  %v2504_v48 = vsel %vm2407_vm3, %v2275_v44, 0  ;;  %v2550_v53 = vsel %vm2407_vm3, %v2276_v51, 0 }
 0x6f2   : > { %v2085_v20 = vrot.slane %v2078_v17, %v6926_v37  ;;  %v2093_v21 = vrot.slane %v4178_v18, %v6926_v37  ;;  %4425 = vmatprep.subr.bf16.mxu1 %v5761_v36  ;;  %v2131_v27 = vrot.slane %v2107_v23, %v6929_v43  ;;  %v2124_v42 = vcombine.high %v2107_v23, %v5761_v36 }
 0x6f3   : > { %v2012_v17 = vadd.f32 %v4169_v16, %v6921_v22 }
 0x6f4   : > { %v2108_v24 = vcombine.low %v2085_v20, %v2093_v21  ;;  %v2109_v40 = vcombine.high %v2085_v20, %v2093_v21  ;;  %v2138_v47 = vrot.slane %v2124_v42, %v6929_v43 }
 0x6f6   : > { %v2116_v28 = vrot.slane %v2108_v24, %v6929_v43  ;;  %v2123_v46 = vrot.slane %v2109_v40, %v6929_v43 }
 0x6f8   : > { %v2139_v30 = vcombine.low %v2116_v28, %v2131_v27  ;;  %v2140_v41 = vcombine.high %v2116_v28, %v2131_v27  ;;  %v2141_v50 = vcombine.low %v2123_v46, %v2138_v47  ;;  %v2142_v54 = vcombine.high %v2123_v46, %v2138_v47 }
 0x6fa   : > { %v2143_v34 = vpack.c.bf16 %v2139_v30, %v2139_v30  ;;  %v2144_v45 = vpack.c.bf16 %v2140_v41, %v2140_v41  ;;  %v2145_v52 = vpack.c.bf16 %v2141_v50, %v2141_v50  ;;  %v2146_v55 = vpack.c.bf16 %v2142_v54, %v2142_v54 }
 0x6fc   : > { %4422 = vmatmul.mubr.msk.bf16.vlgmr.msra.gmra.mrb[4].mxu1 %vm2407_vm3, %v2143_v34 }
 0x6fd   : > { %4426 = vmatpush3.bf16.xpose.msra.mxu1 %v2458_v38  ;;  %4427 = vmatprep.mubr.msk.bf16.mxu1 %vm5762_vm2, %v5761_v36 }
 0x6fe   : > { %4431 = vmatprep.subr.bf16.mxu1 %v5761_v36 }
 0x704   : > { %4428 = vmatmul.mubr.msk.bf16.vlgmr.msra.gmra.mrb[8].mxu1 %vm2407_vm3, %v2144_v45 }
 0x705   : > { %4432 = vmatpush3.bf16.xpose.msra.mxu1 %v2504_v48  ;;  %4433 = vmatprep.mubr.msk.bf16.mxu1 %vm5762_vm2, %v5761_v36 }
 0x706   : > { %4437 = vmatprep.subr.bf16.mxu1 %v5761_v36 }
 0x70c   : > { %4434 = vmatmul.mubr.msk.bf16.vlgmr.msra.gmra.mrb[12].mxu1 %vm2407_vm3, %v2145_v52 }
 0x70d   : > { %4438 = vmatpush3.bf16.xpose.msra.mxu1 %v2550_v53  ;;  %4439 = vmatprep.mubr.msk.bf16.mxu1 %vm5762_vm2, %v5761_v36 }
 0x70e   : > { %4443 = vmatprep.subr.bf16.mxu1 %v5761_v36 }
 0x714   : > { %4440 = vmatmul.mubr.msk.bf16.vlgmr.msra.gmra.mrb[16].mxu1 %vm2407_vm3, %v2146_v55 }
 0x715   : > { %4445 = vmatprep.mubr.msk.bf16.mxu1 %vm5762_vm2, %v5761_v36 }
 0x7cf   : > { %v2448_v56 = vpop.f32.mrb[4].mxu1 }
 0x7d0   : > { %v2592_v57 = vmul.f32 0.17677669, %v2448_v56  ;;  %v4423_v58 = vpop.f32.mrb[5].mxu1 }
 0x7d1   : > { %v2451_v59 = vpop.f32.mrb[6].mxu1 }
 0x7d2   : > { %v4424_v60 = vpop.f32.mrb[7].mxu1  ;;  %v2597_v61 = vsel %vm2596_vm4, %v2592_v57, -inf }
 0x7d3   : > { %2598 = vmax.xlane.f32.xlu1 %v2597_v61 }
 0x7d7   : > { %v2494_v62 = vpop.f32.mrb[8].mxu1 }
 0x7d8   : > { %v2593_v63 = vmul.f32 0.17677669, %v2494_v62  ;;  %v4429_v0 = vpop.f32.mrb[9].mxu1 }
 0x7d9   : > { %v2497_v1 = vpop.f32.mrb[10].mxu1 }
 0x7da   : > { %v4430_v2 = vpop.f32.mrb[11].mxu1  ;;  %v2600_v3 = vsel %vm2596_vm4, %v2593_v63, -inf }
 0x7db   : > { %2601 = vmax.xlane.f32.xlu0 %v2600_v3 }
 0x7df   : > { %v2540_v4 = vpop.f32.mrb[12].mxu1 }
 0x7e0   : > { %v2594_v5 = vmul.f32 0.17677669, %v2540_v4  ;;  %v4435_v6 = vpop.f32.mrb[13].mxu1 }
 0x7e1   : > { %v2543_v7 = vpop.f32.mrb[14].mxu1 }
 0x7e2   : > { %v4436_v8 = vpop.f32.mrb[15].mxu1  ;;  %v2603_v9 = vsel %vm2596_vm4, %v2594_v5, -inf }
 0x7e3   : > { %2604 = vmax.xlane.f32.xlu1 %v2603_v9 }
 0x7e7   : > { %v2586_v10 = vpop.f32.mrb[16].mxu1 }
 0x7e8   : > { %v2595_v11 = vmul.f32 0.17677669, %v2586_v10  ;;  %v4441_v12 = vpop.f32.mrb[17].mxu1 }
 0x7e9   : > { %v2589_v13 = vpop.f32.mrb[18].mxu1 }
 0x7ea   : > { %v4442_v14 = vpop.f32.mrb[19].mxu1  ;;  %v2606_v15 = vsel %vm2596_vm4, %v2595_v11, -inf }
 0x7eb   : > { %2607 = vmax.xlane.f32.xlu1 %v2606_v15 }
 0x7fc   : > { %2278 = vrot.lane.b32.xlu1 %v2012_v17, %s5764_s26 }
 0x800   : > { %2284 = vrot.lane.b32.xlu1 %v2012_v17, %s5763_s30 }
 0x860   : > { %v2599_v18 = vpop.xlane.xlu1 %2598 }
 0x861   : > { %v2609_v19 = vsub.f32 %v2592_v57, %v2599_v18 }
 0x863   : > { %v2613_v20 = vmul.f32 1.442695, %v2609_v19 }
 0x865   : > { %4825 = vpow2.f32 %v2613_v20 }
 0x868   : > { %v2602_v21 = vpop.xlane.xlu0 %2601 }
 0x869   : > { %v2610_v23 = vsub.f32 %v2593_v63, %v2602_v21 }
 0x86b   : > { %v2615_v24 = vmul.f32 1.442695, %v2610_v23 }
 0x86d   : > { %4827 = vpow2.f32 %v2615_v24 }
 0x86f   : > { %v4826_v25 = vpop.eup %4825 }
 0x870   : > { %v2621_v26 = vsel %vm2596_vm4, %v4826_v25, 0.0  ;;  %v2605_v28 = vpop.xlane.xlu1 %2604 }
 0x871   : > { %2622 = vadd.xlane.f32.xlu0 %v2621_v26  ;;  %v2611_v29 = vsub.f32 %v2594_v5, %v2605_v28  ;;  %v5768_v5 = vmov 65535  }
 0x872   : > { %v2651_v6 = vsel %vm2649_vm5, 4294967295, %v5768_v5 }
 0x873   : > { %v2617_v31 = vmul.f32 1.442695, %v2611_v29 }
 0x875   : > { %4829 = vpow2.f32 %v2617_v31 }
 0x877   : > { %v6991_v27 = vpop.eup %4827 }
 0x878   : > { %v2624_v22 = vsel %vm2596_vm4, %v6991_v27, 0.0  ;;  %v2608_v30 = vpop.xlane.xlu1 %2607 }
 0x879   : > { %2625 = vadd.xlane.f32.xlu1 %v2624_v22  ;;  %v2612_v33 = vsub.f32 %v2595_v11, %v2608_v30  ;;  %v2652_v11 = vsel %vm2650_vm6, %v2651_v6, 0 }
 0x87b   : > { %v2619_v34 = vmul.f32 1.442695, %v2612_v33 }
 0x87c   : > { %v2279_v41 = vpop.permute.xlu1 %2278 }
 0x87d   : > { %4831 = vpow2.f32 %v2619_v34 }
 0x87f   : > { %v6996_v35 = vpop.eup %4829 }
 0x880   : > { %v2627_v38 = vsel %vm2596_vm4, %v6996_v35, 0.0  ;;  %v2285_v42 = vpop.permute.xlu1 %2284 }
 0x881   : > { %v2303_v45 = vcombine.low %v2279_v41, %v2285_v42  ;;  %v2304_v46 = vcombine.high %v2279_v41, %v2285_v42 }
 0x883   : > { %v2311_v50 = vrot.slane %v2303_v45, %v6926_v37  ;;  %v2318_v51 = vrot.slane %v2304_v46, %v6926_v37  ;;  %v4777_v45 = vld [vmem:[%s6801_s27 + $0x10] sm:$0xff]   ;;  %v4778_v46 = vld [vmem:[%s6801_s27 + $0x18] sm:$0xff]  }
 0x887   : > { %2281 = vrot.lane.b32.xlu0 %v2012_v17, %s5765_s7  ;;  %v7000_v39 = vpop.eup %4831 }
 0x888   : > { %v2630_v40 = vsel %vm2596_vm4, %v7000_v39, 0.0 }
 0x8a6   : > { %2628 = vadd.xlane.f32.xlu0 %v2627_v38 }
 0x8aa   : > { %2631 = vadd.xlane.f32.xlu0 %v2630_v40 }
 0x8fe   : > { %v2623_v44 = vpop.xlane.xlu0 %2622 }
 0x8ff   : > { %4833 = vrcp.f32 %v2623_v44  ;;  %v4775_v44 = vld [vmem:[%s6801_s27] sm:$0xff]  }
 0x900   : > { %4468 = vmatpush3.bf16.msra.mxu0 %v4775_v44 }
 0x901   : > { %4469 = vmatprep.subr.bf16.mxu0 %v5761_v36 }
 0x902   : > { %v2282_v47 = vpop.permute.xlu0 %2281 }
 0x903   : > { %v2287_v48 = vcombine.low %v2012_v17, %v2282_v47  ;;  %v2288_v49 = vcombine.high %v2012_v17, %v2282_v47  ;;  %v4779_v47 = vld [vmem:[%s6801_s27 + $0x20] sm:$0xff]  }
 0x905   : > { %v2295_v52 = vrot.slane %v2287_v48, %v6926_v37  ;;  %v2302_v53 = vrot.slane %v2288_v49, %v6926_v37 }
 0x906   : > { %v2626_v1 = vpop.xlane.xlu1 %2625 }
 0x907   : > { %v2319_v54 = vcombine.low %v2295_v52, %v2311_v50  ;;  %v2320_v55 = vcombine.high %v2295_v52, %v2311_v50  ;;  %v2335_v56 = vcombine.low %v2302_v53, %v2318_v51  ;;  %4835 = vrcp.f32 %v2626_v1 }
 0x909   : > { %v2327_v57 = vrot.slane %v2319_v54, %v6929_v43  ;;  %v2334_v58 = vrot.slane %v2320_v55, %v6929_v43  ;;  %v2360_v59 = vrot.slane %v2335_v56, %v6929_v43  ;;  %v4834_v7 = vpop.eup %4833 }
 0x90a   : > { %v2637_v14 = vmul.f32 %v4834_v7, %v4826_v25 }
 0x90b   : > { %v2338_v60 = vcombine.low %v2327_v57, %v2334_v58  ;;  %v4180_v61 = vcombine.high %v2327_v57, %v2334_v58  ;;  %v2367_v0 = vrot.slane %v2360_v59, %v6926_v37 }
 0x90c   : > { %v2641_v19 = vpack.c.bf16 %v2637_v14, %v2637_v14 }
 0x90d   : > { %v2345_v62 = vrot.slane %v2338_v60, %v6926_v37  ;;  %v2353_v63 = vrot.slane %v4180_v61, %v6926_v37  ;;  %v2391_v3 = vrot.slane %v2367_v0, %v6929_v43  ;;  %v2384_v12 = vcombine.high %v2367_v0, %v5761_v36 }
 0x90f   : > { %v2368_v2 = vcombine.low %v2345_v62, %v2353_v63  ;;  %v2369_v8 = vcombine.high %v2345_v62, %v2353_v63  ;;  %v2398_v18 = vrot.slane %v2384_v12, %v6929_v43 }
 0x911   : > { %v2376_v4 = vrot.slane %v2368_v2, %v6929_v43  ;;  %v2383_v17 = vrot.slane %v2369_v8, %v6929_v43  ;;  %v4836_v20 = vpop.eup %4835 }
 0x912   : > { %v2638_v24 = vmul.f32 %v4836_v20, %v6991_v27 }
 0x913   : > { %v2399_v9 = vcombine.low %v2376_v4, %v2391_v3  ;;  %v2400_v10 = vcombine.high %v2376_v4, %v2391_v3  ;;  %v2401_v23 = vcombine.low %v2383_v17, %v2398_v18  ;;  %v2402_v27 = vcombine.high %v2383_v17, %v2398_v18  ;;  %v4782_v18 = vld [vmem:[%s6801_s27 + $0x38] sm:$0xff]  }
 0x914   : > { %v2642_v26 = vpack.c.bf16 %v2638_v24, %v2638_v24 }
 0x915   : > { %v2403_v13 = vpack.c.bf16 %v2399_v9, %v2399_v9  ;;  %v2404_v16 = vpack.c.bf16 %v2400_v10, %v2400_v10  ;;  %v2405_v25 = vpack.c.bf16 %v2401_v23, %v2401_v23  ;;  %v2406_v31 = vpack.c.bf16 %v2402_v27, %v2402_v27 }
 0x917   : > { %v2654_v15 = vand.u32 %v2652_v11, %v2403_v13  ;;  %v2700_v21 = vand.u32 %v2652_v11, %v2404_v16  ;;  %v2746_v22 = vand.u32 %v2652_v11, %v2405_v25  ;;  %v2792_v40 = vand.u32 %v2652_v11, %v2406_v31  ;;  %v4781_v11 = vld [vmem:[%s6801_s27 + $0x30] sm:$0xff]  }
 0x919   : > { %4444 = vmatpush3.bf16.msra.mxu1 %v2654_v15 }
 0x91a   : > { %4449 = vmatprep.subr.bf16.mxu1 %v5761_v36 }
 0x91c   : > { %4446 = vmatmul.mubr.msk.bf16.vlgmr.msra.gmra.mrb[20].mxu1 %vm2645_vm7, %v2641_v19 }
 0x91d   : > { %4450 = vmatpush3.bf16.msra.mxu1 %v2700_v21  ;;  %4451 = vmatprep.mubr.msk.bf16.mxu1 %vm5762_vm2, %v5761_v36 }
 0x91e   : > { %4455 = vmatprep.subr.bf16.mxu1 %v5761_v36 }
 0x924   : > { %4452 = vmatmul.mubr.msk.bf16.vlgmr.msra.gmra.mrb[24].mxu1 %vm2645_vm7, %v2642_v26 }
 0x925   : > { %4456 = vmatpush3.bf16.msra.mxu1 %v2746_v22  ;;  %4457 = vmatprep.mubr.msk.bf16.mxu1 %vm5762_vm2, %v5761_v36 }
 0x926   : > { %4461 = vmatprep.subr.bf16.mxu1 %v5761_v36 }
 0x933   : > { %v2629_v28 = vpop.xlane.xlu0 %2628 }
 0x934   : > { %4837 = vrcp.f32 %v2629_v28 }
 0x937   : > { %v2632_v29 = vpop.xlane.xlu0 %2631 }
 0x938   : > { %4839 = vrcp.f32 %v2632_v29 }
 0x93e   : > { %v4838_v30 = vpop.eup %4837 }
 0x93f   : > { %v2639_v33 = vmul.f32 %v4838_v30, %v6996_v35  ;;  %v4776_v35 = vld [vmem:[%s6801_s27 + $0x8] sm:$0xff]  }
 0x940   : > { %4470 = vmatpush3.bf16.msra.mxu0 %v4776_v35 }
 0x941   : > { %v2643_v34 = vpack.c.bf16 %v2639_v33, %v2639_v33  ;;  %4471 = vmatprep.subr.bf16.mxu0 %v5761_v36 }
 0x942   : > { %v4840_v38 = vpop.eup %4839 }
 0x943   : > { %4458 = vmatmul.mubr.msk.bf16.vlgmr.msra.gmra.mrb[28].mxu1 %vm2645_vm7, %v2643_v34  ;;  %v2640_v41 = vmul.f32 %v4840_v38, %v7000_v39  ;;  %v4780_v39 = vld [vmem:[%s6801_s27 + $0x28] sm:$0xff]   ;;  %s7400_s27 = scalar_lea.vmem [#allocation26], %s6766_s18 }
 0x944   : > { %4462 = vmatpush3.bf16.msra.mxu1 %v2792_v40  ;;  %4463 = vmatprep.mubr.msk.bf16.mxu1 %vm5762_vm2, %v5761_v36 }
 0x945   : > { %v2644_v42 = vpack.c.bf16 %v2640_v41, %v2640_v41  ;;  %4472 = vmatpush3.bf16.msra.mxu0 %v4777_v45  ;;  %v4190_v41 = vld [vmem:[%s7400_s27] ss:$0 sm:$0xff] }
 0x946   : > { %4473 = vmatprep.subr.bf16.mxu0 %v5761_v36 }
 0x949   : > { %4474 = vmatpush3.bf16.msra.mxu0 %v4778_v46  ;;  %v4847_v46 = vld [vmem:[#allocation2] sm:$0x1f] }
 0x94a   : > { %4475 = vmatprep.subr.bf16.mxu0 %v5761_v36 }
 0x94b   : > { %4464 = vmatmul.mubr.msk.bf16.vlgmr.msra.gmra.mrb[32].mxu1 %vm2645_vm7, %v2644_v42 }
 0x94d   : > { %4476 = vmatpush3.bf16.msra.mxu0 %v4779_v47 }
 0x94e   : > { %4477 = vmatprep.subr.bf16.mxu0 %v5761_v36 }
 0x951   : > { %4478 = vmatpush3.bf16.msra.mxu0 %v4780_v39 }
 0x952   : > { %4479 = vmatprep.subr.bf16.mxu0 %v5761_v36 }
 0x955   : > { %4480 = vmatpush3.bf16.msra.mxu0 %v4781_v11  ;;  %v4199_v11 = vld [vmem:[%s7401_s29] ss:$0 sm:$0xff] }
 0x956   : > { %4481 = vmatprep.subr.bf16.mxu0 %v5761_v36 }
 0x959   : > { %4482 = vmatpush3.bf16.msra.mxu0 %v4782_v18  ;;  %v4808_v18 = vld [vmem:[%s6827_s14] sm:$0xff]  }
 0x9ef   : > { %v2690_v48 = vpop.f32.mrb[20].mxu1 }
 0x9f0   : > { %v4447_v49 = vpop.f32.mrb[21].mxu1 }
 0x9f1   : > { %v2693_v50 = vpop.f32.mrb[22].mxu1  ;;  %v4783_v49 = vld [vmem:[%s6817_s0] ss:$8 sps:$4 sm:$0xff]  }
 0x9f2   : > { %v4448_v51 = vpop.f32.mrb[23].mxu1  ;;  %v4785_v50 = vld [vmem:[%s6817_s0 + $0x4] ss:$8 sps:$4 sm:$0xff]  }
 0x9f3   : > { %v4788_v51 = vld [vmem:[%s6817_s0 + $0x14] ss:$8 sps:$4 sm:$0xff]   ;;  %3218 = vmatprep.subr.bf16.mxu1 %v4785_v50 }
 0x9f4   : > { %3219 = vmatpush1.bf16.msra.mxu1 %v4783_v49 }
 0x9f5   : > { %3220 = vmatprep.subr.bf16.mxu1 %v4788_v51 }
 0x9f7   : > { %v2736_v52 = vpop.f32.mrb[24].mxu1 }
 0x9f8   : > { %v4453_v53 = vpop.f32.mrb[25].mxu1 }
 0x9f9   : > { %v2739_v54 = vpop.f32.mrb[26].mxu1  ;;  %v4791_v53 = vld [vmem:[%s6817_s0 + $0x24] ss:$8 sps:$4 sm:$0xff]  }
 0x9fa   : > { %v4454_v55 = vpop.f32.mrb[27].mxu1  ;;  %v4789_v54 = vld [vmem:[%s6817_s0 + $0x20] ss:$8 sps:$4 sm:$0xff]  }
 0xa16   : > { %v2782_v56 = vpop.f32.mrb[28].mxu1 }
 0xa17   : > { %v2834_v57 = vcombine.low %v2690_v48, %v2782_v56  ;;  %v2835_v58 = vcombine.high %v2690_v48, %v2782_v56  ;;  %v4459_v59 = vpop.f32.mrb[29].mxu1 }
 0xa18   : > { %v2785_v60 = vpop.f32.mrb[30].mxu1 }
 0xa19   : > { %v4460_v61 = vpop.f32.mrb[31].mxu1  ;;  %v2842_v3 = vrot.slane %v2834_v57, %v6926_v37  ;;  %v2849_v4 = vrot.slane %v2835_v58, %v6926_v37  ;;  %v4794_v60 = vld [vmem:[%s6817_s0 + $0x34] ss:$8 sps:$4 sm:$0xff]  }
 0xa1a   : > { %v4792_v61 = vld [vmem:[%s6817_s0 + $0x30] ss:$8 sps:$4 sm:$0xff]  }
 0xa1e   : > { %v2828_v62 = vpop.f32.mrb[32].mxu1 }
 0xa1f   : > { %v2850_v63 = vcombine.low %v2736_v52, %v2828_v62  ;;  %v2851_v0 = vcombine.high %v2736_v52, %v2828_v62  ;;  %v4465_v1 = vpop.f32.mrb[33].mxu1  ;;  %v4786_v52 = vld [vmem:[%s6817_s0 + $0x10] ss:$8 sps:$4 sm:$0xff]   ;;  %v4797_v62 = vld [vmem:[%s6817_s0 + $0x44] ss:$8 sps:$4 sm:$0xff]  }
 0xa20   : > { %v2831_v2 = vpop.f32.mrb[34].mxu1  ;;  %3221 = vmatpush1.bf16.msra.mxu1 %v4786_v52  ;;  %v4798_v1 = vld [vmem:[%s6817_s0 + $0x50] ss:$8 sps:$4 sm:$0xff]  }
 0xa21   : > { %v2858_v5 = vrot.slane %v2850_v63, %v6926_v37  ;;  %v2865_v6 = vrot.slane %v2851_v0, %v6926_v37  ;;  %v4466_v7 = vpop.f32.mrb[35].mxu1  ;;  %3222 = vmatprep.subr.bf16.mxu1 %v4791_v53  ;;  %v4795_v63 = vld [vmem:[%s6817_s0 + $0x40] ss:$8 sps:$4 sm:$0xff]   ;;  %v4800_v0 = vld [vmem:[%s6817_s0 + $0x54] ss:$8 sps:$4 sm:$0xff]  }
 0xa22   : > { %v4803_v2 = vld [vmem:[%s6817_s0 + $0x64] ss:$8 sps:$4 sm:$0xff]  }
 0xa23   : > { %v2866_v8 = vcombine.low %v2842_v3, %v2858_v5  ;;  %v2867_v9 = vcombine.high %v2842_v3, %v2858_v5  ;;  %v2882_v10 = vcombine.low %v2849_v4, %v2865_v6  ;;  %v4801_v3 = vld [vmem:[%s6817_s0 + $0x60] ss:$8 sps:$4 sm:$0xff]   ;;  %v4806_v4 = vld [vmem:[%s6817_s0 + $0x74] ss:$8 sps:$4 sm:$0xff]   ;;  %v4804_v5 = vld [vmem:[%s6817_s0 + $0x70] ss:$8 sps:$4 sm:$0xff]  }
 0xa24   : > { %3223 = vmatpush1.bf16.msra.mxu1 %v4789_v54  ;;  %v5769_v6 = vmov 0  }
 0xa25   : > { %v2874_v12 = vrot.slane %v2866_v8, %v6929_v43  ;;  %v2881_v13 = vrot.slane %v2867_v9, %v6929_v43  ;;  %v2907_v14 = vrot.slane %v2882_v10, %v6929_v43  ;;  %3224 = vmatprep.subr.bf16.mxu1 %v4794_v60  ;;  %3250 = vmatprep.mubr.bf16.mxu1 %v5769_v6 }
 0xa27   : > { %v2885_v15 = vcombine.low %v2874_v12, %v2881_v13  ;;  %v4189_v16 = vcombine.high %v2874_v12, %v2881_v13  ;;  %v2914_v17 = vrot.slane %v2907_v14, %v6926_v37  ;;  %v4200_v13 = vld [vmem:[%s7402_s10] ss:$0 sm:$0xff] }
 0xa28   : > { %3225 = vmatpush1.bf16.msra.mxu1 %v4792_v61 }
 0xa29   : > { %v2892_v19 = vrot.slane %v2885_v15, %v6926_v37  ;;  %v2900_v20 = vrot.slane %v4189_v16, %v6926_v37  ;;  %v2931_v21 = vcombine.high %v2914_v17, %v5761_v36  ;;  %v2938_v28 = vrot.slane %v2914_v17, %v6929_v43  ;;  %3226 = vmatprep.subr.bf16.mxu1 %v4797_v62  ;;  %v4807_v17 = vld [vmem:[%s6827_s14 + $0x40] sm:$0xff]  }
 0xa2a   : > { %4328 = vmatprep.subr.bf16.mxu0 %v4807_v17 }
 0xa2b   : > { %v2916_v23 = vcombine.high %v2892_v19, %v2900_v20  ;;  %v2915_v24 = vcombine.low %v2892_v19, %v2900_v20  ;;  %v2945_v26 = vrot.slane %v2931_v21, %v6929_v43  ;;  %v4809_v19 = vld [vmem:[%s6827_s14 + $0x48] sm:$0xff]   ;;  %v4811_v21 = vld [vmem:[%s6827_s14 + $0x50] sm:$0xff]  }
 0xa2c   : > { %3227 = vmatpush1.bf16.msra.mxu1 %v4795_v63  ;;  %v4810_v20 = vld [vmem:[%s6827_s14 + $0x8] sm:$0xff]  }
 0xa2d   : > { %v2930_v25 = vrot.slane %v2916_v23, %v6929_v43  ;;  %v2923_v22 = vrot.slane %v2915_v24, %v6929_v43  ;;  %3228 = vmatprep.subr.bf16.mxu1 %v4800_v0  ;;  %v4812_v23 = vld [vmem:[%s6827_s14 + $0x10] sm:$0xff]   ;;  %v4813_v24 = vld [vmem:[%s6827_s14 + $0x58] sm:$0xff]  }
 0xa2f   : > { %v2948_v29 = vcombine.low %v2930_v25, %v2945_v26  ;;  %v2947_v27 = vcombine.high %v2923_v22, %v2938_v28  ;;  %v2949_v30 = vcombine.high %v2930_v25, %v2945_v26  ;;  %v2946_v31 = vcombine.low %v2923_v22, %v2938_v28  ;;  %v4814_v25 = vld [vmem:[%s6827_s14 + $0x18] sm:$0xff]   ;;  %v4815_v26 = vld [vmem:[%s6827_s14 + $0x60] sm:$0xff]   ;;  %v4817_v28 = vld [vmem:[%s6827_s14 + $0x68] sm:$0xff]  }
 0xa30   : > { %3229 = vmatpush1.bf16.msra.mxu1 %v4798_v1  ;;  %v4816_v22 = vld [vmem:[%s6827_s14 + $0x20] sm:$0xff]  }
 0xa31   : > { %2955 = vrot.lane.b32.xlu0 %v2948_v29, %s5765_s7  ;;  %2951 = vrot.lane.b32.xlu1 %v2947_v27, %s5763_s30  ;;  %v4818_v29 = vld [vmem:[%s6827_s14 + $0x28] sm:$0xff]   ;;  %v4819_v27 = vld [vmem:[%s6827_s14 + $0x70] sm:$0xff]  }
 0xa32   : > { %3230 = vmatprep.subr.bf16.mxu1 %v4803_v2 }
 0xa34   : > { %3231 = vmatpush1.bf16.msra.mxu1 %v4801_v3 }
 0xa35   : > { %2959 = vrot.lane.b32.xlu1 %v2949_v30, %s5764_s26  ;;  %3232 = vmatprep.subr.bf16.mxu1 %v4806_v4  ;;  %v4820_v30 = vld [vmem:[%s6827_s14 + $0x30] sm:$0xff]  }
 0xa38   : > { %3233 = vmatpush1.bf16.msra.mxu1 %v4804_v5  ;;  %v4233_v5 = vld [vmem:[%s1303_s28] ss:$0 sm:$0xff] }
 0xaa3   : > { %v2952_v36 = vpop.permute.xlu1 %2951  ;;  %v2956_v37 = vpop.permute.xlu0 %2955 }
 0xaa4   : > { %v2962_v33 = vsel %vm2407_vm3, %v2946_v31, %v2952_v36  ;;  %v4821_v31 = vld [vmem:[%s6827_s14 + $0x78] sm:$0xff]  }
 0xaa5   : > { %v2964_v43 = vsel %vm2963_vm8, %v2962_v33, %v2956_v37  ;;  %v4822_v36 = vld [vmem:[%s6827_s14 + $0x38] sm:$0xff]   ;;  %v3130_v37 = vsub.s32 0, %v6923_v32  ;;  %s7403_s14 = sld [smem:[#allocation60_spill]] }
 0xaa6   : > { %v3126_v33 = vld [vmem:[%s6824_s2] sm:$0x3] }
 0xaa7   : > { %v2960_v34 = vpop.permute.xlu1 %2959 }
 0xaa8   : > { %v2966_v38 = vsel %vm2965_vm9, %v2964_v43, %v2960_v34  ;;  %v3134_v34 = vsub.s32 1, %v6923_v32  ;;  %v3131_v43 = vrot.slane %v3126_v33, %v3130_v37 }
 0xaa9   : > { %v2967_v40 = vpack.c.bf16 %v2966_v38, %v2966_v38 }
 0xaaa   : > { %v3135_v38 = vrot.slane %v3126_v33, %v3134_v34 }
 0xaab   : > { %4484 = vmatmul.mubr.bf16.vlgmr.msra.gmra.mrb[8].mxu0 %v2967_v40  ;;  %p4234_p3 = scmp.ne.s32.totalorder %s7403_s14, 1 }
 0xaac   : > { %4329 = vmatpush3.bf16.msra.mxu0 %v4808_v18  ;;  %vm3463_vm10 = vcmask (!%p4234_p3), 1040384   ;;  %v4850_v17 = vld [vmem:[#allocation39 + $0x10] sm:$0xff] (!%p4234_p3)   ;;  %v4851_v18 = vld [vmem:[#allocation39 + $0x18] sm:$0xff] (!%p4234_p3)   ;;  %vm5771_vm11 = vmmov (!%p4234_p3), 0   ;;  %v3496_v37 = vld [vmem:[#allocation41] sm:$0x1] (!%p4234_p3) }
 0xaad   : > { %4330 = vmatprep.subr.bf16.mxu0 %v4809_v19  ;;  %v4852_v19 = vld [vmem:[#allocation39 + $0x20] sm:$0xff] (!%p4234_p3)  }
 0xab0   : > { %4331 = vmatpush3.bf16.msra.mxu0 %v4810_v20  ;;  %v4853_v20 = vld [vmem:[#allocation39 + $0x28] sm:$0xff] (!%p4234_p3)  }
 0xab1   : > { %4332 = vmatprep.subr.bf16.mxu0 %v4811_v21  ;;  %v4854_v21 = vld [vmem:[#allocation39 + $0x30] sm:$0xff] (!%p4234_p3)  }
 0xab4   : > { %4333 = vmatpush3.bf16.msra.mxu0 %v4812_v23  ;;  %v4855_v23 = vld [vmem:[#allocation39 + $0x38] sm:$0xff] (!%p4234_p3)  }
 0xab5   : > { %4334 = vmatprep.subr.bf16.mxu0 %v4813_v24 }
 0xab8   : > { %4335 = vmatpush3.bf16.msra.mxu0 %v4814_v25 }
 0xab9   : > { %4336 = vmatprep.subr.bf16.mxu0 %v4815_v26 }
 0xabc   : > { %4337 = vmatpush3.bf16.msra.mxu0 %v4816_v22 }
 0xabd   : > { %4338 = vmatprep.subr.bf16.mxu0 %v4817_v28  ;;  %v3461_v28 = vld [vmem:[#allocation36] sm:$0x1] (!%p4234_p3) }
 0xac0   : > { %4339 = vmatpush3.bf16.msra.mxu0 %v4818_v29 }
 0xac1   : > { %4340 = vmatprep.subr.bf16.mxu0 %v4819_v27  ;;  %v3462_v27 = vld [vmem:[#allocation38] sm:$0x1] (!%p4234_p3) }
 0xac4   : > { %4341 = vmatpush3.bf16.msra.mxu0 %v4820_v30 }
 0xac5   : > { %4342 = vmatprep.subr.bf16.mxu0 %v4821_v31 }
 0xac8   : > { %4343 = vmatpush3.bf16.msra.mxu0 %v4822_v36 }
 0xb7e   : > { %v3073_v42 = vpop.f32.mrb[8].mxu0 }
 0xb7f   : > { %v3074_v44 = vadd.f32 %v4190_v41, %v3073_v42  ;;  %v4485_v35 = vpop.f32.mrb[9].mxu0 }
 0xb80   : > { %v3076_v45 = vpop.f32.mrb[10].mxu0 }
 0xb81   : > { %v7071_v47 = vadd.f32 %v4847_v46, %v3074_v44  ;;  %v4486_v39 = vpop.f32.mrb[11].mxu0 }
 0xb83   : > { %v3082_v48 = vsel %vm1654_vm1, %v7071_v47, 0.0 }
 0xb84   : > { %3083 = vadd.xlane.f32.xlu1 %v3082_v48 }
 0xc11   : > { %v3084_v55 = vpop.xlane.xlu1 %3083 }
 0xc12   : > { %v3085_v56 = vmul.f32 0.0078125, %v3084_v55 }
 0xc14   : > { %v3086_v57 = vsub.f32 %v7071_v47, %v3085_v56 }
 0xc16   : > { %v3087_v58 = vmul.f32 %v3086_v57, %v3086_v57 }
 0xc18   : > { %v3088_v59 = vsel %vm1654_vm1, %v3087_v58, 0.0 }
 0xc19   : > { %3089 = vadd.xlane.f32.xlu0 %v3088_v59 }
 0xca6   : > { %v3090_v7 = vpop.xlane.xlu0 %3089 }
 0xca7   : > { %v3091_v8 = vmul.f32 0.0078125, %v3090_v7 }
 0xca9   : > { %v3092_v9 = vadd.f32 1e-05, %v3091_v8 }
 0xcab   : > { %4841 = vrsqrt.f32 %v3092_v9 }
 0xcb5   : > { %v4842_v10 = vpop.eup %4841 }
 0xcb6   : > { %v3094_v12 = vmul.f32 %v4842_v10, %v3086_v57  ;;  %v4848_v10 = vld [vmem:[#allocation39] sm:$0xff] (!%p4234_p3)  }
 0xcb8   : > { %v3101_v14 = vmul.f32 %v4199_v11, %v3094_v12  ;;  %v5770_v11 = vmov (!%p4234_p3), 0.0   ;;  %v4849_v12 = vld [vmem:[#allocation39 + $0x8] sm:$0xff] (!%p4234_p3)  }
 0xcb9   : > { %4487 = vmatprep.subr.bf16.mxu0 (!%p4234_p3), %v5770_v11 }
 0xcba   : > { %v3108_v15 = vadd.f32 %v4200_v13, %v3101_v14 }
 0xcbc   : > { %v3109_v16 = vpack.c.bf16 %v3108_v15, %v3108_v15 }
 0xcbe   : > { %3251 = vmatmul.mubr.bf16.vlgmr.msra.gmra.mrb[36].mxu1 %v3109_v16 }
 0xd91   : > { %v3252_v40 = vpop.f32.mrb[36].mxu1 }
 0xd92   : > { %v3253_v41 = vadd.f32 %v3252_v40, %v3131_v43  ;;  %v3254_v42 = vpop.f32.mrb[37].mxu1 }
 0xd93   : > { %v3255_v44 = vadd.f32 %v3254_v42, %v3135_v38  ;;  %v3256_v35 = vpop.f32.mrb[38].mxu1 }
 0xd94   : > { %v3261_v45 = vmul.f32 0.044715, %v3253_v41  ;;  %v3257_v46 = vpop.f32.mrb[39].mxu1  ;;  %v3259_v57 = vmul.f32 0.5, %v3253_v41 }
 0xd95   : > { %v3262_v39 = vmul.f32 0.044715, %v3255_v44  ;;  %v3260_v59 = vmul.f32 0.5, %v3255_v44 }
 0xd96   : > { %v3263_v48 = vmul.f32 %v3261_v45, %v3253_v41 }
 0xd97   : > { %v3264_v49 = vmul.f32 %v3262_v39, %v3255_v44 }
 0xd98   : > { %v3265_v50 = vmul.f32 %v3263_v48, %v3253_v41 }
 0xd99   : > { %v3266_v51 = vmul.f32 %v3264_v49, %v3255_v44 }
 0xd9a   : > { %v3267_v52 = vadd.f32 %v3265_v50, %v3253_v41 }
 0xd9b   : > { %v3268_v53 = vadd.f32 %v3266_v51, %v3255_v44 }
 0xd9c   : > { %v3269_v54 = vmul.f32 0.7978846, %v3267_v52 }
 0xd9d   : > { %v3270_v55 = vmul.f32 0.7978846, %v3268_v53 }
 0xd9e   : > { %4843 = vtanh.f32 %v3269_v54 }
 0xd9f   : > { %4845 = vtanh.f32 %v3270_v55 }
 0xda8   : > { %v4844_v32 = vpop.eup %4843 }
 0xda9   : > { %v4846_v56 = vpop.eup %4845  ;;  %v3273_v58 = vadd.f32 1.0, %v4844_v32 }
 0xdaa   : > { %v3274_v60 = vadd.f32 1.0, %v4846_v56 }
 0xdab   : > { %v3275_v61 = vmul.f32 %v3273_v58, %v3259_v57 }
 0xdac   : > { %v3276_v62 = vmul.f32 %v3274_v60, %v3260_v59 }
 0xdad   : > { %v3277_v0 = vpack.c.bf16 %v3275_v61, %v3275_v61 }
 0xdae   : > { %v3278_v63 = vpack.c.bf16 %v3276_v62, %v3276_v62 }
 0xdb0   : > { %3439 = vmatprep.mubr.bf16.mxu0 %v3278_v63 }
 0xdb1   : > { %3440 = vmatmul.mubr.bf16.vlgmr.msra.gmra.mrb[12].mxu0 %v3277_v0 }
 0xdb2   : > { %4488 = vmatpush3.bf16.msra.mxu0 (!%p4234_p3), %v4848_v10  ;;  %4503 = vmatprep.mubr.msk.bf16.mxu0 (!%p4234_p3), %vm5771_vm11, %v5770_v11 }
 0xdb3   : > { %4489 = vmatprep.subr.bf16.mxu0 (!%p4234_p3), %v5770_v11 }
 0xdb6   : > { %4490 = vmatpush3.bf16.msra.mxu0 (!%p4234_p3), %v4849_v12 }
 0xdb7   : > { %4491 = vmatprep.subr.bf16.mxu0 (!%p4234_p3), %v5770_v11 }
 0xdba   : > { %4492 = vmatpush3.bf16.msra.mxu0 (!%p4234_p3), %v4850_v17 }
 0xdbb   : > { %4493 = vmatprep.subr.bf16.mxu0 (!%p4234_p3), %v5770_v11 }
 0xdbe   : > { %4494 = vmatpush3.bf16.msra.mxu0 (!%p4234_p3), %v4851_v18 }
 0xdbf   : > { %4495 = vmatprep.subr.bf16.mxu0 (!%p4234_p3), %v5770_v11 }
 0xdc2   : > { %4496 = vmatpush3.bf16.msra.mxu0 (!%p4234_p3), %v4852_v19 }
 0xdc3   : > { %4497 = vmatprep.subr.bf16.mxu0 (!%p4234_p3), %v5770_v11 }
 0xdc6   : > { %4498 = vmatpush3.bf16.msra.mxu0 (!%p4234_p3), %v4853_v20 }
 0xdc7   : > { %4499 = vmatprep.subr.bf16.mxu0 (!%p4234_p3), %v5770_v11 }
 0xdca   : > { %4500 = vmatpush3.bf16.msra.mxu0 (!%p4234_p3), %v4854_v21 }
 0xdcb   : > { %4501 = vmatprep.subr.bf16.mxu0 (!%p4234_p3), %v5770_v11 }
 0xdce   : > { %4502 = vmatpush3.bf16.msra.mxu0 (!%p4234_p3), %v4855_v23 }
 0xe84   : > { %v4344_v1 = vpop.f32.mrb[12].mxu0 }
 0xe85   : > { %v4345_v2 = vpop.f32.mrb[13].mxu0 }
 0xe86   : > { %v4346_v3 = vadd.f32 %v4345_v2, %v4344_v1  ;;  %v4347_v4 = vpop.f32.mrb[14].mxu0  ;;  %3460 = sbr.rel (%p4234_p3) target bundleno = 4254 (0x109e), region = 228 }
 0xe87   : > { %v4348_v6 = vpop.f32.mrb[15].mxu0 }
 0xe88   : > { %v3447_v7 = vadd.f32 %v4346_v3, %v7071_v47 }
 0xe8a   : > { %v3455_v8 = vadd.f32 %v4233_v5, %v3447_v7 }
 0xe8c   : > { %3456 = vst [vmem:[#allocation2] sm:$0x1f] %v3455_v8  ;;  %v3464_v9 = vsel (!%p4234_p3), %vm3463_vm10, %v3455_v8, 0.0 }
 0xe8d   : > { %3465 = vadd.xlane.f32.xlu0 %v3464_v9 }
 0xf1a   : > { %v3466_v13 = vpop.xlane.xlu0 %3465 }
 0xf1b   : > { %v3467_v14 = vmul.f32 0.0078125, %v3466_v13 }
 0xf1d   : > { %v3468_v15 = vsub.f32 %v3455_v8, %v3467_v14 }
 0xf1f   : > { %v3469_v47 = vmul.f32 %v3468_v15, %v3468_v15 }
 0xf21   : > { %v3470_v16 = vsel %vm3463_vm10, %v3469_v47, 0.0 }
 0xf22   : > { %3471 = vadd.xlane.f32.xlu0 %v3470_v16 }
 0xfaf   : > { %v3472_v24 = vpop.xlane.xlu0 %3471 }
 0xfb0   : > { %v3473_v25 = vmul.f32 0.0078125, %v3472_v24 }
 0xfb2   : > { %v3474_v26 = vadd.f32 1e-05, %v3473_v25 }
 0xfb4   : > { %4856 = vrsqrt.f32 %v3474_v26 }
 0xfbe   : > { %v4857_v22 = vpop.eup %4856 }
 0xfbf   : > { %v3476_v29 = vmul.f32 %v4857_v22, %v3468_v15 }
 0xfc1   : > { %v3477_v30 = vmul.f32 %v3476_v29, %v3461_v28 }
 0xfc3   : > { %v3478_v31 = vadd.f32 %v3477_v30, %v3462_v27 }
 0xfc5   : > { %v3479_v36 = vpack.c.bf16 %v3478_v31, %v3478_v31 }
 0xfc7   : > { %4504 = vmatmul.mubr.bf16.vlgmr.msra.gmra.mrb[0].mxu0 %v3479_v36 }
0x109a   : > { %v3579_v33 = vpop.f32.mrb[0].mxu0 }
0x109b   : > { %v3580_v34 = vadd.f32 %v3579_v33, %v3496_v37  ;;  %v4505_v43 = vpop.f32.mrb[1].mxu0 }
0x109c   : > { %v3582_v38 = vpop.f32.mrb[2].mxu0 }
0x109d   : > { %3585 = vst [vmem:[%s1455_s9] sm:$0x1] %v3580_v34  ;;  %v4506_v40 = vpop.f32.mrb[3].mxu0 }
0x109e PF: > { %s7404_s18 = sld [smem:[#allocation61_spill]]  ;;  %s7405_s2 = sld [smem:[#allocation71_spill]] }
0x109f   : > { %s7406_s12 = sld [smem:[#allocation95_spill]]  ;;  %s3599_s30 = sshll.u32 %s1455_s9, 4  ;;  %s3600_s30 = int_to_ptr.vmem [resolvable:$true] %s3599_s30 }
0x10a0   : > { %s3587_s26 = scalar_lea.sflag [#allocation5], %s6744_s19  ;;  %s5558_s11 = scalar_lea.vmem %s3600_s30, 16 }
0x10a1   : > { %p5559_p4 = scmp.ne.s32.totalorder %s3600_s30, %s5558_s11  ;;  %s5772_s7 = smov [#allocation42]  }
0x10a2   : > { %s5562_s13 = sshll.u32 %s5772_s7, 4  ;;  %s5563_s13 = int_to_ptr.vmem [resolvable:$false] %s5562_s13 }
0x10a3   : > { %s5564_s27 = scalar_lea.vmem %s5563_s13, 32  ;;  %p5565_p6 = scmp.lt.s32.totalorder %s3600_s30, %s5563_s13 }
0x10a4   : > { %s4243_s28 = sshll.u32 %s7404_s18, 4  ;;  %p7407_p8 = scmp.ne.s32.totalorder %s7405_s2, 0 }
0x10a5   : > { %s7126_s1 = scalar_lea.hbm %s7406_s12, %s4243_s28  ;;  %p5566_p1 = scmp.lt.s32.totalorder %s5564_s27, %s5558_s11 }
0x10a6   : > { %p5560_p7 = pnand %p5559_p4, %p7407_p8 }
0x10a7   : > { %p5567_p12 = por %p5566_p1, %p5565_p6 }
0x10a8   : > { %p5561_p10 = pneg %p5560_p7 }
0x10aa   : > { %p5568_p9 = pnand %p5567_p12, %p5561_p10 }
0x10ac   : > { %5571 = shalt.err (!%p5568_p9)
}
0x10ad   : > { %s5572_s19 = scalar_lea.hbm %s7126_s1, 16  ;;  %s5576_s10 = scalar_lea.hbm %s7406_s12, 32 }
0x10ae   : > { %p5573_p2 = scmp.ne.s32.totalorder %s7126_s1, %s5572_s19  ;;  %p5577_p0 = scmp.lt.u32.totalorder %s7126_s1, %s7406_s12 }
0x10af   : > { %p5578_p11 = scmp.lt.u32.totalorder %s5576_s10, %s5572_s19  ;;  %p5580_p4 = scmp.lt.u32.totalorder %s5572_s19, %s7126_s1 }
0x10b0   : > { %p5574_p13 = pnand %p5573_p2, %p7407_p8 }
0x10b1   : > { %p5579_p3 = por %p5578_p11, %p5577_p0 }
0x10b2   : > { %p5575_p5 = pneg %p5574_p13 }
0x10b3   : > { %p5581_p7 = por %p5580_p4, %p5579_p3 }
0x10b5   : > { %p5582_p10 = pnand %p5581_p7, %p5575_p5 }
0x10b7   : > { %5585 = shalt.err (!%p5582_p10)
}
0x10b8   : > { %4573 = dma.vmem_to_hbm [thread:$0]  (%p7407_p8), %s3600_s30, 16, %s7126_s1, %s3587_s26  }
0x10b9 PF: > { %s7408_s28 = sld [smem:[#allocation58_spill]]  ;;  %p4620_p6 = scmp.ge.s32.totalorder %s5728_s4, 2 }
0x10ba   : > { %s7409_s0 = sld [smem:[#allocation72_spill]] }
0x10bf   : > { %s3611_s5 = sand.u32 1, %s7408_s28  }
0x10c0   : > { %p7410_p1 = scmp.ne.s32.totalorder %s7409_s0, 0  ;;  %s3612_s11 = scalar_lea.sflag [#allocation5], %s3611_s5 }
0x10c2   : > { %p4601_p12 = pnand %p4620_p6, %p7410_p1 }
0x10c4   : > { %5683 = dma.done.wait (!%p4601_p12), %s3612_s11, 16  }
0x10c5   : > { %5685 = vsyncadd (!%p4601_p12), %s3612_s11, 4294967280  ;;  %s69_s4 = sadd.s32 1, %s5728_s4   ;;  %s7411_s29 = sld [smem:[#allocation57_spill]] }
0x10c6   : > { %p66_p9 = scmp.ge.s32.totalorder %s69_s4, 6   ;;  %s7412_s7 = sld [smem:[#allocation68_spill]] }
0x10c7   : > { %s7413_s30 = sld [smem:[#allocation59_spill]]  ;;  %s7414_s1 = sld [smem:[#allocation69_spill]] }
0x10c8   : > { %s7415_s13 = sld [smem:[#allocation62_spill]]  ;;  %s7416_s27 = sld [smem:[#allocation64_spill]] }
0x10c9   : > { %s7417_s19 = sld [smem:[#allocation66_spill]]  ;;  %s7418_s2 = smov %s5696_s6 }
0x10ca   : > { %s7422_s26 = smov %s5720_s8  ;;  %68 = sbr.rel (!%p66_p9) target bundleno = 52 (0x34), region = 397 }
0x10cc   : > { %s7419_s6 = smov %s7412_s7  ;;  %s7420_s7 = smov %s5708_s3 }
0x10cd   : > { %s7421_s3 = smov %s7414_s1 }
0x10ce   : > { %s7423_s1 = smov %s7415_s13  ;;  %s7424_s8 = smov %s7416_s27 }
0x10cf   : > { %s7425_s27 = smov %s7417_s19 }
0x10d1   :  { %3616 = vsyncpa [#allocation4], 1 }
0x10d2   :  { %3618 = vsyncpa [#allocation4 + $0x1], 1 }
0x10d3   :  { %3619 = vsyncpa [#allocation7], 1 }
0x10d4   :  { %3620 = vsyncpa [#allocation10], 1 }
0x10d5   :  { %3621 = vsyncpa [#allocation13], 1 }
0x10d6   :  { %3623 = vsyncpa [#allocation13 + $0x1], 1 }
0x10d7   :  { %3624 = vsyncpa [#allocation16], 1 }
0x10d8   :  { %3626 = vsyncpa [#allocation16 + $0x1], 1 }
0x10d9   :  { %3627 = vsyncpa [#allocation19], 1 }
0x10da   :  { %3629 = vsyncpa [#allocation19 + $0x1], 1 }
0x10db   :  { %3630 = vsyncpa [#allocation22], 1 }
0x10dc   :  { %3632 = vsyncpa [#allocation22 + $0x1], 1 }
0x10dd   :  { %3633 = vsyncpa [#allocation25], 1 }
0x10de   :  { %3635 = vsyncpa [#allocation25 + $0x1], 1 }
0x10df   :  { %3636 = vsyncpa [#allocation28], 1 }
0x10e0   :  { %3638 = vsyncpa [#allocation28 + $0x1], 1 }
0x10e1   :  { %3639 = vsyncpa [#allocation31], 1 }
0x10e2   :  { %3641 = vsyncpa [#allocation31 + $0x1], 1 }
0x10e3   :  { %3642 = vsyncpa [#allocation34], 1 }
0x10e4   :  { %3644 = vsyncpa [#allocation34 + $0x1], 1 }
0x10e5   :  { %3645 = vsyncpa [#allocation37], 1 }
0x10e6   :  { %3646 = vsyncpa [#allocation40], 1 }
0x10e7   :  { %3647 = vsyncpa [#allocation5], 1 }
0x10e8   :  { %3649 = vsyncpa [#allocation5 + $0x1], 1 }

</bundles_post_ra>
